<compile_context>
chip_gen: v5e
topology: v5e:2x2
jax: 0.10.0
libtpu: 0.0.40
codegen_flags: <defaults>
</compile_context>

<pallas_src>
import math

import jax
import jax.numpy as jnp
from jax.experimental import pallas as pl
from jax.experimental.pallas import tpu as pltpu

# Module hard-codes scale_factor = 1 / sqrt(1024) (matches D = 1024 here).
SCALE = 1.0 / math.sqrt(1024.0)


def _attn_kernel(q_ref, k_ref, v_ref, o_ref):
    # Blocks are (G, S, D): a batch of G full heads.
    q = q_ref[...]          # (G, S, D)
    k = k_ref[...]          # (G, S, D)
    v = v_ref[...]          # (G, S, D)

    # scores = q @ k^T * scale  -> (G, S, S).  Batched einsum contracts the D
    # axis of both operands directly, so no explicit k transpose (XLU copy)
    # is materialized; accumulation stays in f32 on the MXU.
    s = jnp.einsum("gqd,gkd->gqk", q, k,
                   preferred_element_type=jnp.float32) * SCALE

    # Numerically stable softmax over the last dim.  The normalization uses
    # pl.reciprocal (EUP path) + broadcast multiply instead of a VPU divide.
    # approx=False keeps full f32 accuracy for the tolerance check below.
    m = jnp.max(s, axis=-1, keepdims=True)
    e = jnp.exp(s - m)
    inv = pl.reciprocal(jnp.sum(e, axis=-1, keepdims=True), approx=False)
    p = e * inv

    # Dropout(p=0.02) is identity in eval/inference mode -> no-op here.
    # TODO(synk): training-mode dropout would need pltpu.prng_seed /
    # pltpu.prng_random_bits masking with 1/(1-p) rescaling.

    # output = p @ v  -> (G, S, D), f32 accumulation on the MXU.
    o = jnp.einsum("gqk,gkd->gqd", p.astype(v.dtype), v,
                   preferred_element_type=jnp.float32)
    o_ref[...] = o.astype(o_ref.dtype)

    # NOTE: whole-(S, S) scores fit easily in VMEM at S = 64 (G*S*S*4 ~ 48 KiB).
    # TODO(synk): for large S this should become a flash-style KV grid axis
    # (online-softmax accumulator with pl.when init/finalize) to bound VMEM,
    # which matters first on v7x (64 MiB physical / 32 MiB default scoped).


def attention(q, k, v):
    B, H, S, D = q.shape
    BH = B * H
    # Pack heads per block: largest G that still leaves an even grid so the
    # single grid axis can shard across v7x's 2 TensorCores (no cost on
    # v5e/v6e, which have 1 TC).  Fewer, bigger steps amortize the ~0.35 us
    # per-grid-step overhead and issue larger, more efficient DMAs.
    G = BH // 2 if (BH % 2 == 0 and BH >= 2) else BH
    grid = (BH // G,)

    qf = q.reshape(BH, S, D)
    kf = k.reshape(BH, S, D)
    vf = v.reshape(BH, S, D)

    spec = pl.BlockSpec((G, S, D), lambda i: (i, 0, 0))
    out = pl.pallas_call(
        _attn_kernel,
        out_shape=jax.ShapeDtypeStruct((BH, S, D), q.dtype),
        grid_spec=pltpu.PrefetchScalarGridSpec(
            num_scalar_prefetch=0,
            grid=grid,
            in_specs=[spec, spec, spec],
            out_specs=spec,
        ),
        compiler_params=pltpu.CompilerParams(
            dimension_semantics=("parallel",)),
    )(qf, kf, vf)
    return out.reshape(B, H, S, D)


def _reference(q, k, v):
    s = jnp.einsum("bhqd,bhkd->bhqk", q, k,
                   precision=jax.lax.Precision.HIGHEST) * SCALE
    p = jax.nn.softmax(s, axis=-1)
    return jnp.einsum("bhqk,bhkd->bhqd", p, v,
                      precision=jax.lax.Precision.HIGHEST)


if __name__ == "__main__":
    # Shapes exactly as in the PyTorch module: q, k, v = (2, 3, 64, 1024),
    # consistent with the hard-coded scale_factor = 1/sqrt(1024).
    B, H, S, D = 2, 3, 64, 1024
    key = jax.random.PRNGKey(0)
    kq, kk, kv = jax.random.split(key, 3)
    q = jax.random.normal(kq, (B, H, S, D), dtype=jnp.float32)
    k = jax.random.normal(kk, (B, H, S, D), dtype=jnp.float32)
    v = jax.random.normal(kv, (B, H, S, D), dtype=jnp.float32)

    out = attention(q, k, v)
    jax.block_until_ready(out)

    ref = _reference(q, k, v)
    assert out.shape == (B, H, S, D)
    assert jnp.allclose(out, ref, atol=1e-3, rtol=1e-3)
    print("KERNEL_OK")
</pallas_src>

<mosaic_0001>
module attributes {stable_mosaic.version = 11 : i64} {
  func.func @_attn_kernel(%arg0: i32, %arg1: memref<3x64x1024xf32, #tpu.memory_space<vmem>>, %arg2: memref<3x64x1024xf32, #tpu.memory_space<vmem>>, %arg3: memref<3x64x1024xf32, #tpu.memory_space<vmem>>, %arg4: memref<3x64x1024xf32, #tpu.memory_space<vmem>>) attributes {dimension_semantics = [#tpu.dimension_semantics<parallel>], iteration_bounds = array<i64: 2>, scalar_prefetch = 0 : i64, scratch_operands = 0 : i64, tpu.core_type = #tpu.core_type<tc>, window_params = [{transform_indices = @transform_0, window_bounds = array<i64: 3, 64, 1024>}, {transform_indices = @transform_1, window_bounds = array<i64: 3, 64, 1024>}, {transform_indices = @transform_2, window_bounds = array<i64: 3, 64, 1024>}, {transform_indices = @transform_3, window_bounds = array<i64: 3, 64, 1024>}]} {
    %c0 = arith.constant 0 : index
    %c0_0 = arith.constant 0 : index
    %c0_1 = arith.constant 0 : index
    %0 = vector.load %arg1[%c0, %c0_0, %c0_1] : memref<3x64x1024xf32, #tpu.memory_space<vmem>>, vector<3x64x1024xf32>
    %c0_2 = arith.constant 0 : index
    %c0_3 = arith.constant 0 : index
    %c0_4 = arith.constant 0 : index
    %1 = vector.load %arg2[%c0_2, %c0_3, %c0_4] : memref<3x64x1024xf32, #tpu.memory_space<vmem>>, vector<3x64x1024xf32>
    %c0_5 = arith.constant 0 : index
    %c0_6 = arith.constant 0 : index
    %c0_7 = arith.constant 0 : index
    %2 = vector.load %arg3[%c0_5, %c0_6, %c0_7] : memref<3x64x1024xf32, #tpu.memory_space<vmem>>, vector<3x64x1024xf32>
    "tpu.trace_start"() <{level = 10 : i32, message = "gqd,gkd->gqk"}> : () -> ()
    %cst = arith.constant dense<0.000000e+00> : vector<3x64x64xf32>
    %3 = tpu.matmul %0, %1, %cst {dimension_numbers = #tpu.dot_dimension_numbers<[2], [2], [1], [1], [0, 0, 0, 1, 1, 1], [0], [0]>} : vector<3x64x1024xf32>, vector<3x64x1024xf32>, vector<3x64x64xf32> -> vector<3x64x64xf32>
    "tpu.trace_stop"() : () -> ()
    %cst_8 = arith.constant 3.125000e-02 : f32
    %4 = vector.broadcast %cst_8 : f32 to vector<3x64x64xf32>
    %5 = arith.mulf %3, %4 : vector<3x64x64xf32>
    %cst_9 = arith.constant dense<0xFF800000> : vector<3x64xf32>
    %6 = vector.multi_reduction <maximumf>, %5, %cst_9 [2] : vector<3x64x64xf32> to vector<3x64xf32>
    %7 = vector.shape_cast %6 : vector<3x64xf32> to vector<3x64x1xf32>
    %8 = vector.broadcast %7 : vector<3x64x1xf32> to vector<3x64x64xf32>
    %9 = arith.subf %5, %8 : vector<3x64x64xf32>
    %10 = math.exp %9 : vector<3x64x64xf32>
    %cst_10 = arith.constant dense<0.000000e+00> : vector<3x64xf32>
    %11 = vector.multi_reduction <add>, %10, %cst_10 [2] : vector<3x64x64xf32> to vector<3x64xf32>
    %12 = vector.shape_cast %11 : vector<3x64xf32> to vector<3x64x1xf32>
    %13 = tpu.reciprocal %12 : vector<3x64x1xf32> -> vector<3x64x1xf32>
    %14 = vector.broadcast %13 : vector<3x64x1xf32> to vector<3x64x64xf32>
    %15 = arith.mulf %10, %14 : vector<3x64x64xf32>
    "tpu.trace_start"() <{level = 10 : i32, message = "gqk,gkd->gqd"}> : () -> ()
    %cst_11 = arith.constant dense<0.000000e+00> : vector<3x64x1024xf32>
    %16 = tpu.matmul %15, %2, %cst_11 {dimension_numbers = #tpu.dot_dimension_numbers<[2], [1], [1], [2], [0, 0, 0, 1, 1, 2], [0], [0]>} : vector<3x64x64xf32>, vector<3x64x1024xf32>, vector<3x64x1024xf32> -> vector<3x64x1024xf32>
    "tpu.trace_stop"() : () -> ()
    %c0_12 = arith.constant 0 : index
    %c0_13 = arith.constant 0 : index
    %c0_14 = arith.constant 0 : index
    %17 = vector.load %arg4[%c0_12, %c0_13, %c0_14] : memref<3x64x1024xf32, #tpu.memory_space<vmem>>, vector<3x64x1024xf32>
    tpu.vector_store %arg4[%c0_12, %c0_13, %c0_14], %16 {strides = array<i32>} : memref<3x64x1024xf32, #tpu.memory_space<vmem>>, vector<3x64x1024xf32>,
    return
  }
  func.func @transform_0(%arg0: i32) -> (i32, i32, i32) {
    %c0_i32 = arith.constant 0 : i32
    %c0_i32_0 = arith.constant 0 : i32
    %c0_i32_1 = arith.constant 0 : i32
    return %arg0, %c0_i32, %c0_i32_0 : i32, i32, i32
  }
  func.func @transform_1(%arg0: i32) -> (i32, i32, i32) {
    %c0_i32 = arith.constant 0 : i32
    %c0_i32_0 = arith.constant 0 : i32
    %c0_i32_1 = arith.constant 0 : i32
    return %arg0, %c0_i32, %c0_i32_0 : i32, i32, i32
  }
  func.func @transform_2(%arg0: i32) -> (i32, i32, i32) {
    %c0_i32 = arith.constant 0 : i32
    %c0_i32_0 = arith.constant 0 : i32
    %c0_i32_1 = arith.constant 0 : i32
    return %arg0, %c0_i32, %c0_i32_0 : i32, i32, i32
  }
  func.func @transform_3(%arg0: i32) -> (i32, i32, i32) {
    %c0_i32 = arith.constant 0 : i32
    %c0_i32_0 = arith.constant 0 : i32
    %c0_i32_1 = arith.constant 0 : i32
    return %arg0, %c0_i32, %c0_i32_0 : i32, i32, i32
  }
}

</mosaic_0001>

<bundles_post_ra>
// kernel: tpu_custom_call.1
= control target key start
LH: loop header
LB: loop body
LE: loop exit
PB: predicated region body
PF: predicated region fallthrough
CT: control target
= control target key end

     0   :  { %s6703_s0 = inlined_call_operand.hbm [shape: f32[6,64,1024], index: 0, kind: input, shape index: {}]   ;;  %s6704_s1 = inlined_call_operand.hbm [shape: f32[6,64,1024], index: 1, kind: input, shape index: {}]   ;;  %s6705_s2 = inlined_call_operand.hbm [shape: f32[6,64,1024], index: 2, kind: input, shape index: {}]   ;;  %s6706_s3 = inlined_call_operand.hbm [shape: f32[6,64,1024], index: 3, kind: output, shape index: {}]  }
   0x1   :  { %6718 = sst [smem:[#allocation27_spill]] %s6703_s0 }
   0x2   :  { %6719 = sst [smem:[#allocation28_spill]] %s6704_s1 }
   0x3   :  { %8 = vsyncpa [#allocation3], 0 }
   0x4   :  { %10 = vsyncpa [#allocation3 + $0x1], 0 }
   0x5   :  { %11 = vsyncpa [#allocation6], 0 }
   0x6   :  { %13 = vsyncpa [#allocation6 + $0x1], 0 }
   0x7   :  { %14 = vsyncpa [#allocation4], 0 }
   0x8   :  { %16 = vsyncpa [#allocation4 + $0x1], 0  ;;  %s4385_s12 = smov 0   ;;  %s4387_s13 = smov 0  }
   0x9   :  { %s4389_s14 = smov 0   ;;  %s4391_s15 = smov 0  }
   0xa LB: > { %s4406_s16 = sadd.s32 4294967295, %s4359_s15   ;;  %s3821_s17 = sadd.s32 4294967294, %s4359_s15   ;;  %s4359_s15 = sphi %s4391_s15, %s6787_s15   ;;  %s4355_s14 = sphi %s4389_s14, %s6786_s14   ;;  %s4351_s13 = sphi %s4387_s13, %s6785_s13   ;;  %s4347_s12 = sphi %s4385_s12, %s6784_s12  }
   0xb   : > { %s4410_s18 = sadd.s32 1, %s4359_s15   ;;  %s29_s19 = sadd.s32 1, %s4355_s14 }
   0xc   : > { %s26_s20 = ssub.s32 %s4359_s15, %s4410_s18  ;;  %p36_p0 = scmp.ne.s32.totalorder %s4355_s14, %s4351_s13 }
   0xd   : > { %p27_p1 = scmp.eq.s32.totalorder %s26_s20, 0  ;;  %p37_p2 = scmp.eq.s32.totalorder %s4359_s15, 0 }
   0xe   : > { %p42_p3 = scmp.ne.s32.totalorder %s4351_s13, %s4347_s12  ;;  %p43_p4 = scmp.eq.s32.totalorder %s4406_s16, 0 }
   0xf   : > { %s4422_s21 = scalar_select %p27_p1, %s4355_s14, %s29_s19  }
  0x10   : > { %p38_p5 = por %p37_p2, %p36_p0  ;;  %p4424_p6 = por %p43_p4, %p42_p3 }
  0x11   : > { %6720 = sst [smem:[#allocation12_spill]] %s4422_s21  ;;  %p118_p7 = scmp.eq.s32.totalorder %s4406_s16, 1 }
  0x12   : > { %p124_p8 = scmp.eq.s32.totalorder %s3821_s17, 1  ;;  %p3823_p9 = scmp.ge.s32.totalorder %s4359_s15, 2 }
  0x13   : > { %p4065_p10 = scmp.lt.s32.totalorder %s4359_s15, 2  ;;  %p4431_p11 = por %p118_p7, %p36_p0 }
  0x14   : > { %p4435_p12 = por %p124_p8, %p42_p3  ;;  %s144_s25 = sand.u32 1, %s4355_s14  }
  0x15   : > { %s4441_s26 = smul.u32 1536, %s4359_s15  ;;  %p4447_p13 = pnand %p4065_p10, %p38_p5 }
  0x16   : > { %s4445_s27 = smul.u32 1536, %s144_s25  ;;  %s167_s29 = sand.u32 1, %s4359_s15  }
  0x17   : > { %s6725_s1 = sld [smem:[#allocation28_spill]]  ;;  %p3830_p0 = scmp.ge.s32.totalorder %s4359_s15, 1 }
  0x18   : > { %s171_s6 = scalar_lea.vmem [#allocation5], %s4445_s27  ;;  %s4458_s9 = scalar_lea.sflag [#allocation6], %s167_s29 }
  0x19   : > { %s180_s7 = sshll.u32 %s171_s6, 4  ;;  %p4203_p2 = pneg %p4447_p13  ;;  %s181_s7 = int_to_ptr.vmem [resolvable:$true] %s180_s7 }
  0x1d   : > { %s177_s5 = scalar_lea.hbm %s6725_s1, %s4441_s26  ;;  %s4206_s20 = scalar_lea.hbm %s6725_s1, 3072 }
  0x1e   : > { %s178_s8 = sshll.u32 %s177_s5, 4  ;;  %s179_s8 = int_to_ptr.hbm [resolvable:$true] %s178_s8 }
  0x1f   : > { %s4199_s10 = sshra.s32 %s179_s8, 4  ;;  %s4200_s10 = int_to_ptr.hbm [resolvable:$true] %s4199_s10 }
  0x20   : > { %s4201_s11 = scalar_lea.hbm %s4200_s10, 1536  ;;  %p4207_p5 = scmp.lt.s32.totalorder %s4200_s10, %s6725_s1 }
  0x21   : > { %p4202_p1 = scmp.ne.s32.totalorder %s4200_s10, %s4201_s11  ;;  %p4208_p7 = scmp.lt.s32.totalorder %s4206_s20, %s4201_s11 }
  0x23   : > { %p4204_p3 = pnand %p4203_p2, %p4202_p1  ;;  %p4209_p8 = por %p4208_p7, %p4207_p5 }
  0x25   : > { %p4205_p4 = pneg %p4204_p3 }
  0x27   : > { %p4210_p10 = pnand %p4209_p8, %p4205_p4 }
  0x29   : > { %4213 = shalt.err (!%p4210_p10)
}
  0x2a   : > { %s6707_s29 = smov 1024   ;;  %s4362_s5 = smov 64  }
  0x2b   : > { %4057 = dma.hbm_to_vmem [thread:$0]  (!%p4447_p13), %s179_s8, 24576, %s181_s7, %s4458_s9, %s6707_s29, %s6707_s29, %s4362_s5  }
  0x2c   : > { %p211_p1 = scmp.lt.s32.totalorder %s4359_s15, 3  ;;  %s6726_s0 = sld [smem:[#allocation27_spill]] }
  0x2d   : > { %s148_s20 = scalar_lea.vmem [#allocation2], %s4445_s27  ;;  %s145_s4 = scalar_lea.sflag [#allocation3], %s144_s25 }
  0x2e   : > { %p4484_p3 = pnand %p3830_p0, %p211_p1  ;;  %s157_s30 = sshll.u32 %s148_s20, 4  ;;  %s158_s30 = int_to_ptr.vmem [resolvable:$true] %s157_s30 }
  0x32   : > { %s154_s11 = scalar_lea.hbm %s6726_s0, %s4441_s26  ;;  %s4236_s10 = scalar_lea.hbm %s6726_s0, 3072 }
  0x33   : > { %s155_s19 = sshll.u32 %s154_s11, 4  ;;  %s156_s19 = int_to_ptr.hbm [resolvable:$true] %s155_s19 }
  0x34   : > { %s4229_s1 = sshra.s32 %s156_s19, 4  ;;  %s4230_s1 = int_to_ptr.hbm [resolvable:$true] %s4229_s1 }
  0x35   : > { %s4231_s7 = scalar_lea.hbm %s4230_s1, 1536  ;;  %p4237_p0 = scmp.lt.s32.totalorder %s4230_s1, %s6726_s0 }
  0x36   : > { %p4232_p4 = scmp.ne.s32.totalorder %s4230_s1, %s4231_s7  ;;  %p4238_p8 = scmp.lt.s32.totalorder %s4236_s10, %s4231_s7 }
  0x38   : > { %p4234_p5 = pnand %p4232_p4, %p4203_p2  ;;  %p4239_p10 = por %p4238_p8, %p4237_p0 }
  0x3a   : > { %p4235_p7 = pneg %p4234_p5 }
  0x3c   : > { %p4240_p1 = pnand %p4239_p10, %p4235_p7 }
  0x3e   : > { %4243 = shalt.err (!%p4240_p1)
}
  0x3f   : > { %s6728_s25 = smov 1024   ;;  %s200_s6 = scalar_lea.hbm %s6705_s2, %s4441_s26 }
  0x40   : > { %4054 = dma.hbm_to_vmem [thread:$0]  (!%p4447_p13), %s156_s19, 24576, %s158_s30, %s145_s4, %s6728_s25, %s6728_s25, %s4362_s5  }
  0x41   : > { %s194_s21 = scalar_lea.vmem [#allocation7], %s4445_s27  ;;  %s201_s1 = sshll.u32 %s200_s6, 4  ;;  %s202_s1 = int_to_ptr.hbm [resolvable:$true] %s201_s1 }
  0x42   : > { %s203_s29 = sshll.u32 %s194_s21, 4  ;;  %s4259_s7 = sshra.s32 %s202_s1, 4  ;;  %s204_s29 = int_to_ptr.vmem [resolvable:$true] %s203_s29  ;;  %s4260_s7 = int_to_ptr.hbm [resolvable:$true] %s4259_s7 }
  0x43   : > { %s4261_s10 = scalar_lea.hbm %s4260_s7, 1536  ;;  %s4266_s19 = scalar_lea.hbm %s6705_s2, 3072 }
  0x44   : > { %p4262_p4 = scmp.ne.s32.totalorder %s4260_s7, %s4261_s10  ;;  %p4267_p0 = scmp.lt.s32.totalorder %s4260_s7, %s6705_s2 }
  0x45   : > { %p4268_p8 = scmp.lt.s32.totalorder %s4266_s19, %s4261_s10 }
  0x46   : > { %p4264_p5 = pnand %p4262_p4, %p4203_p2 }
  0x47   : > { %p4269_p10 = por %p4268_p8, %p4267_p0 }
  0x48   : > { %p4265_p7 = pneg %p4264_p5 }
  0x4a   : > { %p4270_p1 = pnand %p4269_p10, %p4265_p7 }
  0x4c   : > { %4273 = shalt.err (!%p4270_p1)
}
  0x4d   : > { %4060 = dma.hbm_to_vmem [thread:$0]  (!%p4447_p13), %s202_s1, 24576, %s204_s29, %s4458_s9, %s6728_s25, %s6728_s25, %s4362_s5  }
  0x4e   : > { %215 = sbr.rel (%p4484_p3) target bundleno = 1187 (0x4a3), region = 32 }
  0x53   : > { %s4528_s0 = sand.u32 1, %s4351_s13  }
  0x54   : > { %s4531_s21 = smul.u32 1536, %s4528_s0  ;;  %s218_s26 = scalar_lea.sflag [#allocation3], %s4528_s0 }
  0x56   : > { %s4535_s27 = scalar_lea.vmem [#allocation2], %s4531_s21 }
  0x57   : > { %4334 = dma.done.wait (%p4424_p6), %s218_s26, 24576  }
  0x58   : > { %4336 = vsyncadd (%p4424_p6), %s218_s26, 4294942720  ;;  %s227_s28 = sand.u32 1, %s4406_s16   ;;  %s4543_s5 = scalar_lea.vmem [#allocation5], %s4531_s21 }
  0x59   : > { %s228_s9 = scalar_lea.sflag [#allocation6], %s227_s28 }
  0x5a   : > { %4338 = dma.done.wait (%p4424_p6), %s228_s9, 49152  }
  0x5b   : > { %4340 = vsyncadd (%p4424_p6), %s228_s9, 4294918144  ;;  %v527_v0 = vld [vmem:[%s4543_s5 + $0x1c0] sm:$0xff]  ;;  %v529_v1 = vld [vmem:[%s4543_s5 + $0x1d0] sm:$0xff]  ;;  %vm1863_vm0 = vcmask 523264   ;;  %s5255_s22 = scalar_lea.vmem [#allocation7], %s4531_s21  ;;  %s5748_s17 = scalar_lea.vmem [#allocation8], %s4531_s21 }
  0x5c   : > { %v528_v2 = vld [vmem:[%s4543_s5 + $0x1c8] sm:$0xff]  ;;  %863 = vmatpush.xpose.msra.mxu0 %v527_v0  ;;  %945 = vmatpush.xpose.msra.mxu2 %v529_v1  ;;  %v530_v3 = vld [vmem:[%s4543_s5 + $0x1d8] sm:$0xff]  ;;  %v519_v4 = vld [vmem:[%s4543_s5 + $0x180] sm:$0xff]  ;;  %s4038_s25 = smul.u32 1536, %s4406_s16  ;;  %s3702_s29 = sshll.u32 %s5748_s17, 4  ;;  %s3703_s29 = int_to_ptr.vmem [resolvable:$true] %s3702_s29 }
  0x5d   : > { %904 = vmatpush.xpose.msra.mxu1 %v528_v2  ;;  %986 = vmatpush.xpose.msra.mxu3 %v530_v3  ;;  %v521_v5 = vld [vmem:[%s4543_s5 + $0x190] sm:$0xff]  ;;  %v520_v6 = vld [vmem:[%s4543_s5 + $0x188] sm:$0xff]  ;;  %v522_v7 = vld [vmem:[%s4543_s5 + $0x198] sm:$0xff]  ;;  %s3689_s16 = scalar_lea.sflag [#allocation4], %s4528_s0  ;;  %s4309_s30 = scalar_lea.hbm %s6706_s3, 3072 }
  0x5e   : > { %v511_v8 = vld [vmem:[%s4543_s5 + $0x140] sm:$0xff]  ;;  %v513_v9 = vld [vmem:[%s4543_s5 + $0x150] sm:$0xff]  ;;  %v512_v10 = vld [vmem:[%s4543_s5 + $0x148] sm:$0xff]  ;;  %s3701_s6 = scalar_lea.hbm %s6706_s3, %s4038_s25 }
  0x5f   : > { %v514_v11 = vld [vmem:[%s4543_s5 + $0x158] sm:$0xff]  ;;  %v503_v12 = vld [vmem:[%s4543_s5 + $0x100] sm:$0xff]  ;;  %v505_v13 = vld [vmem:[%s4543_s5 + $0x110] sm:$0xff]  ;;  %s3704_s1 = sshll.u32 %s3701_s6, 4  ;;  %s3705_s1 = int_to_ptr.hbm [resolvable:$true] %s3704_s1 }
  0x60   : > { %864 = vmatpush.xpose.msra.mxu0 %v519_v4  ;;  %946 = vmatpush.xpose.msra.mxu2 %v521_v5  ;;  %v504_v14 = vld [vmem:[%s4543_s5 + $0x108] sm:$0xff]  ;;  %v506_v15 = vld [vmem:[%s4543_s5 + $0x118] sm:$0xff]  ;;  %v495_v16 = vld [vmem:[%s4543_s5 + $0xc0] sm:$0xff]  ;;  %s4303_s7 = sshra.s32 %s3705_s1, 4  ;;  %s4304_s7 = int_to_ptr.hbm [resolvable:$true] %s4303_s7 }
  0x61   : > { %905 = vmatpush.xpose.msra.mxu1 %v520_v6  ;;  %987 = vmatpush.xpose.msra.mxu3 %v522_v7  ;;  %v497_v17 = vld [vmem:[%s4543_s5 + $0xd0] sm:$0xff]  ;;  %v496_v18 = vld [vmem:[%s4543_s5 + $0xc8] sm:$0xff]  ;;  %v498_v19 = vld [vmem:[%s4543_s5 + $0xd8] sm:$0xff]  ;;  %s4305_s10 = scalar_lea.hbm %s4304_s7, 1536  ;;  %p4310_p3 = scmp.lt.s32.totalorder %s4304_s7, %s6706_s3 }
  0x62   : > { %v487_v20 = vld [vmem:[%s4543_s5 + $0x80] sm:$0xff]  ;;  %v489_v21 = vld [vmem:[%s4543_s5 + $0x90] sm:$0xff]  ;;  %v488_v22 = vld [vmem:[%s4543_s5 + $0x88] sm:$0xff]  ;;  %p4306_p6 = scmp.ne.s32.totalorder %s4304_s7, %s4305_s10  ;;  %p4311_p4 = scmp.lt.s32.totalorder %s4309_s30, %s4305_s10 }
  0x63   : > { %v490_v23 = vld [vmem:[%s4543_s5 + $0x98] sm:$0xff]  ;;  %v479_v24 = vld [vmem:[%s4543_s5 + $0x40] sm:$0xff]  ;;  %v481_v25 = vld [vmem:[%s4543_s5 + $0x50] sm:$0xff] }
  0x64   : > { %865 = vmatpush.xpose.msra.mxu0 %v511_v8  ;;  %947 = vmatpush.xpose.msra.mxu2 %v513_v9  ;;  %v480_v26 = vld [vmem:[%s4543_s5 + $0x48] sm:$0xff]  ;;  %v482_v27 = vld [vmem:[%s4543_s5 + $0x58] sm:$0xff]  ;;  %v471_v28 = vld [vmem:[%s4543_s5] sm:$0xff]  ;;  %p4307_p13 = pnand %p4306_p6, %p4431_p11  ;;  %p4312_p5 = por %p4311_p4, %p4310_p3 }
  0x65   : > { %906 = vmatpush.xpose.msra.mxu1 %v512_v10  ;;  %988 = vmatpush.xpose.msra.mxu3 %v514_v11  ;;  %v473_v29 = vld [vmem:[%s4543_s5 + $0x10] sm:$0xff]  ;;  %v472_v30 = vld [vmem:[%s4543_s5 + $0x8] sm:$0xff]  ;;  %v474_v31 = vld [vmem:[%s4543_s5 + $0x18] sm:$0xff] }
  0x66   : > { %v533_v32 = vld [vmem:[%s4543_s5 + $0x1f0] sm:$0xff]  ;;  %v531_v33 = vld [vmem:[%s4543_s5 + $0x1e0] sm:$0xff]  ;;  %v280_v36 = vld [vmem:[%s4535_s27 + $0x8] sm:$0xff]  ;;  %p4308_p2 = pneg %p4307_p13 }
  0x67   : > { %v279_v34 = vld [vmem:[%s4535_s27] sm:$0xff]  ;;  %v281_v35 = vld [vmem:[%s4535_s27 + $0x10] sm:$0xff]  ;;  %v282_v37 = vld [vmem:[%s4535_s27 + $0x18] sm:$0xff] }
  0x68   : > { %866 = vmatpush.xpose.msra.mxu0 %v503_v12  ;;  %948 = vmatpush.xpose.msra.mxu2 %v505_v13  ;;  %v534_v38 = vld [vmem:[%s4543_s5 + $0x1f8] sm:$0xff]  ;;  %v532_v39 = vld [vmem:[%s4543_s5 + $0x1e8] sm:$0xff]  ;;  %v525_v40 = vld [vmem:[%s4543_s5 + $0x1b0] sm:$0xff]  ;;  %p4313_p7 = pnand %p4312_p5, %p4308_p2 }
  0x69   : > { %907 = vmatpush.xpose.msra.mxu1 %v504_v14  ;;  %989 = vmatpush.xpose.msra.mxu3 %v506_v15  ;;  %v523_v41 = vld [vmem:[%s4543_s5 + $0x1a0] sm:$0xff]  ;;  %v526_v42 = vld [vmem:[%s4543_s5 + $0x1b8] sm:$0xff]  ;;  %v524_v43 = vld [vmem:[%s4543_s5 + $0x1a8] sm:$0xff] }
  0x6a   : > { %v517_v44 = vld [vmem:[%s4543_s5 + $0x170] sm:$0xff]  ;;  %v515_v45 = vld [vmem:[%s4543_s5 + $0x160] sm:$0xff]  ;;  %v288_v48 = vld [vmem:[%s4535_s27 + $0x48] sm:$0xff] }
  0x6b   : > { %v287_v46 = vld [vmem:[%s4535_s27 + $0x40] sm:$0xff]  ;;  %v289_v47 = vld [vmem:[%s4535_s27 + $0x50] sm:$0xff]  ;;  %v290_v49 = vld [vmem:[%s4535_s27 + $0x58] sm:$0xff] }
  0x6c   : > { %867 = vmatpush.xpose.msra.mxu0 %v495_v16  ;;  %949 = vmatpush.xpose.msra.mxu2 %v497_v17  ;;  %v518_v50 = vld [vmem:[%s4543_s5 + $0x178] sm:$0xff]  ;;  %v516_v51 = vld [vmem:[%s4543_s5 + $0x168] sm:$0xff]  ;;  %v509_v52 = vld [vmem:[%s4543_s5 + $0x130] sm:$0xff] }
  0x6d   : > { %908 = vmatpush.xpose.msra.mxu1 %v496_v18  ;;  %990 = vmatpush.xpose.msra.mxu3 %v498_v19  ;;  %v507_v53 = vld [vmem:[%s4543_s5 + $0x120] sm:$0xff]  ;;  %v510_v54 = vld [vmem:[%s4543_s5 + $0x138] sm:$0xff]  ;;  %v508_v55 = vld [vmem:[%s4543_s5 + $0x128] sm:$0xff] }
  0x6e   : > { %v501_v56 = vld [vmem:[%s4543_s5 + $0xf0] sm:$0xff]  ;;  %v499_v57 = vld [vmem:[%s4543_s5 + $0xe0] sm:$0xff]  ;;  %v296_v60 = vld [vmem:[%s4535_s27 + $0x88] sm:$0xff] }
  0x6f   : > { %v295_v58 = vld [vmem:[%s4535_s27 + $0x80] sm:$0xff]  ;;  %v297_v59 = vld [vmem:[%s4535_s27 + $0x90] sm:$0xff]  ;;  %v298_v61 = vld [vmem:[%s4535_s27 + $0x98] sm:$0xff] }
  0x70   : > { %868 = vmatpush.xpose.msra.mxu0 %v487_v20  ;;  %950 = vmatpush.xpose.msra.mxu2 %v489_v21  ;;  %v502_v62 = vld [vmem:[%s4543_s5 + $0xf8] sm:$0xff]  ;;  %v500_v63 = vld [vmem:[%s4543_s5 + $0xe8] sm:$0xff]  ;;  %v493_v0 = vld [vmem:[%s4543_s5 + $0xb0] sm:$0xff] }
  0x71   : > { %909 = vmatpush.xpose.msra.mxu1 %v488_v22  ;;  %991 = vmatpush.xpose.msra.mxu3 %v490_v23  ;;  %v491_v1 = vld [vmem:[%s4543_s5 + $0xa0] sm:$0xff]  ;;  %v494_v2 = vld [vmem:[%s4543_s5 + $0xb8] sm:$0xff]  ;;  %v492_v3 = vld [vmem:[%s4543_s5 + $0xa8] sm:$0xff] }
  0x72   : > { %v485_v4 = vld [vmem:[%s4543_s5 + $0x70] sm:$0xff]  ;;  %v483_v5 = vld [vmem:[%s4543_s5 + $0x60] sm:$0xff]  ;;  %v304_v8 = vld [vmem:[%s4535_s27 + $0xc8] sm:$0xff] }
  0x73   : > { %v303_v6 = vld [vmem:[%s4535_s27 + $0xc0] sm:$0xff]  ;;  %v305_v7 = vld [vmem:[%s4535_s27 + $0xd0] sm:$0xff]  ;;  %v306_v9 = vld [vmem:[%s4535_s27 + $0xd8] sm:$0xff] }
  0x74   : > { %869 = vmatpush.xpose.msra.mxu0 %v479_v24  ;;  %951 = vmatpush.xpose.msra.mxu2 %v481_v25  ;;  %v486_v10 = vld [vmem:[%s4543_s5 + $0x78] sm:$0xff]  ;;  %v484_v11 = vld [vmem:[%s4543_s5 + $0x68] sm:$0xff]  ;;  %v477_v12 = vld [vmem:[%s4543_s5 + $0x30] sm:$0xff] }
  0x75   : > { %910 = vmatpush.xpose.msra.mxu1 %v480_v26  ;;  %992 = vmatpush.xpose.msra.mxu3 %v482_v27  ;;  %v475_v13 = vld [vmem:[%s4543_s5 + $0x20] sm:$0xff]  ;;  %v478_v14 = vld [vmem:[%s4543_s5 + $0x38] sm:$0xff]  ;;  %v476_v15 = vld [vmem:[%s4543_s5 + $0x28] sm:$0xff] }
  0x76   : > { %v311_v16 = vld [vmem:[%s4535_s27 + $0x100] sm:$0xff]  ;;  %v313_v17 = vld [vmem:[%s4535_s27 + $0x110] sm:$0xff]  ;;  %v312_v18 = vld [vmem:[%s4535_s27 + $0x108] sm:$0xff] }
  0x77   : > { %v314_v19 = vld [vmem:[%s4535_s27 + $0x118] sm:$0xff]  ;;  %v319_v20 = vld [vmem:[%s4535_s27 + $0x140] sm:$0xff]  ;;  %v321_v21 = vld [vmem:[%s4535_s27 + $0x150] sm:$0xff] }
  0x78   : > { %870 = vmatpush.xpose.msra.mxu0 %v471_v28  ;;  %952 = vmatpush.xpose.msra.mxu2 %v473_v29  ;;  %v320_v22 = vld [vmem:[%s4535_s27 + $0x148] sm:$0xff]  ;;  %v322_v23 = vld [vmem:[%s4535_s27 + $0x158] sm:$0xff]  ;;  %v327_v24 = vld [vmem:[%s4535_s27 + $0x180] sm:$0xff] }
  0x79   : > { %911 = vmatpush.xpose.msra.mxu1 %v472_v30  ;;  %993 = vmatpush.xpose.msra.mxu3 %v474_v31  ;;  %v329_v25 = vld [vmem:[%s4535_s27 + $0x190] sm:$0xff]  ;;  %v328_v26 = vld [vmem:[%s4535_s27 + $0x188] sm:$0xff]  ;;  %v330_v27 = vld [vmem:[%s4535_s27 + $0x198] sm:$0xff] }
  0x7a   : > { %v335_v28 = vld [vmem:[%s4535_s27 + $0x1c0] sm:$0xff]  ;;  %v337_v29 = vld [vmem:[%s4535_s27 + $0x1d0] sm:$0xff]  ;;  %v336_v30 = vld [vmem:[%s4535_s27 + $0x1c8] sm:$0xff] }
  0x7b   : > { %871 = vmatmul.f32.vlgmr.msra.gmra.mxu0 %v279_v34  ;;  %953 = vmatmul.f32.vlgmr.msra.gmra.mxu2 %v281_v35  ;;  %v338_v31 = vld [vmem:[%s4535_s27 + $0x1d8] sm:$0xff]  ;;  %v284_v34 = vld [vmem:[%s4535_s27 + $0x28] sm:$0xff] }
  0x7c   : > { %1109 = vmatpush.xpose.msrb.mxu2 %v533_v32  ;;  %1027 = vmatpush.xpose.msrb.mxu0 %v531_v33  ;;  %v283_v32 = vld [vmem:[%s4535_s27 + $0x20] sm:$0xff]  ;;  %v285_v33 = vld [vmem:[%s4535_s27 + $0x30] sm:$0xff]  ;;  %v286_v35 = vld [vmem:[%s4535_s27 + $0x38] sm:$0xff] }
  0x7d   : > { %912 = vmatmul.f32.vlgmr.msra.gmra.mxu1 %v280_v36  ;;  %994 = vmatmul.f32.vlgmr.msra.gmra.mxu3 %v282_v37  ;;  %v593_v36 = vld [vmem:[%s4543_s5 + $0x3d0] sm:$0xff]  ;;  %v591_v37 = vld [vmem:[%s4543_s5 + $0x3c0] sm:$0xff] }
  0x7e   : > { %1150 = vmatpush.xpose.msrb.mxu3 %v534_v38  ;;  %1068 = vmatpush.xpose.msrb.mxu1 %v532_v39  ;;  %v594_v38 = vld [vmem:[%s4543_s5 + $0x3d8] sm:$0xff]  ;;  %v592_v39 = vld [vmem:[%s4543_s5 + $0x3c8] sm:$0xff] }
  0x80   : > { %1110 = vmatpush.xpose.msrb.mxu2 %v525_v40  ;;  %1028 = vmatpush.xpose.msrb.mxu0 %v523_v41  ;;  %v583_v40 = vld [vmem:[%s4543_s5 + $0x380] sm:$0xff]  ;;  %v585_v41 = vld [vmem:[%s4543_s5 + $0x390] sm:$0xff] }
  0x82   : > { %1151 = vmatpush.xpose.msrb.mxu3 %v526_v42  ;;  %1069 = vmatpush.xpose.msrb.mxu1 %v524_v43  ;;  %v584_v42 = vld [vmem:[%s4543_s5 + $0x388] sm:$0xff]  ;;  %v586_v43 = vld [vmem:[%s4543_s5 + $0x398] sm:$0xff] }
  0x83   : > { %874 = vmatmul.f32.gmra.mxu0 %v287_v46  ;;  %956 = vmatmul.f32.gmra.mxu2 %v289_v47  ;;  %v292_v46 = vld [vmem:[%s4535_s27 + $0x68] sm:$0xff]  ;;  %v294_v47 = vld [vmem:[%s4535_s27 + $0x78] sm:$0xff] }
  0x84   : > { %1111 = vmatpush.xpose.msrb.mxu2 %v517_v44  ;;  %1029 = vmatpush.xpose.msrb.mxu0 %v515_v45  ;;  %v291_v44 = vld [vmem:[%s4535_s27 + $0x60] sm:$0xff]  ;;  %v293_v45 = vld [vmem:[%s4535_s27 + $0x70] sm:$0xff] }
  0x85   : > { %915 = vmatmul.f32.gmra.mxu1 %v288_v48  ;;  %997 = vmatmul.f32.gmra.mxu3 %v290_v49  ;;  %v575_v48 = vld [vmem:[%s4543_s5 + $0x340] sm:$0xff]  ;;  %v577_v49 = vld [vmem:[%s4543_s5 + $0x350] sm:$0xff] }
  0x86   : > { %1152 = vmatpush.xpose.msrb.mxu3 %v518_v50  ;;  %1070 = vmatpush.xpose.msrb.mxu1 %v516_v51  ;;  %v576_v50 = vld [vmem:[%s4543_s5 + $0x348] sm:$0xff]  ;;  %v578_v51 = vld [vmem:[%s4543_s5 + $0x358] sm:$0xff] }
  0x88   : > { %1112 = vmatpush.xpose.msrb.mxu2 %v509_v52  ;;  %1030 = vmatpush.xpose.msrb.mxu0 %v507_v53  ;;  %v567_v52 = vld [vmem:[%s4543_s5 + $0x300] sm:$0xff]  ;;  %v569_v53 = vld [vmem:[%s4543_s5 + $0x310] sm:$0xff] }
  0x8a   : > { %1153 = vmatpush.xpose.msrb.mxu3 %v510_v54  ;;  %1071 = vmatpush.xpose.msrb.mxu1 %v508_v55  ;;  %v568_v54 = vld [vmem:[%s4543_s5 + $0x308] sm:$0xff]  ;;  %v570_v55 = vld [vmem:[%s4543_s5 + $0x318] sm:$0xff] }
  0x8b   : > { %877 = vmatmul.f32.gmra.mxu0 %v295_v58  ;;  %959 = vmatmul.f32.gmra.mxu2 %v297_v59  ;;  %v300_v58 = vld [vmem:[%s4535_s27 + $0xa8] sm:$0xff]  ;;  %v302_v59 = vld [vmem:[%s4535_s27 + $0xb8] sm:$0xff] }
  0x8c   : > { %1113 = vmatpush.xpose.msrb.mxu2 %v501_v56  ;;  %1031 = vmatpush.xpose.msrb.mxu0 %v499_v57  ;;  %v299_v56 = vld [vmem:[%s4535_s27 + $0xa0] sm:$0xff]  ;;  %v301_v57 = vld [vmem:[%s4535_s27 + $0xb0] sm:$0xff] }
  0x8d   : > { %918 = vmatmul.f32.gmra.mxu1 %v296_v60  ;;  %1000 = vmatmul.f32.gmra.mxu3 %v298_v61  ;;  %v559_v60 = vld [vmem:[%s4543_s5 + $0x2c0] sm:$0xff]  ;;  %v561_v61 = vld [vmem:[%s4543_s5 + $0x2d0] sm:$0xff] }
  0x8e   : > { %1154 = vmatpush.xpose.msrb.mxu3 %v502_v62  ;;  %1072 = vmatpush.xpose.msrb.mxu1 %v500_v63  ;;  %v560_v62 = vld [vmem:[%s4543_s5 + $0x2c8] sm:$0xff]  ;;  %v562_v63 = vld [vmem:[%s4543_s5 + $0x2d8] sm:$0xff] }
  0x90   : > { %1114 = vmatpush.xpose.msrb.mxu2 %v493_v0  ;;  %1032 = vmatpush.xpose.msrb.mxu0 %v491_v1  ;;  %v551_v0 = vld [vmem:[%s4543_s5 + $0x280] sm:$0xff]  ;;  %v553_v1 = vld [vmem:[%s4543_s5 + $0x290] sm:$0xff] }
  0x92   : > { %1155 = vmatpush.xpose.msrb.mxu3 %v494_v2  ;;  %1073 = vmatpush.xpose.msrb.mxu1 %v492_v3  ;;  %v552_v2 = vld [vmem:[%s4543_s5 + $0x288] sm:$0xff]  ;;  %v554_v3 = vld [vmem:[%s4543_s5 + $0x298] sm:$0xff] }
  0x93   : > { %880 = vmatmul.f32.gmra.mxu0 %v303_v6  ;;  %962 = vmatmul.f32.gmra.mxu2 %v305_v7  ;;  %v308_v6 = vld [vmem:[%s4535_s27 + $0xe8] sm:$0xff]  ;;  %v310_v7 = vld [vmem:[%s4535_s27 + $0xf8] sm:$0xff] }
  0x94   : > { %1115 = vmatpush.xpose.msrb.mxu2 %v485_v4  ;;  %1033 = vmatpush.xpose.msrb.mxu0 %v483_v5  ;;  %v307_v4 = vld [vmem:[%s4535_s27 + $0xe0] sm:$0xff]  ;;  %v309_v5 = vld [vmem:[%s4535_s27 + $0xf0] sm:$0xff] }
  0x95   : > { %921 = vmatmul.f32.gmra.mxu1 %v304_v8  ;;  %1003 = vmatmul.f32.gmra.mxu3 %v306_v9  ;;  %v543_v8 = vld [vmem:[%s4543_s5 + $0x240] sm:$0xff]  ;;  %v545_v9 = vld [vmem:[%s4543_s5 + $0x250] sm:$0xff] }
  0x96   : > { %1156 = vmatpush.xpose.msrb.mxu3 %v486_v10  ;;  %1074 = vmatpush.xpose.msrb.mxu1 %v484_v11  ;;  %v544_v10 = vld [vmem:[%s4543_s5 + $0x248] sm:$0xff]  ;;  %v546_v11 = vld [vmem:[%s4543_s5 + $0x258] sm:$0xff] }
  0x98   : > { %1116 = vmatpush.xpose.msrb.mxu2 %v477_v12  ;;  %1034 = vmatpush.xpose.msrb.mxu0 %v475_v13  ;;  %v535_v12 = vld [vmem:[%s4543_s5 + $0x200] sm:$0xff]  ;;  %v537_v13 = vld [vmem:[%s4543_s5 + $0x210] sm:$0xff] }
  0x9a   : > { %1157 = vmatpush.xpose.msrb.mxu3 %v478_v14  ;;  %1075 = vmatpush.xpose.msrb.mxu1 %v476_v15  ;;  %v315_v14 = vld [vmem:[%s4535_s27 + $0x120] sm:$0xff]  ;;  %v317_v15 = vld [vmem:[%s4535_s27 + $0x130] sm:$0xff] }
  0x9b   : > { %883 = vmatmul.f32.gmra.mxu0 %v311_v16  ;;  %965 = vmatmul.f32.gmra.mxu2 %v313_v17  ;;  %v316_v16 = vld [vmem:[%s4535_s27 + $0x128] sm:$0xff]  ;;  %v318_v17 = vld [vmem:[%s4535_s27 + $0x138] sm:$0xff] }
  0x9c   : > { %1273 = vmatpush.xpose.msra.mxu2 %v593_v36  ;;  %1191 = vmatpush.xpose.msra.mxu0 %v591_v37  ;;  %v344_v36 = vld [vmem:[%s4535_s27 + $0x208] sm:$0xff]  ;;  %v346_v37 = vld [vmem:[%s4535_s27 + $0x218] sm:$0xff] }
  0x9d   : > { %924 = vmatmul.f32.gmra.mxu1 %v312_v18  ;;  %1006 = vmatmul.f32.gmra.mxu3 %v314_v19  ;;  %v536_v18 = vld [vmem:[%s4543_s5 + $0x208] sm:$0xff]  ;;  %v538_v19 = vld [vmem:[%s4543_s5 + $0x218] sm:$0xff] }
  0x9e   : > { %1314 = vmatpush.xpose.msra.mxu3 %v594_v38  ;;  %1232 = vmatpush.xpose.msra.mxu1 %v592_v39  ;;  %v597_v38 = vld [vmem:[%s4543_s5 + $0x3f0] sm:$0xff]  ;;  %v595_v39 = vld [vmem:[%s4543_s5 + $0x3e0] sm:$0xff] }
  0xa0   : > { %1192 = vmatpush.xpose.msra.mxu0 %v583_v40  ;;  %1274 = vmatpush.xpose.msra.mxu2 %v585_v41  ;;  %v598_v40 = vld [vmem:[%s4543_s5 + $0x3f8] sm:$0xff]  ;;  %v596_v41 = vld [vmem:[%s4543_s5 + $0x3e8] sm:$0xff] }
  0xa2   : > { %1233 = vmatpush.xpose.msra.mxu1 %v584_v42  ;;  %1315 = vmatpush.xpose.msra.mxu3 %v586_v43 }
  0xa3   : > { %886 = vmatmul.f32.gmra.mxu0 %v319_v20  ;;  %968 = vmatmul.f32.gmra.mxu2 %v321_v21  ;;  %v323_v20 = vld [vmem:[%s4535_s27 + $0x160] sm:$0xff]  ;;  %v325_v21 = vld [vmem:[%s4535_s27 + $0x170] sm:$0xff] }
  0xa4   : > { %1193 = vmatpush.xpose.msra.mxu0 %v575_v48  ;;  %1275 = vmatpush.xpose.msra.mxu2 %v577_v49  ;;  %v353_v48 = vld [vmem:[%s4535_s27 + $0x250] sm:$0xff]  ;;  %v352_v49 = vld [vmem:[%s4535_s27 + $0x248] sm:$0xff] }
  0xa5   : > { %927 = vmatmul.f32.gmra.mxu1 %v320_v22  ;;  %1009 = vmatmul.f32.gmra.mxu3 %v322_v23  ;;  %v324_v22 = vld [vmem:[%s4535_s27 + $0x168] sm:$0xff]  ;;  %v326_v23 = vld [vmem:[%s4535_s27 + $0x178] sm:$0xff] }
  0xa6   : > { %1234 = vmatpush.xpose.msra.mxu1 %v576_v50  ;;  %1316 = vmatpush.xpose.msra.mxu3 %v578_v51  ;;  %v354_v51 = vld [vmem:[%s4535_s27 + $0x258] sm:$0xff] }
  0xa8   : > { %1194 = vmatpush.xpose.msra.mxu0 %v567_v52  ;;  %1276 = vmatpush.xpose.msra.mxu2 %v569_v53  ;;  %v588_v52 = vld [vmem:[%s4543_s5 + $0x3a8] sm:$0xff]  ;;  %v590_v53 = vld [vmem:[%s4543_s5 + $0x3b8] sm:$0xff] }
  0xaa   : > { %1235 = vmatpush.xpose.msra.mxu1 %v568_v54  ;;  %1317 = vmatpush.xpose.msra.mxu3 %v570_v55  ;;  %v579_v54 = vld [vmem:[%s4543_s5 + $0x360] sm:$0xff]  ;;  %v581_v55 = vld [vmem:[%s4543_s5 + $0x370] sm:$0xff] }
  0xab   : > { %889 = vmatmul.f32.gmra.mxu0 %v327_v24  ;;  %971 = vmatmul.f32.gmra.mxu2 %v329_v25  ;;  %v331_v24 = vld [vmem:[%s4535_s27 + $0x1a0] sm:$0xff]  ;;  %v333_v25 = vld [vmem:[%s4535_s27 + $0x1b0] sm:$0xff] }
  0xac   : > { %1195 = vmatpush.xpose.msra.mxu0 %v559_v60  ;;  %1277 = vmatpush.xpose.msra.mxu2 %v561_v61  ;;  %v571_v60 = vld [vmem:[%s4543_s5 + $0x320] sm:$0xff]  ;;  %v573_v61 = vld [vmem:[%s4543_s5 + $0x330] sm:$0xff] }
  0xad   : > { %930 = vmatmul.f32.gmra.mxu1 %v328_v26  ;;  %1012 = vmatmul.f32.gmra.mxu3 %v330_v27  ;;  %v332_v26 = vld [vmem:[%s4535_s27 + $0x1a8] sm:$0xff]  ;;  %v334_v27 = vld [vmem:[%s4535_s27 + $0x1b8] sm:$0xff] }
  0xae   : > { %1236 = vmatpush.xpose.msra.mxu1 %v560_v62  ;;  %1318 = vmatpush.xpose.msra.mxu3 %v562_v63  ;;  %v359_v63 = vld [vmem:[%s4535_s27 + $0x280] sm:$0xff] }
  0xb0   : > { %1196 = vmatpush.xpose.msra.mxu0 %v551_v0  ;;  %1278 = vmatpush.xpose.msra.mxu2 %v553_v1  ;;  %v361_v0 = vld [vmem:[%s4535_s27 + $0x290] sm:$0xff]  ;;  %v360_v1 = vld [vmem:[%s4535_s27 + $0x288] sm:$0xff] }
  0xb2   : > { %1237 = vmatpush.xpose.msra.mxu1 %v552_v2  ;;  %1319 = vmatpush.xpose.msra.mxu3 %v554_v3  ;;  %v362_v3 = vld [vmem:[%s4535_s27 + $0x298] sm:$0xff] }
  0xb3   : > { %892 = vmatmul.f32.gmra.mxu0 %v335_v28  ;;  %974 = vmatmul.f32.gmra.mxu2 %v337_v29  ;;  %v339_v28 = vld [vmem:[%s4535_s27 + $0x1e0] sm:$0xff]  ;;  %v341_v29 = vld [vmem:[%s4535_s27 + $0x1f0] sm:$0xff] }
  0xb4   : > { %1197 = vmatpush.xpose.msra.mxu0 %v543_v8  ;;  %1279 = vmatpush.xpose.msra.mxu2 %v545_v9  ;;  %v564_v8 = vld [vmem:[%s4543_s5 + $0x2e8] sm:$0xff]  ;;  %v566_v9 = vld [vmem:[%s4543_s5 + $0x2f8] sm:$0xff] }
  0xb5   : > { %933 = vmatmul.f32.gmra.mxu1 %v336_v30  ;;  %1015 = vmatmul.f32.gmra.mxu3 %v338_v31  ;;  %v340_v30 = vld [vmem:[%s4535_s27 + $0x1e8] sm:$0xff]  ;;  %v342_v31 = vld [vmem:[%s4535_s27 + $0x1f8] sm:$0xff] }
  0xb6   : > { %1238 = vmatpush.xpose.msra.mxu1 %v544_v10  ;;  %1320 = vmatpush.xpose.msra.mxu3 %v546_v11 }
  0xb8   : > { %1198 = vmatpush.xpose.msra.mxu0 %v535_v12  ;;  %1280 = vmatpush.xpose.msra.mxu2 %v537_v13  ;;  %v555_v12 = vld [vmem:[%s4543_s5 + $0x2a0] sm:$0xff]  ;;  %v557_v13 = vld [vmem:[%s4543_s5 + $0x2b0] sm:$0xff] }
  0xba   : > { %1239 = vmatpush.xpose.msra.mxu1 %v536_v18  ;;  %1321 = vmatpush.xpose.msra.mxu3 %v538_v19  ;;  %v370_v19 = vld [vmem:[%s4535_s27 + $0x2d8] sm:$0xff] }
  0xbb   : > { %1035 = vmatmul.f32.vlgmr.msrb.gmra.mxu0 %v283_v32  ;;  %1117 = vmatmul.f32.vlgmr.msrb.gmra.mxu2 %v285_v33  ;;  %v343_v33 = vld [vmem:[%s4535_s27 + $0x200] sm:$0xff] }
  0xbc   : > { %1437 = vmatpush.xpose.msrb.mxu2 %v597_v38  ;;  %1355 = vmatpush.xpose.msrb.mxu0 %v595_v39  ;;  %v540_v38 = vld [vmem:[%s4543_s5 + $0x228] sm:$0xff]  ;;  %v542_v39 = vld [vmem:[%s4543_s5 + $0x238] sm:$0xff] }
  0xbd   : > { %1076 = vmatmul.f32.vlgmr.msrb.gmra.mxu1 %v284_v34  ;;  %1158 = vmatmul.f32.vlgmr.msrb.gmra.mxu3 %v286_v35  ;;  %v345_v34 = vld [vmem:[%s4535_s27 + $0x210] sm:$0xff] }
  0xbe   : > { %1478 = vmatpush.xpose.msrb.mxu3 %v598_v40  ;;  %1396 = vmatpush.xpose.msrb.mxu1 %v596_v41 }
  0xc2   : > { %1397 = vmatpush.xpose.msrb.mxu1 %v588_v52  ;;  %1479 = vmatpush.xpose.msrb.mxu3 %v590_v53 }
  0xc3   : > { %1038 = vmatmul.f32.gmra.mxu0 %v291_v44  ;;  %1120 = vmatmul.f32.gmra.mxu2 %v293_v45  ;;  %v587_v44 = vld [vmem:[%s4543_s5 + $0x3a0] sm:$0xff]  ;;  %v589_v45 = vld [vmem:[%s4543_s5 + $0x3b0] sm:$0xff] }
  0xc4   : > { %1356 = vmatpush.xpose.msrb.mxu0 %v587_v44  ;;  %1438 = vmatpush.xpose.msrb.mxu2 %v589_v45  ;;  %v383_v45 = vld [vmem:[%s4535_s27 + $0x340] sm:$0xff] }
  0xc5   : > { %1079 = vmatmul.f32.gmra.mxu1 %v292_v46  ;;  %1161 = vmatmul.f32.gmra.mxu3 %v294_v47  ;;  %v351_v47 = vld [vmem:[%s4535_s27 + $0x240] sm:$0xff] }
  0xc8   : > { %1357 = vmatpush.xpose.msrb.mxu0 %v579_v54  ;;  %1439 = vmatpush.xpose.msrb.mxu2 %v581_v55  ;;  %v391_v55 = vld [vmem:[%s4535_s27 + $0x380] sm:$0xff] }
  0xcb   : > { %1041 = vmatmul.f32.gmra.mxu0 %v299_v56  ;;  %1123 = vmatmul.f32.gmra.mxu2 %v301_v57  ;;  %v580_v56 = vld [vmem:[%s4543_s5 + $0x368] sm:$0xff]  ;;  %v582_v57 = vld [vmem:[%s4543_s5 + $0x378] sm:$0xff] }
  0xcc   : > { %1398 = vmatpush.xpose.msrb.mxu1 %v580_v56  ;;  %1480 = vmatpush.xpose.msrb.mxu3 %v582_v57  ;;  %v393_v56 = vld [vmem:[%s4535_s27 + $0x390] sm:$0xff] }
  0xcd   : > { %1082 = vmatmul.f32.gmra.mxu1 %v300_v58  ;;  %1164 = vmatmul.f32.gmra.mxu3 %v302_v59 }
  0xce   : > { %1358 = vmatpush.xpose.msrb.mxu0 %v571_v60  ;;  %1440 = vmatpush.xpose.msrb.mxu2 %v573_v61  ;;  %v392_v60 = vld [vmem:[%s4535_s27 + $0x388] sm:$0xff]  ;;  %v394_v61 = vld [vmem:[%s4535_s27 + $0x398] sm:$0xff] }
  0xd3   : > { %1044 = vmatmul.f32.gmra.mxu0 %v307_v4  ;;  %1126 = vmatmul.f32.gmra.mxu2 %v309_v5  ;;  %v572_v4 = vld [vmem:[%s4543_s5 + $0x328] sm:$0xff]  ;;  %v574_v5 = vld [vmem:[%s4543_s5 + $0x338] sm:$0xff] }
  0xd4   : > { %1399 = vmatpush.xpose.msrb.mxu1 %v572_v4  ;;  %1481 = vmatpush.xpose.msrb.mxu3 %v574_v5  ;;  %v401_v4 = vld [vmem:[%s4535_s27 + $0x3d0] sm:$0xff] }
  0xd5   : > { %1085 = vmatmul.f32.gmra.mxu1 %v308_v6  ;;  %1167 = vmatmul.f32.gmra.mxu3 %v310_v7  ;;  %v563_v6 = vld [vmem:[%s4543_s5 + $0x2e0] sm:$0xff]  ;;  %v565_v7 = vld [vmem:[%s4543_s5 + $0x2f0] sm:$0xff] }
  0xd6   : > { %1359 = vmatpush.xpose.msrb.mxu0 %v563_v6  ;;  %1441 = vmatpush.xpose.msrb.mxu2 %v565_v7  ;;  %v400_v7 = vld [vmem:[%s4535_s27 + $0x3c8] sm:$0xff] }
  0xd8   : > { %1400 = vmatpush.xpose.msrb.mxu1 %v564_v8  ;;  %1482 = vmatpush.xpose.msrb.mxu3 %v566_v9  ;;  %v402_v8 = vld [vmem:[%s4535_s27 + $0x3d8] sm:$0xff] }
  0xda   : > { %1360 = vmatpush.xpose.msrb.mxu0 %v555_v12  ;;  %1442 = vmatpush.xpose.msrb.mxu2 %v557_v13 }
  0xdb   : > { %1047 = vmatmul.f32.gmra.mxu0 %v315_v14  ;;  %1129 = vmatmul.f32.gmra.mxu2 %v317_v15  ;;  %v367_v15 = vld [vmem:[%s4535_s27 + $0x2c0] sm:$0xff] }
  0xdd   : > { %1088 = vmatmul.f32.gmra.mxu1 %v316_v16  ;;  %1170 = vmatmul.f32.gmra.mxu3 %v318_v17  ;;  %v369_v16 = vld [vmem:[%s4535_s27 + $0x2d0] sm:$0xff]  ;;  %v368_v17 = vld [vmem:[%s4535_s27 + $0x2c8] sm:$0xff] }
  0xe3   : > { %1050 = vmatmul.f32.gmra.mxu0 %v323_v20  ;;  %1132 = vmatmul.f32.gmra.mxu2 %v325_v21  ;;  %v556_v20 = vld [vmem:[%s4543_s5 + $0x2a8] sm:$0xff]  ;;  %v558_v21 = vld [vmem:[%s4543_s5 + $0x2b8] sm:$0xff] }
  0xe4   : > { %1401 = vmatpush.xpose.msrb.mxu1 %v556_v20  ;;  %1483 = vmatpush.xpose.msrb.mxu3 %v558_v21  ;;  %v348_v20 = vld [vmem:[%s4535_s27 + $0x228] sm:$0xff]  ;;  %v350_v21 = vld [vmem:[%s4535_s27 + $0x238] sm:$0xff] }
  0xe5   : > { %1091 = vmatmul.f32.gmra.mxu1 %v324_v22  ;;  %1173 = vmatmul.f32.gmra.mxu3 %v326_v23  ;;  %v547_v22 = vld [vmem:[%s4543_s5 + $0x260] sm:$0xff]  ;;  %v549_v23 = vld [vmem:[%s4543_s5 + $0x270] sm:$0xff] }
  0xe6   : > { %1361 = vmatpush.xpose.msrb.mxu0 %v547_v22  ;;  %1443 = vmatpush.xpose.msrb.mxu2 %v549_v23 }
  0xeb   : > { %1053 = vmatmul.f32.gmra.mxu0 %v331_v24  ;;  %1135 = vmatmul.f32.gmra.mxu2 %v333_v25  ;;  %v548_v24 = vld [vmem:[%s4543_s5 + $0x268] sm:$0xff]  ;;  %v550_v25 = vld [vmem:[%s4543_s5 + $0x278] sm:$0xff] }
  0xec   : > { %1402 = vmatpush.xpose.msrb.mxu1 %v548_v24  ;;  %1484 = vmatpush.xpose.msrb.mxu3 %v550_v25 }
  0xed   : > { %1094 = vmatmul.f32.gmra.mxu1 %v332_v26  ;;  %1176 = vmatmul.f32.gmra.mxu3 %v334_v27 }
  0xf0   : > { %1403 = vmatpush.xpose.msrb.mxu1 %v540_v38  ;;  %1485 = vmatpush.xpose.msrb.mxu3 %v542_v39  ;;  %v358_v38 = vld [vmem:[%s4535_s27 + $0x278] sm:$0xff] }
  0xf3   : > { %1056 = vmatmul.f32.gmra.mxu0 %v339_v28  ;;  %1138 = vmatmul.f32.gmra.mxu2 %v341_v29  ;;  %v539_v28 = vld [vmem:[%s4543_s5 + $0x220] sm:$0xff]  ;;  %v541_v29 = vld [vmem:[%s4543_s5 + $0x230] sm:$0xff] }
  0xf4   : > { %1362 = vmatpush.xpose.msrb.mxu0 %v539_v28  ;;  %1444 = vmatpush.xpose.msrb.mxu2 %v541_v29  ;;  %v355_v28 = vld [vmem:[%s4535_s27 + $0x260] sm:$0xff]  ;;  %v357_v29 = vld [vmem:[%s4535_s27 + $0x270] sm:$0xff] }
  0xf5   : > { %1097 = vmatmul.f32.gmra.mxu1 %v340_v30  ;;  %1179 = vmatmul.f32.gmra.mxu3 %v342_v31  ;;  %v375_v31 = vld [vmem:[%s4535_s27 + $0x300] sm:$0xff] }
  0xf8   : > { %v4709_v32 = vpop.f32.mrf.mxu0 }
  0xfa   : > { %v4713_v35 = vpop.f32.mrf.mxu1 }
  0xfb   : > { %1199 = vmatmul.f32.vlgmr.msra.gmra.mxu0 %v343_v33  ;;  %1281 = vmatmul.f32.vlgmr.msra.gmra.mxu2 %v345_v34  ;;  %v377_v33 = vld [vmem:[%s4535_s27 + $0x310] sm:$0xff]  ;;  %v376_v34 = vld [vmem:[%s4535_s27 + $0x308] sm:$0xff]  ;;  %v914_v5 = vadd.f32 %v4713_v35, %v4709_v32  ;;  %v347_v32 = vld [vmem:[%s4535_s27 + $0x220] sm:$0xff] }
  0xfc   : > { %v349_v35 = vld [vmem:[%s4535_s27 + $0x230] sm:$0xff] }
  0xfd   : > { %1240 = vmatmul.f32.vlgmr.msra.gmra.mxu1 %v344_v36  ;;  %1322 = vmatmul.f32.vlgmr.msra.gmra.mxu3 %v346_v37  ;;  %v378_v37 = vld [vmem:[%s4535_s27 + $0x318] sm:$0xff] }
  0xfe   : > { %v4721_v42 = vpop.f32.mrf.mxu2 }
  0xff   : > { %v955_v9 = vadd.f32 %v4721_v42, %v914_v5  ;;  %v364_v5 = vld [vmem:[%s4535_s27 + $0x2a8] sm:$0xff] }
 0x100   : > { %v4723_v43 = vpop.f32.mrf.mxu3  ;;  %v4727_v46 = vpop.f32.mrf.mxu0 }
 0x101   : > { %v996_v13 = vadd.f32 %v4723_v43, %v955_v9 }
 0x102   : > { %v4732_v50 = vpop.f32.mrf.mxu1 }
 0x103   : > { %1202 = vmatmul.f32.gmra.mxu0 %v351_v47  ;;  %1284 = vmatmul.f32.gmra.mxu2 %v353_v48  ;;  %v385_v47 = vld [vmem:[%s4535_s27 + $0x350] sm:$0xff] }
 0x105   : > { %1243 = vmatmul.f32.gmra.mxu1 %v352_v49  ;;  %1325 = vmatmul.f32.gmra.mxu3 %v354_v51  ;;  %v384_v49 = vld [vmem:[%s4535_s27 + $0x348] sm:$0xff]  ;;  %v386_v51 = vld [vmem:[%s4535_s27 + $0x358] sm:$0xff] }
 0x106   : > { %v4741_v58 = vpop.f32.mrf.mxu2 }
 0x108   : > { %v4743_v59 = vpop.f32.mrf.mxu3  ;;  %v4747_v62 = vpop.f32.mrf.mxu0 }
 0x10a   : > { %v4752_v2 = vpop.f32.mrf.mxu1 }
 0x10b   : > { %1205 = vmatmul.f32.gmra.mxu0 %v359_v63  ;;  %1287 = vmatmul.f32.gmra.mxu2 %v361_v0 }
 0x10d   : > { %1246 = vmatmul.f32.gmra.mxu1 %v360_v1  ;;  %1328 = vmatmul.f32.gmra.mxu3 %v362_v3  ;;  %v399_v3 = vld [vmem:[%s4535_s27 + $0x3c0] sm:$0xff] }
 0x10e   : > { %v4761_v10 = vpop.f32.mrf.mxu2 }
 0x110   : > { %v4763_v11 = vpop.f32.mrf.mxu3  ;;  %v4767_v14 = vpop.f32.mrf.mxu0 }
 0x112   : > { %v4772_v18 = vpop.f32.mrf.mxu1 }
 0x113   : > { %1208 = vmatmul.f32.gmra.mxu0 %v367_v15  ;;  %1290 = vmatmul.f32.gmra.mxu2 %v369_v16 }
 0x115   : > { %1249 = vmatmul.f32.gmra.mxu1 %v368_v17  ;;  %1331 = vmatmul.f32.gmra.mxu3 %v370_v19  ;;  %v917_v17 = vadd.f32 %v4732_v50, %v4727_v46 }
 0x116   : > { %v4781_v26 = vpop.f32.mrf.mxu2 }
 0x117   : > { %v958_v22 = vadd.f32 %v4741_v58, %v917_v17  ;;  %v373_v17 = vld [vmem:[%s4535_s27 + $0x2f0] sm:$0xff] }
 0x118   : > { %v4783_v27 = vpop.f32.mrf.mxu3  ;;  %v4787_v30 = vpop.f32.mrf.mxu0 }
 0x119   : > { %v999_v24 = vadd.f32 %v4743_v59, %v958_v22  ;;  %v372_v22 = vld [vmem:[%s4535_s27 + $0x2e8] sm:$0xff] }
 0x11a   : > { %v4792_v36 = vpop.f32.mrf.mxu1 }
 0x11b   : > { %1211 = vmatmul.f32.gmra.mxu0 %v375_v31  ;;  %1293 = vmatmul.f32.gmra.mxu2 %v377_v33  ;;  %v920_v31 = vadd.f32 %v4752_v2, %v4747_v62 }
 0x11d   : > { %1252 = vmatmul.f32.gmra.mxu1 %v376_v34  ;;  %1334 = vmatmul.f32.gmra.mxu3 %v378_v37  ;;  %v356_v37 = vld [vmem:[%s4535_s27 + $0x268] sm:$0xff]  ;;  %v961_v39 = vadd.f32 %v4761_v10, %v920_v31  ;;  %v363_v10 = vld [vmem:[%s4535_s27 + $0x2a0] sm:$0xff] }
 0x11e   : > { %v4797_v40 = vpop.f32.mrf.mxu2 }
 0x120   : > { %v4799_v41 = vpop.f32.mrf.mxu3  ;;  %v4801_v44 = vpop.f32.mrf.mxu0 }
 0x122   : > { %v4805_v48 = vpop.f32.mrf.mxu1 }
 0x123   : > { %1214 = vmatmul.f32.gmra.mxu0 %v383_v45  ;;  %1296 = vmatmul.f32.gmra.mxu2 %v385_v47  ;;  %v1002_v47 = vadd.f32 %v4763_v11, %v961_v39  ;;  %v381_v39 = vld [vmem:[%s4535_s27 + $0x330] sm:$0xff] }
 0x125   : > { %1255 = vmatmul.f32.gmra.mxu1 %v384_v49  ;;  %1337 = vmatmul.f32.gmra.mxu3 %v386_v51 }
 0x126   : > { %v4809_v52 = vpop.f32.mrf.mxu2 }
 0x128   : > { %v4811_v53 = vpop.f32.mrf.mxu3  ;;  %v4813_v54 = vpop.f32.mrf.mxu0 }
 0x12a   : > { %v4817_v57 = vpop.f32.mrf.mxu1 }
 0x12b   : > { %1217 = vmatmul.f32.gmra.mxu0 %v391_v55  ;;  %1299 = vmatmul.f32.gmra.mxu2 %v393_v56  ;;  %v365_v56 = vld [vmem:[%s4535_s27 + $0x2b0] sm:$0xff] }
 0x12d   : > { %1258 = vmatmul.f32.gmra.mxu1 %v392_v60  ;;  %1340 = vmatmul.f32.gmra.mxu3 %v394_v61  ;;  %v923_v60 = vadd.f32 %v4772_v18, %v4767_v14 }
 0x12e   : > { %v4821_v63 = vpop.f32.mrf.mxu2 }
 0x130   : > { %v4823_v0 = vpop.f32.mrf.mxu3  ;;  %v4825_v1 = vpop.f32.mrf.mxu0 }
 0x132   : > { %v4831_v6 = vpop.f32.mrf.mxu1 }
 0x133   : > { %1220 = vmatmul.f32.gmra.mxu0 %v399_v3  ;;  %1302 = vmatmul.f32.gmra.mxu2 %v401_v4 }
 0x135   : > { %1261 = vmatmul.f32.gmra.mxu1 %v400_v7  ;;  %1343 = vmatmul.f32.gmra.mxu3 %v402_v8  ;;  %v366_v7 = vld [vmem:[%s4535_s27 + $0x2b8] sm:$0xff]  ;;  %v964_v8 = vadd.f32 %v4781_v26, %v923_v60 }
 0x136   : > { %v4836_v12 = vpop.f32.mrf.mxu2 }
 0x138   : > { %v4839_v15 = vpop.f32.mrf.mxu3  ;;  %v1036_v16 = vpop.f32.mrf.mxu0 }
 0x139   : > { %v1037_v19 = vadd.f32 %v1036_v16, %v996_v13  ;;  %v1005_v13 = vadd.f32 %v4783_v27, %v964_v8 }
 0x13a   : > { %v1077_v42 = vpop.f32.mrf.mxu1 }
 0x13b   : > { %1363 = vmatmul.f32.vlgmr.msrb.gmra.mxu0 %v347_v32  ;;  %1445 = vmatmul.f32.vlgmr.msrb.gmra.mxu2 %v349_v35  ;;  %v1078_v43 = vadd.f32 %v1077_v42, %v1037_v19  ;;  %v371_v35 = vld [vmem:[%s4535_s27 + $0x2e0] sm:$0xff]  ;;  %v926_v19 = vadd.f32 %v4792_v36, %v4787_v30 }
 0x13d   : > { %1404 = vmatmul.f32.vlgmr.msrb.gmra.mxu1 %v348_v20  ;;  %1486 = vmatmul.f32.vlgmr.msrb.gmra.mxu3 %v350_v21  ;;  %v967_v27 = vadd.f32 %v4797_v40, %v926_v19  ;;  %v649_v40 = vld [vmem:[%s4543_s5 + $0x590] sm:$0xff]  ;;  %v388_v19 = vld [vmem:[%s4535_s27 + $0x368] sm:$0xff] }
 0x13e   : > { %v1118_v23 = vpop.f32.mrf.mxu2 }
 0x13f   : > { %v1119_v25 = vadd.f32 %v1118_v23, %v1078_v43  ;;  %v374_v43 = vld [vmem:[%s4535_s27 + $0x2f8] sm:$0xff]  ;;  %v657_v23 = vld [vmem:[%s4543_s5 + $0x5d0] sm:$0xff] }
 0x140   : > { %v1159_v46 = vpop.f32.mrf.mxu3  ;;  %v1039_v50 = vpop.f32.mrf.mxu0  ;;  %1601 = vmatpush.xpose.msra.mxu2 %v657_v23 }
 0x141   : > { %v1040_v33 = vadd.f32 %v1039_v50, %v999_v24  ;;  %v1160_v58 = vadd.f32 %v1159_v46, %v1119_v25  ;;  %v655_v25 = vld [vmem:[%s4543_s5 + $0x5c0] sm:$0xff]  ;;  %v658_v46 = vld [vmem:[%s4543_s5 + $0x5d8] sm:$0xff]  ;;  %v656_v50 = vld [vmem:[%s4543_s5 + $0x5c8] sm:$0xff] }
 0x142   : > { %v1080_v34 = vpop.f32.mrf.mxu1  ;;  %1519 = vmatpush.xpose.msra.mxu0 %v655_v25  ;;  %1642 = vmatpush.xpose.msra.mxu3 %v658_v46  ;;  %v617_v25 = vld [vmem:[%s4543_s5 + $0x490] sm:$0xff] }
 0x143   : > { %1366 = vmatmul.f32.gmra.mxu0 %v355_v28  ;;  %1448 = vmatmul.f32.gmra.mxu2 %v357_v29  ;;  %v4856_v59 = vmul.f32 0.03125, %v1160_v58  ;;  %v1081_v45 = vadd.f32 %v1080_v34, %v1040_v33  ;;  %v1008_v29 = vadd.f32 %v4799_v41, %v967_v27  ;;  %v647_v58 = vld [vmem:[%s4543_s5 + $0x580] sm:$0xff]  ;;  %v650_v34 = vld [vmem:[%s4543_s5 + $0x598] sm:$0xff] }
 0x144   : > { %1560 = vmatpush.xpose.msra.mxu1 %v656_v50  ;;  %1602 = vmatpush.xpose.msra.mxu2 %v649_v40  ;;  %v382_v41 = vld [vmem:[%s4535_s27 + $0x338] sm:$0xff]  ;;  %v615_v50 = vld [vmem:[%s4543_s5 + $0x480] sm:$0xff] }
 0x145   : > { %1407 = vmatmul.f32.gmra.mxu1 %v356_v37  ;;  %1489 = vmatmul.f32.gmra.mxu3 %v358_v38  ;;  %v1864_v62 = vsel %vm1863_vm0, %v4856_v59, -inf  ;;  %v379_v38 = vld [vmem:[%s4535_s27 + $0x320] sm:$0xff] }
 0x146   : > { %v1121_v2 = vpop.f32.mrf.mxu2  ;;  %1865 = vmax.xlane.f32.xlu0 %v1864_v62  ;;  %1520 = vmatpush.xpose.msra.mxu0 %v647_v58 }
 0x147   : > { %v1122_v49 = vadd.f32 %v1121_v2, %v1081_v45  ;;  %v929_v45 = vadd.f32 %v4805_v48, %v4801_v44  ;;  %1643 = vmatpush.xpose.msra.mxu3 %v650_v34  ;;  %v639_v44 = vld [vmem:[%s4543_s5 + $0x540] sm:$0xff]  ;;  %v642_v48 = vld [vmem:[%s4543_s5 + $0x558] sm:$0xff] }
 0x148   : > { %v1162_v51 = vpop.f32.mrf.mxu3  ;;  %v1042_v55 = vpop.f32.mrf.mxu0 }
 0x149   : > { %v1043_v61 = vadd.f32 %v1042_v55, %v1002_v47  ;;  %v1163_v3 = vadd.f32 %v1162_v51, %v1122_v49  ;;  %v380_v49 = vld [vmem:[%s4535_s27 + $0x328] sm:$0xff]  ;;  %v641_v55 = vld [vmem:[%s4543_s5 + $0x550] sm:$0xff] }
 0x14a   : > { %v1083_v4 = vpop.f32.mrf.mxu1  ;;  %v648_v51 = vld [vmem:[%s4543_s5 + $0x588] sm:$0xff]  ;;  %1603 = vmatpush.xpose.msra.mxu2 %v641_v55  ;;  %1521 = vmatpush.xpose.msra.mxu0 %v639_v44  ;;  %v601_v44 = vld [vmem:[%s4543_s5 + $0x410] sm:$0xff] }
 0x14b   : > { %v4868_v9 = vmul.f32 0.03125, %v1163_v3  ;;  %1369 = vmatmul.f32.gmra.mxu0 %v363_v10  ;;  %1451 = vmatmul.f32.gmra.mxu2 %v365_v56  ;;  %v1084_v11 = vadd.f32 %v1083_v4, %v1043_v61  ;;  %v970_v10 = vadd.f32 %v4809_v52, %v929_v45  ;;  %v640_v52 = vld [vmem:[%s4543_s5 + $0x548] sm:$0xff]  ;;  %v633_v4 = vld [vmem:[%s4543_s5 + $0x510] sm:$0xff] }
 0x14c   : > { %1561 = vmatpush.xpose.msra.mxu1 %v648_v51  ;;  %1644 = vmatpush.xpose.msra.mxu3 %v642_v48 }
 0x14d   : > { %1410 = vmatmul.f32.gmra.mxu1 %v364_v5  ;;  %1492 = vmatmul.f32.gmra.mxu3 %v366_v7  ;;  %v1867_v14 = vsel %vm1863_vm0, %v4868_v9, -inf  ;;  %v1011_v5 = vadd.f32 %v4811_v53, %v970_v10  ;;  %v390_v53 = vld [vmem:[%s4535_s27 + $0x378] sm:$0xff] }
 0x14e   : > { %v1124_v18 = vpop.f32.mrf.mxu2  ;;  %1868 = vmax.xlane.f32.xlu0 %v1867_v14  ;;  %v634_v14 = vld [vmem:[%s4543_s5 + $0x518] sm:$0xff]  ;;  %1604 = vmatpush.xpose.msra.mxu2 %v633_v4 }
 0x14f   : > { %v1125_v16 = vadd.f32 %v1124_v18, %v1084_v11  ;;  %v631_v11 = vld [vmem:[%s4543_s5 + $0x500] sm:$0xff] }
 0x150   : > { %v1165_v32 = vpop.f32.mrf.mxu3  ;;  %v1045_v26 = vpop.f32.mrf.mxu0  ;;  %1562 = vmatpush.xpose.msra.mxu1 %v640_v52  ;;  %1522 = vmatpush.xpose.msra.mxu0 %v631_v11 }
 0x151   : > { %v1046_v42 = vadd.f32 %v1045_v26, %v1005_v13  ;;  %v1166_v20 = vadd.f32 %v1165_v32, %v1125_v16  ;;  %v387_v13 = vld [vmem:[%s4535_s27 + $0x360] sm:$0xff]  ;;  %v389_v16 = vld [vmem:[%s4535_s27 + $0x370] sm:$0xff]  ;;  %v932_v32 = vadd.f32 %v4817_v57, %v4813_v54  ;;  %1645 = vmatpush.xpose.msra.mxu3 %v634_v14  ;;  %v626_v57 = vld [vmem:[%s4543_s5 + $0x4d8] sm:$0xff] }
 0x152   : > { %v1086_v21 = vpop.f32.mrf.mxu1  ;;  %v623_v54 = vld [vmem:[%s4543_s5 + $0x4c0] sm:$0xff]  ;;  %v600_v14 = vld [vmem:[%s4543_s5 + $0x408] sm:$0xff] }
 0x153   : > { %1372 = vmatmul.f32.gmra.mxu0 %v371_v35  ;;  %1454 = vmatmul.f32.gmra.mxu2 %v373_v17  ;;  %v4881_v24 = vmul.f32 0.03125, %v1166_v20  ;;  %v1087_v30 = vadd.f32 %v1086_v21, %v1046_v42  ;;  %v632_v42 = vld [vmem:[%s4543_s5 + $0x508] sm:$0xff]  ;;  %v625_v20 = vld [vmem:[%s4543_s5 + $0x4d0] sm:$0xff]  ;;  %v973_v21 = vadd.f32 %v4821_v63, %v932_v32 }
 0x154   : > { %1563 = vmatpush.xpose.msra.mxu1 %v632_v42  ;;  %1605 = vmatpush.xpose.msra.mxu2 %v625_v20  ;;  %v624_v63 = vld [vmem:[%s4543_s5 + $0x4c8] sm:$0xff]  ;;  %v410_v20 = vld [vmem:[%s4535_s27 + $0x418] sm:$0xff] }
 0x155   : > { %1413 = vmatmul.f32.gmra.mxu1 %v372_v22  ;;  %1495 = vmatmul.f32.gmra.mxu3 %v374_v43  ;;  %v1870_v36 = vsel %vm1863_vm0, %v4881_v24, -inf  ;;  %v1014_v46 = vadd.f32 %v4823_v0, %v973_v21  ;;  %v618_v0 = vld [vmem:[%s4543_s5 + $0x498] sm:$0xff]  ;;  %v408_v21 = vld [vmem:[%s4535_s27 + $0x408] sm:$0xff] }
 0x156   : > { %v1127_v28 = vpop.f32.mrf.mxu2  ;;  %1871 = vmax.xlane.f32.xlu1 %v1870_v36  ;;  %1523 = vmatpush.xpose.msra.mxu0 %v623_v54 }
 0x157   : > { %v1128_v31 = vadd.f32 %v1127_v28, %v1087_v30  ;;  %1646 = vmatpush.xpose.msra.mxu3 %v626_v57  ;;  %v395_v28 = vld [vmem:[%s4535_s27 + $0x3a0] sm:$0xff] }
 0x158   : > { %v1168_v33 = vpop.f32.mrf.mxu3  ;;  %v1048_v37 = vpop.f32.mrf.mxu0  ;;  %1564 = vmatpush.xpose.msra.mxu1 %v624_v63  ;;  %1606 = vmatpush.xpose.msra.mxu2 %v617_v25 }
 0x159   : > { %v1049_v62 = vadd.f32 %v1048_v37, %v1008_v29  ;;  %v1169_v2 = vadd.f32 %v1168_v33, %v1128_v31  ;;  %v397_v29 = vld [vmem:[%s4535_s27 + $0x3b0] sm:$0xff]  ;;  %v935_v31 = vadd.f32 %v4831_v6, %v4825_v1  ;;  %v396_v37 = vld [vmem:[%s4535_s27 + $0x3a8] sm:$0xff]  ;;  %v607_v6 = vld [vmem:[%s4543_s5 + $0x440] sm:$0xff] }
 0x15a   : > { %v1089_v47 = vpop.f32.mrf.mxu1  ;;  %1524 = vmatpush.xpose.msra.mxu0 %v615_v50  ;;  %v609_v1 = vld [vmem:[%s4543_s5 + $0x450] sm:$0xff] }
 0x15b   : > { %v4901_v56 = vmul.f32 0.03125, %v1169_v2  ;;  %1375 = vmatmul.f32.gmra.mxu0 %v379_v38  ;;  %1457 = vmatmul.f32.gmra.mxu2 %v381_v39  ;;  %v1090_v60 = vadd.f32 %v1089_v47, %v1049_v62  ;;  %v398_v38 = vld [vmem:[%s4535_s27 + $0x3b8] sm:$0xff]  ;;  %v616_v39 = vld [vmem:[%s4543_s5 + $0x488] sm:$0xff]  ;;  %v976_v45 = vadd.f32 %v4836_v12, %v935_v31 }
 0x15c   : > { %1647 = vmatpush.xpose.msra.mxu3 %v618_v0  ;;  %1565 = vmatpush.xpose.msra.mxu1 %v616_v39  ;;  %v610_v12 = vld [vmem:[%s4543_s5 + $0x458] sm:$0xff] }
 0x15d   : > { %1416 = vmatmul.f32.gmra.mxu1 %v380_v49  ;;  %1498 = vmatmul.f32.gmra.mxu3 %v382_v41  ;;  %v1873_v61 = vsel %vm1863_vm0, %v4901_v56, -inf  ;;  %v608_v41 = vld [vmem:[%s4543_s5 + $0x448] sm:$0xff]  ;;  %v1017_v51 = vadd.f32 %v4839_v15, %v976_v45  ;;  %v602_v15 = vld [vmem:[%s4543_s5 + $0x418] sm:$0xff] }
 0x15e   : > { %v1130_v3 = vpop.f32.mrf.mxu2  ;;  %1874 = vmax.xlane.f32.xlu1 %v1873_v61  ;;  %1607 = vmatpush.xpose.msra.mxu2 %v609_v1  ;;  %v405_v61 = vld [vmem:[%s4535_s27 + $0x3f0] sm:$0xff]  ;;  %v426_v45 = vld [vmem:[%s4535_s27 + $0x498] sm:$0xff]  ;;  %v424_v1 = vld [vmem:[%s4535_s27 + $0x488] sm:$0xff] }
 0x15f   : > { %v1131_v7 = vadd.f32 %v1130_v3, %v1090_v60  ;;  %1525 = vmatpush.xpose.msra.mxu0 %v607_v6  ;;  %v403_v60 = vld [vmem:[%s4535_s27 + $0x3e0] sm:$0xff] }
 0x160   : > { %v1171_v8 = vpop.f32.mrf.mxu3  ;;  %v1051_v18 = vpop.f32.mrf.mxu0  ;;  %1648 = vmatpush.xpose.msra.mxu3 %v610_v12  ;;  %1566 = vmatpush.xpose.msra.mxu1 %v608_v41  ;;  %v433_v41 = vld [vmem:[%s4535_s27 + $0x4d0] sm:$0xff] }
 0x161   : > { %v1052_v26 = vadd.f32 %v1051_v18, %v1011_v5  ;;  %v1172_v35 = vadd.f32 %v1171_v8, %v1131_v7  ;;  %v404_v5 = vld [vmem:[%s4535_s27 + $0x3e8] sm:$0xff]  ;;  %v406_v7 = vld [vmem:[%s4535_s27 + $0x3f8] sm:$0xff]  ;;  %v599_v8 = vld [vmem:[%s4543_s5 + $0x400] sm:$0xff] }
 0x162   : > { %v1092_v17 = vpop.f32.mrf.mxu1  ;;  %1608 = vmatpush.xpose.msra.mxu2 %v601_v44  ;;  %v434_v44 = vld [vmem:[%s4535_s27 + $0x4d8] sm:$0xff] }
 0x163   : > { %1378 = vmatmul.f32.gmra.mxu0 %v387_v13  ;;  %1460 = vmatmul.f32.gmra.mxu2 %v389_v16  ;;  %v4921_v22 = vmul.f32 0.03125, %v1172_v35  ;;  %v1093_v43 = vadd.f32 %v1092_v17, %v1052_v26  ;;  %v409_v17 = vld [vmem:[%s4535_s27 + $0x410] sm:$0xff] }
 0x164   : > { %1526 = vmatpush.xpose.msra.mxu0 %v599_v8  ;;  %1649 = vmatpush.xpose.msra.mxu3 %v602_v15 }
 0x165   : > { %1419 = vmatmul.f32.gmra.mxu1 %v388_v19  ;;  %1501 = vmatmul.f32.gmra.mxu3 %v390_v53  ;;  %v1876_v23 = vsel %vm1863_vm0, %v4921_v22, -inf  ;;  %v407_v19 = vld [vmem:[%s4535_s27 + $0x400] sm:$0xff] }
 0x166   : > { %v1133_v27 = vpop.f32.mrf.mxu2  ;;  %1877 = vmax.xlane.f32.xlu2 %v1876_v23  ;;  %1567 = vmatpush.xpose.msra.mxu1 %v600_v14  ;;  %v651_v14 = vld [vmem:[%s4543_s5 + $0x5a0] sm:$0xff] }
 0x167   : > { %v1134_v30 = vadd.f32 %v1133_v27, %v1093_v43 }
 0x168   : > { %v1174_v36 = vpop.f32.mrf.mxu3  ;;  %v1054_v40 = vpop.f32.mrf.mxu0 }
 0x169   : > { %v1055_v33 = vadd.f32 %v1054_v40, %v1014_v46  ;;  %v1175_v58 = vadd.f32 %v1174_v36, %v1134_v30  ;;  %v417_v46 = vld [vmem:[%s4535_s27 + $0x450] sm:$0xff]  ;;  %v415_v30 = vld [vmem:[%s4535_s27 + $0x440] sm:$0xff]  ;;  %v418_v40 = vld [vmem:[%s4535_s27 + $0x458] sm:$0xff] }
 0x16a   : > { %v1095_v34 = vpop.f32.mrf.mxu1 }
 0x16b   : > { %v4940_v62 = vmul.f32 0.03125, %v1175_v58  ;;  %1381 = vmatmul.f32.gmra.mxu0 %v395_v28  ;;  %1463 = vmatmul.f32.gmra.mxu2 %v397_v29  ;;  %v1096_v2 = vadd.f32 %v1095_v34, %v1055_v33  ;;  %v416_v28 = vld [vmem:[%s4535_s27 + $0x448] sm:$0xff] }
 0x16d   : > { %1422 = vmatmul.f32.gmra.mxu1 %v396_v37  ;;  %1504 = vmatmul.f32.gmra.mxu3 %v398_v38  ;;  %v1879_v47 = vsel %vm1863_vm0, %v4940_v62, -inf  ;;  %v425_v37 = vld [vmem:[%s4535_s27 + $0x490] sm:$0xff]  ;;  %v423_v38 = vld [vmem:[%s4535_s27 + $0x480] sm:$0xff] }
 0x16e   : > { %v1136_v49 = vpop.f32.mrf.mxu2  ;;  %1880 = vmax.xlane.f32.xlu2 %v1879_v47 }
 0x16f   : > { %v1137_v55 = vadd.f32 %v1136_v49, %v1096_v2 }
 0x170   : > { %v1177_v10 = vpop.f32.mrf.mxu3  ;;  %v1057_v48 = vpop.f32.mrf.mxu0 }
 0x171   : > { %v1058_v52 = vadd.f32 %v1057_v48, %v1017_v51  ;;  %v1178_v3 = vadd.f32 %v1177_v10, %v1137_v55  ;;  %v431_v51 = vld [vmem:[%s4535_s27 + $0x4c0] sm:$0xff]  ;;  %v432_v48 = vld [vmem:[%s4535_s27 + $0x4c8] sm:$0xff] }
 0x172   : > { %v1098_v4 = vpop.f32.mrf.mxu1 }
 0x173   : > { %v4956_v11 = vmul.f32 0.03125, %v1178_v3  ;;  %1384 = vmatmul.f32.gmra.mxu0 %v403_v60  ;;  %1466 = vmatmul.f32.gmra.mxu2 %v405_v61  ;;  %v1099_v18 = vadd.f32 %v1098_v4, %v1058_v52  ;;  %v661_v60 = vld [vmem:[%s4543_s5 + $0x5f0] sm:$0xff]  ;;  %v659_v61 = vld [vmem:[%s4543_s5 + $0x5e0] sm:$0xff]  ;;  %v662_v3 = vld [vmem:[%s4543_s5 + $0x5f8] sm:$0xff] }
 0x174   : > { %1765 = vmatpush.xpose.msrb.mxu2 %v661_v60  ;;  %1683 = vmatpush.xpose.msrb.mxu0 %v659_v61  ;;  %v660_v4 = vld [vmem:[%s4543_s5 + $0x5e8] sm:$0xff] }
 0x175   : > { %1425 = vmatmul.f32.gmra.mxu1 %v404_v5  ;;  %1507 = vmatmul.f32.gmra.mxu3 %v406_v7  ;;  %v1882_v13 = vsel %vm1863_vm0, %v4956_v11, -inf  ;;  %v653_v5 = vld [vmem:[%s4543_s5 + $0x5b0] sm:$0xff] }
 0x176   : > { %v1139_v16 = vpop.f32.mrf.mxu2  ;;  %1883 = vmax.xlane.f32.xlu0 %v1882_v13  ;;  %1806 = vmatpush.xpose.msrb.mxu3 %v662_v3  ;;  %v620_v3 = vld [vmem:[%s4543_s5 + $0x4a8] sm:$0xff] }
 0x177   : > { %v1140_v32 = vadd.f32 %v1139_v16, %v1099_v18  ;;  %1724 = vmatpush.xpose.msrb.mxu1 %v660_v4  ;;  %v654_v18 = vld [vmem:[%s4543_s5 + $0x5b8] sm:$0xff]  ;;  %v441_v16 = vld [vmem:[%s4535_s27 + $0x510] sm:$0xff] }
 0x178   : > { %v1180_v26 = vpop.f32.mrf.mxu3  ;;  %v1200_v35 = vpop.f32.mrf.mxu0  ;;  %1766 = vmatpush.xpose.msrb.mxu2 %v653_v5  ;;  %1684 = vmatpush.xpose.msrb.mxu0 %v651_v14  ;;  %v613_v4 = vld [vmem:[%s4543_s5 + $0x470] sm:$0xff]  ;;  %v611_v5 = vld [vmem:[%s4543_s5 + $0x460] sm:$0xff] }
 0x179   : > { %v1181_v53 = vadd.f32 %v1180_v26, %v1140_v32  ;;  %v439_v32 = vld [vmem:[%s4535_s27 + $0x500] sm:$0xff]  ;;  %v442_v26 = vld [vmem:[%s4535_s27 + $0x518] sm:$0xff] }
 0x17a   : > { %v1241_v42 = vpop.f32.mrf.mxu1  ;;  %1807 = vmatpush.xpose.msrb.mxu3 %v654_v18 }
 0x17b   : > { %v4965_v54 = vmul.f32 0.03125, %v1181_v53  ;;  %v1242_v57 = vadd.f32 %v1241_v42, %v1200_v35  ;;  %1609 = vmatmul.f32.vlgmr.msra.gmra.mxu2 %v409_v17  ;;  %1527 = vmatmul.f32.vlgmr.msra.gmra.mxu0 %v407_v19  ;;  %v440_v19 = vld [vmem:[%s4535_s27 + $0x508] sm:$0xff]  ;;  %v645_v42 = vld [vmem:[%s4543_s5 + $0x570] sm:$0xff] }
 0x17c   : > { %v652_v53 = vld [vmem:[%s4543_s5 + $0x5a8] sm:$0xff]  ;;  %1767 = vmatpush.xpose.msrb.mxu2 %v645_v42 }
 0x17d   : > { %1650 = vmatmul.f32.vlgmr.msra.gmra.mxu3 %v410_v20  ;;  %1568 = vmatmul.f32.vlgmr.msra.gmra.mxu1 %v408_v21  ;;  %v1885_v43 = vsel %vm1863_vm0, %v4965_v54, -inf  ;;  %v643_v21 = vld [vmem:[%s4543_s5 + $0x560] sm:$0xff]  ;;  %v464_v42 = vld [vmem:[%s4535_s27 + $0x5c8] sm:$0xff] }
 0x17e   : > { %v1282_v23 = vpop.f32.mrf.mxu2  ;;  %1886 = vmax.xlane.f32.xlu2 %v1885_v43  ;;  %1725 = vmatpush.xpose.msrb.mxu1 %v652_v53  ;;  %v644_v43 = vld [vmem:[%s4543_s5 + $0x568] sm:$0xff]  ;;  %v466_v53 = vld [vmem:[%s4535_s27 + $0x5d8] sm:$0xff] }
 0x17f   : > { %v1283_v27 = vadd.f32 %v1282_v23, %v1242_v57  ;;  %v646_v57 = vld [vmem:[%s4543_s5 + $0x578] sm:$0xff]  ;;  %1685 = vmatpush.xpose.msrb.mxu0 %v643_v21  ;;  %v637_v23 = vld [vmem:[%s4543_s5 + $0x530] sm:$0xff] }
 0x180   : > { %v1323_v63 = vpop.f32.mrf.mxu3  ;;  %v1203_v25 = vpop.f32.mrf.mxu0  ;;  %1808 = vmatpush.xpose.msrb.mxu3 %v646_v57  ;;  %1768 = vmatpush.xpose.msrb.mxu2 %v637_v23 }
 0x181   : > { %v4971_v36 = vadd.f32 %v1323_v63, %v1283_v27 }
 0x182   : > { %v1244_v50 = vpop.f32.mrf.mxu1  ;;  %1726 = vmatpush.xpose.msrb.mxu1 %v644_v43 }
 0x183   : > { %v1245_v29 = vadd.f32 %v1244_v50, %v1203_v25  ;;  %1612 = vmatmul.f32.gmra.mxu2 %v417_v46  ;;  %1530 = vmatmul.f32.gmra.mxu0 %v415_v30  ;;  %v635_v46 = vld [vmem:[%s4543_s5 + $0x520] sm:$0xff]  ;;  %v638_v30 = vld [vmem:[%s4543_s5 + $0x538] sm:$0xff] }
 0x184   : > { %1686 = vmatpush.xpose.msrb.mxu0 %v635_v46  ;;  %1809 = vmatpush.xpose.msrb.mxu3 %v638_v30 }
 0x185   : > { %1653 = vmatmul.f32.gmra.mxu3 %v418_v40  ;;  %1571 = vmatmul.f32.gmra.mxu1 %v416_v28  ;;  %v449_v40 = vld [vmem:[%s4535_s27 + $0x550] sm:$0xff]  ;;  %v447_v28 = vld [vmem:[%s4535_s27 + $0x540] sm:$0xff] }
 0x186   : > { %v1285_v31 = vpop.f32.mrf.mxu2 }
 0x187   : > { %v1286_v33 = vadd.f32 %v1285_v31, %v1245_v29  ;;  %v450_v29 = vld [vmem:[%s4535_s27 + $0x558] sm:$0xff] }
 0x188   : > { %v1326_v58 = vpop.f32.mrf.mxu3  ;;  %v1206_v34 = vpop.f32.mrf.mxu0 }
 0x189   : > { %v4977_v0 = vadd.f32 %v1326_v58, %v1286_v33  ;;  %v448_v58 = vld [vmem:[%s4535_s27 + $0x548] sm:$0xff] }
 0x18a   : > { %v1247_v39 = vpop.f32.mrf.mxu1 }
 0x18b   : > { %v1248_v6 = vadd.f32 %v1247_v39, %v1206_v34  ;;  %1615 = vmatmul.f32.gmra.mxu2 %v425_v37  ;;  %1533 = vmatmul.f32.gmra.mxu0 %v423_v38  ;;  %v636_v34 = vld [vmem:[%s4543_s5 + $0x528] sm:$0xff]  ;;  %v629_v37 = vld [vmem:[%s4543_s5 + $0x4f0] sm:$0xff]  ;;  %v627_v39 = vld [vmem:[%s4543_s5 + $0x4e0] sm:$0xff] }
 0x18c   : > { %1727 = vmatpush.xpose.msrb.mxu1 %v636_v34  ;;  %1769 = vmatpush.xpose.msrb.mxu2 %v629_v37 }
 0x18d   : > { %1656 = vmatmul.f32.gmra.mxu3 %v426_v45  ;;  %1574 = vmatmul.f32.gmra.mxu1 %v424_v1  ;;  %v630_v45 = vld [vmem:[%s4543_s5 + $0x4f8] sm:$0xff]  ;;  %v628_v1 = vld [vmem:[%s4543_s5 + $0x4e8] sm:$0xff] }
 0x18e   : > { %v1288_v2 = vpop.f32.mrf.mxu2  ;;  %1687 = vmatpush.xpose.msrb.mxu0 %v627_v39  ;;  %1810 = vmatpush.xpose.msrb.mxu3 %v630_v45  ;;  %v419_v39 = vld [vmem:[%s4535_s27 + $0x460] sm:$0xff] }
 0x18f   : > { %v1289_v47 = vadd.f32 %v1288_v2, %v1248_v6  ;;  %v621_v6 = vld [vmem:[%s4543_s5 + $0x4b0] sm:$0xff] }
 0x190   : > { %v1329_v49 = vpop.f32.mrf.mxu3  ;;  %v1209_v12 = vpop.f32.mrf.mxu0  ;;  %1728 = vmatpush.xpose.msrb.mxu1 %v628_v1  ;;  %1770 = vmatpush.xpose.msrb.mxu2 %v621_v6  ;;  %v422_v1 = vld [vmem:[%s4535_s27 + $0x478] sm:$0xff]  ;;  %v420_v6 = vld [vmem:[%s4535_s27 + $0x468] sm:$0xff] }
 0x191   : > { %v4983_v55 = vadd.f32 %v1329_v49, %v1289_v47 }
 0x192   : > { %v1250_v10 = vpop.f32.mrf.mxu1 }
 0x193   : > { %v1251_v52 = vadd.f32 %v1250_v10, %v1209_v12  ;;  %1618 = vmatmul.f32.gmra.mxu2 %v433_v41  ;;  %1536 = vmatmul.f32.gmra.mxu0 %v431_v51  ;;  %v619_v12 = vld [vmem:[%s4543_s5 + $0x4a0] sm:$0xff]  ;;  %v622_v41 = vld [vmem:[%s4543_s5 + $0x4b8] sm:$0xff]  ;;  %v457_v10 = vld [vmem:[%s4535_s27 + $0x590] sm:$0xff] }
 0x194   : > { %1688 = vmatpush.xpose.msrb.mxu0 %v619_v12  ;;  %1811 = vmatpush.xpose.msrb.mxu3 %v622_v41 }
 0x195   : > { %1659 = vmatmul.f32.gmra.mxu3 %v434_v44  ;;  %1577 = vmatmul.f32.gmra.mxu1 %v432_v48  ;;  %v455_v44 = vld [vmem:[%s4535_s27 + $0x580] sm:$0xff]  ;;  %v458_v48 = vld [vmem:[%s4535_s27 + $0x598] sm:$0xff] }
 0x196   : > { %v1291_v7 = vpop.f32.mrf.mxu2  ;;  %1729 = vmatpush.xpose.msrb.mxu1 %v620_v3  ;;  %1771 = vmatpush.xpose.msrb.mxu2 %v613_v4  ;;  %v430_v3 = vld [vmem:[%s4535_s27 + $0x4b8] sm:$0xff]  ;;  %v428_v4 = vld [vmem:[%s4535_s27 + $0x4a8] sm:$0xff] }
 0x197   : > { %v1292_v8 = vadd.f32 %v1291_v7, %v1251_v52  ;;  %v456_v52 = vld [vmem:[%s4535_s27 + $0x588] sm:$0xff]  ;;  %v614_v7 = vld [vmem:[%s4543_s5 + $0x478] sm:$0xff] }
 0x198   : > { %v1332_v15 = vpop.f32.mrf.mxu3  ;;  %v1212_v13 = vpop.f32.mrf.mxu0  ;;  %1689 = vmatpush.xpose.msrb.mxu0 %v611_v5  ;;  %1812 = vmatpush.xpose.msrb.mxu3 %v614_v7 }
 0x199   : > { %v4997_v35 = vadd.f32 %v1332_v15, %v1292_v8  ;;  %v612_v8 = vld [vmem:[%s4543_s5 + $0x468] sm:$0xff]  ;;  %v605_v15 = vld [vmem:[%s4543_s5 + $0x430] sm:$0xff] }
 0x19a   : > { %v1253_v17 = vpop.f32.mrf.mxu1  ;;  %1730 = vmatpush.xpose.msrb.mxu1 %v612_v8  ;;  %1772 = vmatpush.xpose.msrb.mxu2 %v605_v15 }
 0x19b   : > { %v1254_v20 = vadd.f32 %v1253_v17, %v1212_v13  ;;  %1621 = vmatmul.f32.gmra.mxu2 %v441_v16  ;;  %1539 = vmatmul.f32.gmra.mxu0 %v439_v32  ;;  %v603_v13 = vld [vmem:[%s4543_s5 + $0x420] sm:$0xff]  ;;  %v606_v16 = vld [vmem:[%s4543_s5 + $0x438] sm:$0xff] }
 0x19c   : > { %v463_v17 = vld [vmem:[%s4535_s27 + $0x5c0] sm:$0xff]  ;;  %1690 = vmatpush.xpose.msrb.mxu0 %v603_v13  ;;  %1813 = vmatpush.xpose.msrb.mxu3 %v606_v16 }
 0x19d   : > { %1662 = vmatmul.f32.gmra.mxu3 %v442_v26  ;;  %1580 = vmatmul.f32.gmra.mxu1 %v440_v19  ;;  %v465_v26 = vld [vmem:[%s4535_s27 + $0x5d0] sm:$0xff] }
 0x19e   : > { %v1294_v27 = vpop.f32.mrf.mxu2 }
 0x19f   : > { %v1295_v63 = vadd.f32 %v1294_v27, %v1254_v20  ;;  %v604_v20 = vld [vmem:[%s4543_s5 + $0x428] sm:$0xff] }
 0x1a0   : > { %v1335_v25 = vpop.f32.mrf.mxu3  ;;  %v1215_v50 = vpop.f32.mrf.mxu0  ;;  %1731 = vmatpush.xpose.msrb.mxu1 %v604_v20 }
 0x1a1   : > { %v5011_v31 = vadd.f32 %v1335_v25, %v1295_v63  ;;  %v413_v63 = vld [vmem:[%s4535_s27 + $0x430] sm:$0xff]  ;;  %v411_v25 = vld [vmem:[%s4535_s27 + $0x420] sm:$0xff] }
 0x1a2   : > { %v1256_v33 = vpop.f32.mrf.mxu1 }
 0x1a3   : > { %v1257_v38 = vadd.f32 %v1256_v33, %v1215_v50  ;;  %1624 = vmatmul.f32.gmra.mxu2 %v449_v40  ;;  %1542 = vmatmul.f32.gmra.mxu0 %v447_v28  ;;  %v414_v40 = vld [vmem:[%s4535_s27 + $0x438] sm:$0xff]  ;;  %v412_v28 = vld [vmem:[%s4535_s27 + $0x428] sm:$0xff] }
 0x1a5   : > { %1665 = vmatmul.f32.gmra.mxu3 %v450_v29  ;;  %1583 = vmatmul.f32.gmra.mxu1 %v448_v58 }
 0x1a6   : > { %v1297_v2 = vpop.f32.mrf.mxu2 }
 0x1a7   : > { %v1298_v47 = vadd.f32 %v1297_v2, %v1257_v38  ;;  %v421_v38 = vld [vmem:[%s4535_s27 + $0x470] sm:$0xff] }
 0x1a8   : > { %v1338_v49 = vpop.f32.mrf.mxu3  ;;  %v5022_v51 = vpop.f32.mrf.mxu0 }
 0x1a9   : > { %v5027_v60 = vadd.f32 %v1338_v49, %v1298_v47 }
 0x1aa   : > { %v5029_v61 = vpop.f32.mrf.mxu1 }
 0x1ab   : > { %1627 = vmatmul.f32.gmra.mxu2 %v457_v10  ;;  %1545 = vmatmul.f32.gmra.mxu0 %v455_v44  ;;  %v429_v44 = vld [vmem:[%s4535_s27 + $0x4b0] sm:$0xff] }
 0x1ad   : > { %1668 = vmatmul.f32.gmra.mxu3 %v458_v48  ;;  %1586 = vmatmul.f32.gmra.mxu1 %v456_v52  ;;  %v427_v48 = vld [vmem:[%s4535_s27 + $0x4a0] sm:$0xff] }
 0x1ae   : > { %v5038_v14 = vpop.f32.mrf.mxu2 }
 0x1b0   : > { %v5040_v18 = vpop.f32.mrf.mxu3  ;;  %v1221_v32 = vpop.f32.mrf.mxu0 }
 0x1b2   : > { %v1262_v19 = vpop.f32.mrf.mxu1 }
 0x1b3   : > { %v1263_v21 = vadd.f32 %v1262_v19, %v1221_v32  ;;  %1630 = vmatmul.f32.gmra.mxu2 %v465_v26  ;;  %1548 = vmatmul.f32.gmra.mxu0 %v463_v17  ;;  %v437_v32 = vld [vmem:[%s4535_s27 + $0x4f0] sm:$0xff]  ;;  %v435_v26 = vld [vmem:[%s4535_s27 + $0x4e0] sm:$0xff]  ;;  %v438_v17 = vld [vmem:[%s4535_s27 + $0x4f8] sm:$0xff] }
 0x1b4   : > { %v436_v19 = vld [vmem:[%s4535_s27 + $0x4e8] sm:$0xff] }
 0x1b5   : > { %1671 = vmatmul.f32.gmra.mxu3 %v466_v53  ;;  %1589 = vmatmul.f32.gmra.mxu1 %v464_v42 }
 0x1b6   : > { %v1303_v57 = vpop.f32.mrf.mxu2 }
 0x1b7   : > { %v1304_v43 = vadd.f32 %v1303_v57, %v1263_v21 }
 0x1b8   : > { %v1344_v23 = vpop.f32.mrf.mxu3  ;;  %v5049_v27 = vpop.f32.mrf.mxu0 }
 0x1b9   : > { %v5053_v46 = vadd.f32 %v1344_v23, %v1304_v43  ;;  %v1866_v30 = vpop.xlane.xlu0 %1865 }
 0x1ba   : > { %v5055_v50 = vpop.f32.mrf.mxu1  ;;  %v1936_v29 = vsub.f32 %v4856_v59, %v1866_v30  ;;  %v443_v30 = vld [vmem:[%s4535_s27 + $0x520] sm:$0xff] }
 0x1bb   : > { %1773 = vmatmul.f32.vlgmr.msrb.gmra.mxu2 %v413_v63  ;;  %1691 = vmatmul.f32.vlgmr.msrb.gmra.mxu0 %v411_v25  ;;  %v445_v25 = vld [vmem:[%s4535_s27 + $0x530] sm:$0xff] }
 0x1bc   : > { %v1960_v33 = vmul.f32 1.442695, %v1936_v29 }
 0x1bd   : > { %1814 = vmatmul.f32.vlgmr.msrb.gmra.mxu3 %v414_v40  ;;  %1732 = vmatmul.f32.vlgmr.msrb.gmra.mxu1 %v412_v28  ;;  %v446_v40 = vld [vmem:[%s4535_s27 + $0x538] sm:$0xff]  ;;  %v444_v28 = vld [vmem:[%s4535_s27 + $0x528] sm:$0xff] }
 0x1be   : > { %4103 = vpow2.f32 %v1960_v33  ;;  %v5060_v58 = vpop.f32.mrf.mxu2 }
 0x1c0   : > { %v5062_v34 = vpop.f32.mrf.mxu3  ;;  %v5064_v37 = vpop.f32.mrf.mxu0 }
 0x1c1   : > { %v1869_v45 = vpop.xlane.xlu0 %1868 }
 0x1c2   : > { %v1937_v59 = vsub.f32 %v4868_v9, %v1869_v45  ;;  %v5071_v2 = vpop.f32.mrf.mxu1 }
 0x1c3   : > { %1776 = vmatmul.f32.gmra.mxu2 %v421_v38  ;;  %1694 = vmatmul.f32.gmra.mxu0 %v419_v39 }
 0x1c4   : > { %v5073_v47 = vpop.eup %4103  ;;  %v1962_v49 = vmul.f32 1.442695, %v1937_v59  ;;  %v451_v59 = vld [vmem:[%s4535_s27 + $0x560] sm:$0xff] }
 0x1c5   : > { %1817 = vmatmul.f32.gmra.mxu3 %v422_v1  ;;  %1735 = vmatmul.f32.gmra.mxu1 %v420_v6  ;;  %v2008_v12 = vsel %vm1863_vm0, %v5073_v47, 0.0 }
 0x1c6   : > { %4105 = vpow2.f32 %v1962_v49  ;;  %v5077_v41 = vpop.f32.mrf.mxu2  ;;  %2009 = vadd.xlane.f32.xlu1 %v2008_v12  ;;  %v454_v12 = vld [vmem:[%s4535_s27 + $0x578] sm:$0xff] }
 0x1c8   : > { %v5079_v10 = vpop.f32.mrf.mxu0  ;;  %v5081_v9 = vpop.f32.mrf.mxu3 }
 0x1c9   : > { %v1872_v52 = vpop.xlane.xlu1 %1871 }
 0x1ca   : > { %v1938_v5 = vsub.f32 %v4881_v24, %v1872_v52  ;;  %v5090_v15 = vpop.f32.mrf.mxu1 }
 0x1cb   : > { %1779 = vmatmul.f32.gmra.mxu2 %v429_v44  ;;  %1697 = vmatmul.f32.gmra.mxu0 %v427_v48  ;;  %v452_v44 = vld [vmem:[%s4535_s27 + $0x568] sm:$0xff] }
 0x1cc   : > { %v5088_v7 = vpop.eup %4105  ;;  %v1964_v8 = vmul.f32 1.442695, %v1938_v5 }
 0x1cd   : > { %1820 = vmatmul.f32.gmra.mxu3 %v430_v3  ;;  %1738 = vmatmul.f32.gmra.mxu1 %v428_v4  ;;  %v2011_v13 = vsel %vm1863_vm0, %v5088_v7, 0.0  ;;  %v1365_v3 = vadd.f32 %v5049_v27, %v4971_v36  ;;  %v461_v36 = vld [vmem:[%s4535_s27 + $0x5b0] sm:$0xff]  ;;  %v459_v27 = vld [vmem:[%s4535_s27 + $0x5a0] sm:$0xff] }
 0x1ce   : > { %4107 = vpow2.f32 %v1964_v8  ;;  %v5094_v16 = vpop.f32.mrf.mxu2  ;;  %2012 = vadd.xlane.f32.xlu0 %v2011_v13 }
 0x1d0   : > { %v1373_v53 = vpop.f32.mrf.mxu0  ;;  %v5100_v42 = vpop.f32.mrf.mxu3 }
 0x1d1   : > { %v1875_v24 = vpop.xlane.xlu1 %1874 }
 0x1d2   : > { %v1939_v20 = vsub.f32 %v4901_v56, %v1875_v24  ;;  %v5107_v23 = vpop.f32.mrf.mxu1 }
 0x1d3   : > { %1782 = vmatmul.f32.gmra.mxu2 %v437_v32  ;;  %1700 = vmatmul.f32.gmra.mxu0 %v435_v26  ;;  %v1260_v26 = vadd.f32 %v5029_v61, %v5022_v51 }
 0x1d4   : > { %v5103_v21 = vpop.eup %4107  ;;  %v1966_v57 = vmul.f32 1.442695, %v1939_v20  ;;  %v460_v20 = vld [vmem:[%s4535_s27 + $0x5a8] sm:$0xff] }
 0x1d5   : > { %1823 = vmatmul.f32.gmra.mxu3 %v438_v17  ;;  %1741 = vmatmul.f32.gmra.mxu1 %v436_v19  ;;  %v2014_v43 = vsel %vm1863_vm0, %v5103_v21, 0.0  ;;  %v462_v19 = vld [vmem:[%s4535_s27 + $0x5b8] sm:$0xff] }
 0x1d6   : > { %4109 = vpow2.f32 %v1966_v57  ;;  %2015 = vadd.xlane.f32.xlu1 %v2014_v43  ;;  %v5109_v63 = vpop.f32.mrf.mxu2  ;;  %v1368_v57 = vadd.f32 %v5064_v37, %v4977_v0 }
 0x1d8   : > { %v5118_v38 = vpop.f32.mrf.mxu0  ;;  %v5120_v39 = vpop.f32.mrf.mxu3 }
 0x1d9   : > { %v1878_v56 = vpop.xlane.xlu2 %1877 }
 0x1da   : > { %v1940_v29 = vsub.f32 %v4921_v22, %v1878_v56  ;;  %v5124_v6 = vpop.f32.mrf.mxu1  ;;  %v453_v22 = vld [vmem:[%s4535_s27 + $0x570] sm:$0xff] }
 0x1db   : > { %1785 = vmatmul.f32.gmra.mxu2 %v445_v25  ;;  %1703 = vmatmul.f32.gmra.mxu0 %v443_v30  ;;  %v1374_v30 = vadd.f32 %v1373_v53, %v4997_v35  ;;  %v1409_v35 = vadd.f32 %v5071_v2, %v1368_v57 }
 0x1dc   : > { %v5116_v33 = vpop.eup %4109  ;;  %v1968_v45 = vmul.f32 1.442695, %v1940_v29  ;;  %v467_v29 = vld [vmem:[%s4535_s27 + $0x5e0] sm:$0xff] }
 0x1dd   : > { %1826 = vmatmul.f32.gmra.mxu3 %v446_v40  ;;  %1744 = vmatmul.f32.gmra.mxu1 %v444_v28  ;;  %v2017_v1 = vsel %vm1863_vm0, %v5116_v33, 0.0  ;;  %v1415_v37 = vadd.f32 %v5107_v23, %v1374_v30  ;;  %v1450_v53 = vadd.f32 %v5077_v41, %v1409_v35  ;;  %v469_v28 = vld [vmem:[%s4535_s27 + $0x5f0] sm:$0xff]  ;;  %v1377_v23 = vadd.f32 %v5118_v38, %v5011_v31 }
 0x1de   : > { %4111 = vpow2.f32 %v1968_v45  ;;  %2018 = vadd.xlane.f32.xlu2 %v2017_v1  ;;  %v5130_v48 = vpop.f32.mrf.mxu2 }
 0x1e0   : > { %v5139_v13 = vpop.f32.mrf.mxu0  ;;  %v5141_v32 = vpop.f32.mrf.mxu3 }
 0x1e1   : > { %v1881_v49 = vpop.xlane.xlu2 %1880 }
 0x1e2   : > { %v1941_v52 = vsub.f32 %v4940_v62, %v1881_v49  ;;  %v1406_v62 = vadd.f32 %v5055_v50, %v1365_v3  ;;  %v5153_v43 = vpop.f32.mrf.mxu1 }
 0x1e3   : > { %1788 = vmatmul.f32.gmra.mxu2 %v453_v22  ;;  %1706 = vmatmul.f32.gmra.mxu0 %v451_v59  ;;  %v470_v22 = vld [vmem:[%s4535_s27 + $0x5f8] sm:$0xff]  ;;  %v468_v59 = vld [vmem:[%s4535_s27 + $0x5e8] sm:$0xff] }
 0x1e4   : > { %v5135_v4 = vpop.eup %4111  ;;  %v1970_v5 = vmul.f32 1.442695, %v1941_v52  ;;  %v1447_v24 = vadd.f32 %v5060_v58, %v1406_v62  ;;  %v1301_v58 = vadd.f32 %v5038_v14, %v1260_v26 }
 0x1e5   : > { %1829 = vmatmul.f32.gmra.mxu3 %v454_v12  ;;  %1747 = vmatmul.f32.gmra.mxu1 %v452_v44  ;;  %v2020_v8 = vsel %vm1863_vm0, %v5135_v4, 0.0  ;;  %v1491_v12 = vadd.f32 %v5081_v9, %v1450_v53 }
 0x1e6   : > { %4113 = vpow2.f32 %v1970_v5  ;;  %2021 = vadd.xlane.f32.xlu0 %v2020_v8  ;;  %v5159_v51 = vpop.f32.mrf.mxu2  ;;  %v1488_v0 = vadd.f32 %v5062_v34, %v1447_v24  ;;  %v1342_v14 = vadd.f32 %v5040_v18, %v1301_v58  ;;  %v1456_v34 = vadd.f32 %v5109_v63, %v1415_v37 }
 0x1e7   : > { %v1371_v18 = vadd.f32 %v5079_v10, %v4983_v55  ;;  %v1418_v55 = vadd.f32 %v5124_v6, %v1377_v23  ;;  %v5190_v9 = vmul.f32 0.03125, %v1491_v12  ;;  %v1380_v24 = vadd.f32 %v5139_v13, %v5027_v60  ;;  %v719_v12 = vld [vmem:[%s5255_s22 + $0x1c0] sm:$0xff] }
 0x1e8   : > { %v1382_v56 = vpop.f32.mrf.mxu0  ;;  %v1502_v40 = vpop.f32.mrf.mxu3  ;;  %v5171_v45 = vmul.f32 0.03125, %v1488_v0  ;;  %v1497_v52 = vadd.f32 %v5120_v39, %v1456_v34  ;;  %2472 = vmatpush.msra.mxu0 %v719_v12  ;;  %v666_v12 = vld [vmem:[%s5255_s22 + $0x18] sm:$0xff] }
 0x1e9   : > { %v1884_v17 = vpop.xlane.xlu0 %1883  ;;  %v1383_v49 = vadd.f32 %v1382_v56, %v1342_v14  ;;  %v1412_v3 = vadd.f32 %v5090_v15, %v1371_v18  ;;  %v1459_v39 = vadd.f32 %v5130_v48, %v1418_v55  ;;  %v1891_v6 = vsel %vm1863_vm0, %v5190_v9, -inf  ;;  %v713_v55 = vld [vmem:[%s5255_s22 + $0x190] sm:$0xff] }
 0x1ea   : > { %v1942_v25 = vsub.f32 %v4956_v11, %v1884_v17  ;;  %v1423_v44 = vpop.f32.mrf.mxu1  ;;  %v5193_v5 = vmul.f32 0.03125, %v1497_v52  ;;  %v1421_v60 = vadd.f32 %v5153_v43, %v1380_v24  ;;  %v722_v52 = vld [vmem:[%s5255_s22 + $0x1d8] sm:$0xff]  ;;  %v696_v24 = vld [vmem:[%s5255_s22 + $0x108] sm:$0xff] }
 0x1eb   : > { %1791 = vmatmul.f32.gmra.mxu2 %v461_v36  ;;  %1709 = vmatmul.f32.gmra.mxu0 %v459_v27  ;;  %v1424_v10 = vadd.f32 %v1423_v44, %v1383_v49  ;;  %v1453_v62 = vadd.f32 %v5094_v16, %v1412_v3  ;;  %v1500_v17 = vadd.f32 %v5141_v32, %v1459_v39  ;;  %v720_v44 = vld [vmem:[%s5255_s22 + $0x1c8] sm:$0xff]  ;;  %v703_v39 = vld [vmem:[%s5255_s22 + $0x140] sm:$0xff] }
 0x1ec   : > { %v5157_v50 = vpop.eup %4113  ;;  %v1972_v61 = vmul.f32 1.442695, %v1942_v25  ;;  %v1462_v25 = vadd.f32 %v5159_v51, %v1421_v60  ;;  %2513 = vmatpush.msra.mxu1 %v720_v44  ;;  %2595 = vmatpush.msra.mxu3 %v722_v52 }
 0x1ed   : > { %1832 = vmatmul.f32.gmra.mxu3 %v462_v19  ;;  %1750 = vmatmul.f32.gmra.mxu1 %v460_v20  ;;  %v2023_v11 = vsel %vm1863_vm0, %v5157_v50, 0.0  ;;  %v1897_v19 = vsel %vm1863_vm0, %v5193_v5, -inf  ;;  %v1494_v16 = vadd.f32 %v5100_v42, %v1453_v62  ;;  %v5210_v13 = vmul.f32 0.03125, %v1500_v17  ;;  %v705_v62 = vld [vmem:[%s5255_s22 + $0x150] sm:$0xff] }
 0x1ee   : > { %4115 = vpow2.f32 %v1972_v61  ;;  %2024 = vadd.xlane.f32.xlu1 %v2023_v11  ;;  %v1464_v38 = vpop.f32.mrf.mxu2  ;;  %v1503_v43 = vadd.f32 %v1502_v40, %v1462_v25  ;;  %v679_v25 = vld [vmem:[%s5255_s22 + $0x80] sm:$0xff] }
 0x1ef   : > { %v1465_v8 = vadd.f32 %v1464_v38, %v1424_v10  ;;  %v5214_v32 = vmul.f32 0.03125, %v1494_v16  ;;  %v1900_v0 = vsel %vm1863_vm0, %v5210_v13, -inf  ;;  %v712_v38 = vld [vmem:[%s5255_s22 + $0x188] sm:$0xff]  ;;  %v714_v10 = vld [vmem:[%s5255_s22 + $0x198] sm:$0xff]  ;;  %v689_v16 = vld [vmem:[%s5255_s22 + $0xd0] sm:$0xff] }
 0x1f0   : > { %v1385_v36 = vpop.f32.mrf.mxu0  ;;  %v1505_v27 = vpop.f32.mrf.mxu3  ;;  %v5228_v53 = vmul.f32 0.03125, %v1503_v43  ;;  %2514 = vmatpush.msra.mxu1 %v712_v38  ;;  %2596 = vmatpush.msra.mxu3 %v714_v10  ;;  %v671_v43 = vld [vmem:[%s5255_s22 + $0x40] sm:$0xff] }
 0x1f1   : > { %v1887_v1 = vpop.xlane.xlu2 %1886  ;;  %v1506_v15 = vadd.f32 %v1505_v27, %v1465_v8  ;;  %v1386_v58 = vadd.f32 %v1385_v36, %v5053_v46  ;;  %v1894_v35 = vsel %vm1863_vm0, %v5214_v32, -inf  ;;  %v704_v8 = vld [vmem:[%s5255_s22 + $0x148] sm:$0xff]  ;;  %v706_v36 = vld [vmem:[%s5255_s22 + $0x158] sm:$0xff]  ;;  %v695_v27 = vld [vmem:[%s5255_s22 + $0x100] sm:$0xff] }
 0x1f2   : > { %v1943_v2 = vsub.f32 %v4965_v54, %v1887_v1  ;;  %v1888_v54 = vsel %vm1863_vm0, %v5171_v45, -inf  ;;  %v1426_v20 = vpop.f32.mrf.mxu1  ;;  %v1903_v40 = vsel %vm1863_vm0, %v5228_v53, -inf  ;;  %2515 = vmatpush.msra.mxu1 %v704_v8  ;;  %2597 = vmatpush.msra.mxu3 %v706_v36 }
 0x1f3   : > { %1794 = vmatmul.f32.gmra.mxu2 %v469_v28  ;;  %1712 = vmatmul.f32.gmra.mxu0 %v467_v29  ;;  %v5212_v57 = vmul.f32 0.03125, %v1506_v15  ;;  %v1427_v37 = vadd.f32 %v1426_v20, %v1386_v58  ;;  %v698_v15 = vld [vmem:[%s5255_s22 + $0x118] sm:$0xff]  ;;  %v681_v58 = vld [vmem:[%s5255_s22 + $0x90] sm:$0xff] }
 0x1f4   : > { %v5179_v41 = vpop.eup %4115  ;;  %v1974_v63 = vmul.f32 1.442695, %v1943_v2  ;;  %2516 = vmatpush.msra.mxu1 %v696_v24  ;;  %2598 = vmatpush.msra.mxu3 %v698_v15  ;;  %v690_v20 = vld [vmem:[%s5255_s22 + $0xd8] sm:$0xff] }
 0x1f5   : > { %1835 = vmatmul.f32.gmra.mxu3 %v470_v22  ;;  %1753 = vmatmul.f32.gmra.mxu1 %v468_v59  ;;  %v2026_v31 = vsel %vm1863_vm0, %v5179_v41, 0.0  ;;  %v1906_v42 = vsel %vm1863_vm0, %v5212_v57, -inf }
 0x1f6   : > { %4117 = vpow2.f32 %v1974_v63  ;;  %1889 = vmax.xlane.f32.xlu1 %v1888_v54  ;;  %2027 = vadd.xlane.f32.xlu2 %v2026_v31  ;;  %v1467_v30 = vpop.f32.mrf.mxu2  ;;  %v721_v63 = vld [vmem:[%s5255_s22 + $0x1d0] sm:$0xff]  ;;  %v711_v31 = vld [vmem:[%s5255_s22 + $0x180] sm:$0xff] }
 0x1f7   : > { %v1468_v46 = vadd.f32 %v1467_v30, %v1427_v37  ;;  %2554 = vmatpush.msra.mxu2 %v721_v63  ;;  %2473 = vmatpush.msra.mxu0 %v711_v31  ;;  %v680_v30 = vld [vmem:[%s5255_s22 + $0x88] sm:$0xff]  ;;  %v674_v37 = vld [vmem:[%s5255_s22 + $0x58] sm:$0xff] }
 0x1f8   : > { %v5217_v61 = vpop.f32.mrf.mxu0  ;;  %v1508_v11 = vpop.f32.mrf.mxu3  ;;  %2599 = vmatpush.msra.mxu3 %v690_v20 }
 0x1f9   : > { %v1509_v29 = vadd.f32 %v1508_v11, %v1468_v46  ;;  %2555 = vmatpush.msra.mxu2 %v713_v55  ;;  %2474 = vmatpush.msra.mxu0 %v703_v39  ;;  %v672_v11 = vld [vmem:[%s5255_s22 + $0x48] sm:$0xff] }
 0x1fa   : > { %v5226_v51 = vpop.f32.mrf.mxu1 }
 0x1fb   : > { %v5240_v1 = vmul.f32 0.03125, %v1509_v29  ;;  %2556 = vmatpush.msra.mxu2 %v705_v62  ;;  %2475 = vmatpush.msra.mxu0 %v695_v27  ;;  %v663_v29 = vld [vmem:[%s5255_s22] sm:$0xff] }
 0x1fc   : > { %v5197_v26 = vpop.eup %4117 }
 0x1fd   : > { %v2029_v48 = vsel %vm1863_vm0, %v5197_v26, 0.0  ;;  %6729 = vst [vmem:[#allocation13_spill] sm:$0xff] %v5240_v1  ;;  %v1909_v59 = vsel %vm1863_vm0, %v5240_v1, -inf  ;;  %v684_v1 = vld [vmem:[%s5255_s22 + $0xa8] sm:$0xff] }
 0x1fe   : > { %1898 = vmax.xlane.f32.xlu1 %v1897_v19  ;;  %1892 = vmax.xlane.f32.xlu2 %v1891_v6  ;;  %v5230_v56 = vpop.f32.mrf.mxu2  ;;  %v697_v6 = vld [vmem:[%s5255_s22 + $0x110] sm:$0xff]  ;;  %v687_v19 = vld [vmem:[%s5255_s22 + $0xc0] sm:$0xff] }
 0x1ff   : > { %2030 = vadd.xlane.f32.xlu0 %v2029_v48  ;;  %2557 = vmatpush.msra.mxu2 %v697_v6  ;;  %v688_v48 = vld [vmem:[%s5255_s22 + $0xc8] sm:$0xff] }
 0x200   : > { %v5232_v28 = vpop.f32.mrf.mxu0  ;;  %v5236_v14 = vpop.f32.mrf.mxu3  ;;  %2476 = vmatpush.msra.mxu0 %v687_v19  ;;  %2517 = vmatpush.msra.mxu1 %v688_v48 }
 0x201   : > { %2558 = vmatpush.msra.mxu2 %v689_v16 }
 0x202   : > { %v5238_v34 = vpop.f32.mrf.mxu1  ;;  %2477 = vmatpush.msra.mxu0 %v679_v25  ;;  %2518 = vmatpush.msra.mxu1 %v680_v30 }
 0x203   : > { %2559 = vmatpush.msra.mxu2 %v681_v58 }
 0x204   : > { %2478 = vmatpush.msra.mxu0 %v671_v43  ;;  %2519 = vmatpush.msra.mxu1 %v672_v11 }
 0x206   : > { %1907 = vmax.xlane.f32.xlu1 %v1906_v42  ;;  %1901 = vmax.xlane.f32.xlu2 %v1900_v0  ;;  %v5242_v22 = vpop.f32.mrf.mxu2  ;;  %v682_v42 = vld [vmem:[%s5255_s22 + $0x98] sm:$0xff] }
 0x207   : > { %1895 = vmax.xlane.f32.xlu0 %v1894_v35  ;;  %2600 = vmatpush.msra.mxu3 %v682_v42  ;;  %v673_v35 = vld [vmem:[%s5255_s22 + $0x50] sm:$0xff] }
 0x208   : > { %v5246_v2 = vpop.f32.mrf.mxu0  ;;  %v5248_v23 = vpop.f32.mrf.mxu3  ;;  %2560 = vmatpush.msra.mxu2 %v673_v35  ;;  %2479 = vmatpush.msra.mxu0 %v663_v29 }
 0x209   : > { %2601 = vmatpush.msra.mxu3 %v674_v37 }
 0x20a   : > { %v5250_v49 = vpop.f32.mrf.mxu1 }
 0x20b   : > { %2602 = vmatpush.msra.mxu3 %v666_v12 }
 0x20e   : > { %v5252_v18 = vpop.f32.mrf.mxu2 }
 0x20f   : > { %1904 = vmax.xlane.f32.xlu0 %v1903_v40  ;;  %v664_v40 = vld [vmem:[%s5255_s22 + $0x8] sm:$0xff] }
 0x210   : > { %v5261_v54 = vpop.f32.mrf.mxu0  ;;  %v5267_v3 = vpop.f32.mrf.mxu3  ;;  %2520 = vmatpush.msra.mxu1 %v664_v40 }
 0x212   : > { %v5276_v17 = vpop.f32.mrf.mxu1 }
 0x216   : > { %v5283_v60 = vpop.f32.mrf.mxu2 }
 0x217   : > { %1910 = vmax.xlane.f32.xlu0 %v1909_v59  ;;  %v665_v59 = vld [vmem:[%s5255_s22 + $0x10] sm:$0xff] }
 0x218   : > { %v5289_v0 = vpop.f32.mrf.mxu0  ;;  %v5295_v46 = vpop.f32.mrf.mxu3  ;;  %2561 = vmatpush.msra.mxu2 %v665_v59 }
 0x21a   : > { %v5301_v44 = vpop.f32.mrf.mxu1 }
 0x21e   : > { %v5303_v63 = vpop.f32.mrf.mxu2 }
 0x220   : > { %v5305_v52 = vpop.f32.mrf.mxu0  ;;  %v5307_v31 = vpop.f32.mrf.mxu3 }
 0x222   : > { %v5309_v55 = vpop.f32.mrf.mxu1 }
 0x226   : > { %v5311_v10 = vpop.f32.mrf.mxu2 }
 0x227   : > { %6730 = vst [vmem:[#allocation14_spill] sm:$0xff] %v5311_v10 }
 0x228   : > { %v5313_v39 = vpop.f32.mrf.mxu0  ;;  %v5315_v62 = vpop.f32.mrf.mxu3 }
 0x229   : > { %6731 = vst [vmem:[#allocation15_spill] sm:$0xff] %v5315_v62  ;;  %v692_v62 = vld [vmem:[%s5255_s22 + $0xe8] sm:$0xff] }
 0x22a   : > { %v5317_v6 = vpop.f32.mrf.mxu1 }
 0x22e   : > { %v5319_v16 = vpop.f32.mrf.mxu2 }
 0x230   : > { %v5321_v58 = vpop.f32.mrf.mxu0  ;;  %v5323_v37 = vpop.f32.mrf.mxu3 }
 0x231   : > { %6732 = vst [vmem:[#allocation16_spill] sm:$0xff] %v5321_v58 }
 0x232   : > { %6733 = vst [vmem:[#allocation17_spill] sm:$0xff] %v5323_v37 }
 0x239   : > { %v2010_v38 = vpop.xlane.xlu1 %2009 }
 0x23a   : > { %4119 = vrcp.f32 %v2010_v38  ;;  %v2091_v15 = vand.u32 2147483648, %v2010_v38  ;;  %v2089_v48 = vand.u32 2147483647, %v2010_v38  ;;  %vm2085_vm2 = vweird.f32 %v2010_v38 }
 0x23c   : > { %v2092_v30 = vor.u32 1.1754944e-38, %v2091_v15  ;;  %vm2090_vm4 = vcmp.eq.f32.partialorder %v2089_v48, 8.507059e+37  ;;  %v5338_v15 = vpop.f32.mrf.mxu2 }
 0x23d   : > { %6736 = vst [vmem:[#allocation20_spill] sm:$0xff] %v5338_v15  ;;  %v726_v15 = vld [vmem:[%s5255_s22 + $0x1f8] sm:$0xff] }
 0x23e   : > { %2759 = vmatpush.msrb.mxu3 %v726_v15  ;;  %v707_v15 = vld [vmem:[%s5255_s22 + $0x160] sm:$0xff] }
 0x240   : > { %v4120_v8 = vpop.eup %4119 }
 0x241   : > { %v2081_v36 = vmul.f32 %v4120_v8, %v2010_v38  ;;  %v2013_v27 = vpop.xlane.xlu0 %2012  ;;  %vm2086_vm1 = vweird.f32 %v4120_v8 }
 0x242   : > { %4121 = vrcp.f32 %v2013_v27  ;;  %vm2087_vm3 = vmor %vm2085_vm2, %vm2086_vm1  ;;  %v2105_v59 = vand.u32 2147483648, %v2013_v27  ;;  %v2103_v38 = vand.u32 2147483647, %v2013_v27  ;;  %vm2099_vm6 = vweird.f32 %v2013_v27 }
 0x243   : > { %v2082_v24 = vsub.f32 1.0, %v2081_v36  ;;  %v5328_v36 = vpop.f32.mrf.mxu1 }
 0x244   : > { %6735 = vst [vmem:[#allocation19_spill] sm:$0xff] %v5328_v36  ;;  %vm2104_vm8 = vcmp.eq.f32.partialorder %v2103_v38, 8.507059e+37 }
 0x245   : > { %v2083_v19 = vmul.f32 %v4120_v8, %v2082_v24  ;;  %v2106_v24 = vor.u32 1.1754944e-38, %v2105_v59 }
 0x247   : > { %v2084_v20 = vadd.f32 %v4120_v8, %v2083_v19 }
 0x248   : > { %v4122_v25 = vpop.eup %4121 }
 0x249   : > { %v2088_v42 = vsel %vm2087_vm3, %v4120_v8, %v2084_v20  ;;  %v2095_v43 = vmul.f32 %v4122_v25, %v2013_v27  ;;  %v2016_v11 = vpop.xlane.xlu1 %2015  ;;  %vm2100_vm5 = vweird.f32 %v4122_v25 }
 0x24a   : > { %v2093_v35 = vsel %vm2090_vm4, %v2092_v30, %v2088_v42  ;;  %4123 = vrcp.f32 %v2016_v11  ;;  %vm2101_vm7 = vmor %vm2099_vm6, %vm2100_vm5  ;;  %v5340_v42 = vpop.f32.mrf.mxu0  ;;  %v2117_v59 = vand.u32 2147483647, %v2016_v11  ;;  %vm2113_vm10 = vweird.f32 %v2016_v11 }
 0x24b   : > { %v5326_v29 = vmul.f32 %v5073_v47, %v2093_v35  ;;  %v2096_v40 = vsub.f32 1.0, %v2095_v43 }
 0x24c   : > { %vm2118_vm12 = vcmp.eq.f32.partialorder %v2117_v59, 8.507059e+37 }
 0x24d   : > { %6734 = vst [vmem:[#allocation18_spill] sm:$0xff] %v5326_v29  ;;  %v2097_v12 = vmul.f32 %v4122_v25, %v2096_v40  ;;  %3831 = vmatmul.msk.f32.vlgmr.msra.gmra.mxu0 %vm1863_vm0, %v5326_v29  ;;  %3839 = vmatmul.msk.f32.vlgmr.msra.gmra.mxu1 %vm1863_vm0, %v5326_v29  ;;  %v2119_v40 = vand.u32 2147483648, %v2016_v11 }
 0x24e   : > { %3847 = vmatmul.msk.f32.vlgmr.msra.gmra.mxu2 %vm1863_vm0, %v5326_v29  ;;  %3855 = vmatmul.msk.f32.vlgmr.msra.gmra.mxu3 %vm1863_vm0, %v5326_v29 }
 0x24f   : > { %v2098_v47 = vadd.f32 %v4122_v25, %v2097_v12  ;;  %v5345_v12 = vpop.f32.mrf.mxu3 }
 0x250   : > { %v4124_v8 = vpop.eup %4123  ;;  %6738 = vst [vmem:[#allocation22_spill] sm:$0xff] %v5345_v12 }
 0x251   : > { %v2102_v19 = vsel %vm2101_vm7, %v4122_v25, %v2098_v47  ;;  %v2109_v48 = vmul.f32 %v4124_v8, %v2016_v11  ;;  %v2019_v20 = vpop.xlane.xlu2 %2018  ;;  %vm2114_vm9 = vweird.f32 %v4124_v8  ;;  %v5355_v25 = vpop.f32.mrf.mxu1  ;;  %v2120_v47 = vor.u32 1.1754944e-38, %v2119_v40 }
 0x252   : > { %v2107_v30 = vsel %vm2104_vm8, %v2106_v24, %v2102_v19  ;;  %4125 = vrcp.f32 %v2019_v20  ;;  %vm2115_vm11 = vmor %vm2113_vm10, %vm2114_vm9  ;;  %v2133_v12 = vand.u32 2147483648, %v2019_v20  ;;  %v2131_v40 = vand.u32 2147483647, %v2019_v20 }
 0x253   : > { %v5343_v43 = vmul.f32 %v5088_v7, %v2107_v30  ;;  %v2110_v35 = vsub.f32 1.0, %v2109_v48  ;;  %vm2127_vm14 = vweird.f32 %v2019_v20 }
 0x254   : > { %vm2132_vm1 = vcmp.eq.f32.partialorder %v2131_v40, 8.507059e+37 }
 0x255   : > { %6737 = vst [vmem:[#allocation21_spill] sm:$0xff] %v5343_v43  ;;  %v2111_v27 = vmul.f32 %v4124_v8, %v2110_v35  ;;  %3832 = vmatmul.msk.f32.gmra.mxu0 %vm1863_vm0, %v5343_v43  ;;  %3840 = vmatmul.msk.f32.gmra.mxu1 %vm1863_vm0, %v5343_v43  ;;  %v5359_v35 = vpop.f32.mrf.mxu2 }
 0x256   : > { %3848 = vmatmul.msk.f32.gmra.mxu2 %vm1863_vm0, %v5343_v43  ;;  %3856 = vmatmul.msk.f32.gmra.mxu3 %vm1863_vm0, %v5343_v43  ;;  %v5365_v43 = vpop.f32.mrf.mxu0 }
 0x257   : > { %v2112_v7 = vadd.f32 %v4124_v8, %v2111_v27  ;;  %v5371_v59 = vpop.f32.mrf.mxu3 }
 0x258   : > { %v4126_v38 = vpop.eup %4125  ;;  %6740 = vst [vmem:[#allocation24_spill] sm:$0xff] %v5371_v59 }
 0x259   : > { %v2116_v24 = vsel %vm2115_vm11, %v4124_v8, %v2112_v7  ;;  %v2123_v19 = vmul.f32 %v4126_v38, %v2019_v20  ;;  %v5357_v48 = vpop.xlane.xlu0 %2021  ;;  %vm2128_vm13 = vweird.f32 %v4126_v38  ;;  %v723_v7 = vld [vmem:[%s5255_s22 + $0x1e0] sm:$0xff] }
 0x25a   : > { %v2121_v30 = vsel %vm2118_vm12, %v2120_v47, %v2116_v24  ;;  %4127 = vrcp.f32 %v5357_v48  ;;  %v724_v47 = vld [vmem:[%s5255_s22 + $0x1e8] sm:$0xff]  ;;  %v725_v24 = vld [vmem:[%s5255_s22 + $0x1f0] sm:$0xff]  ;;  %vm5382_vm15 = vmor %vm2127_vm14, %vm2128_vm13  ;;  %2636 = vmatpush.msrb.mxu0 %v723_v7  ;;  %vm2141_vm3 = vweird.f32 %v5357_v48 }
 0x25b   : > { %v5363_v27 = vmul.f32 %v5103_v21, %v2121_v30  ;;  %v2124_v11 = vsub.f32 1.0, %v2123_v19  ;;  %2677 = vmatpush.msrb.mxu1 %v724_v47  ;;  %2718 = vmatpush.msrb.mxu2 %v725_v24  ;;  %v716_v7 = vld [vmem:[%s5255_s22 + $0x1a8] sm:$0xff]  ;;  %v717_v47 = vld [vmem:[%s5255_s22 + $0x1b0] sm:$0xff]  ;;  %v2147_v30 = vand.u32 2147483648, %v5357_v48 }
 0x25c   : > { %v708_v24 = vld [vmem:[%s5255_s22 + $0x168] sm:$0xff] }
 0x25d   : > { %6739 = vst [vmem:[#allocation23_spill] sm:$0xff] %v5363_v27  ;;  %v2125_v8 = vmul.f32 %v4126_v38, %v2124_v11  ;;  %3833 = vmatmul.msk.f32.gmra.mxu0 %vm1863_vm0, %v5363_v27  ;;  %3841 = vmatmul.msk.f32.gmra.mxu1 %vm1863_vm0, %v5363_v27  ;;  %v2134_v11 = vor.u32 1.1754944e-38, %v2133_v12  ;;  %v715_v12 = vld [vmem:[%s5255_s22 + $0x1a0] sm:$0xff] }
 0x25e   : > { %3849 = vmatmul.msk.f32.gmra.mxu2 %vm1863_vm0, %v5363_v27  ;;  %3857 = vmatmul.msk.f32.gmra.mxu3 %vm1863_vm0, %v5363_v27  ;;  %v5391_v27 = vpop.f32.mrf.mxu1 }
 0x25f   : > { %v2126_v21 = vadd.f32 %v4126_v38, %v2125_v8  ;;  %2637 = vmatpush.msrb.mxu0 %v715_v12  ;;  %2678 = vmatpush.msrb.mxu1 %v716_v7  ;;  %v710_v12 = vld [vmem:[%s5255_s22 + $0x178] sm:$0xff]  ;;  %v700_v7 = vld [vmem:[%s5255_s22 + $0x128] sm:$0xff]  ;;  %v5439_v37 = vpop.f32.mrf.mxu3 }
 0x260   : > { %v5380_v19 = vpop.eup %4127  ;;  %2719 = vmatpush.msrb.mxu2 %v717_v47  ;;  %v5419_v47 = vpop.f32.mrf.mxu0 }
 0x261   : > { %v2130_v20 = vsel %vm5382_vm15, %v4126_v38, %v2126_v21  ;;  %v2137_v8 = vmul.f32 %v5380_v19, %v5357_v48  ;;  %v5393_v36 = vpop.xlane.xlu1 %2024  ;;  %v718_v38 = vld [vmem:[%s5255_s22 + $0x1b8] sm:$0xff]  ;;  %2638 = vmatpush.msrb.mxu0 %v707_v15  ;;  %2679 = vmatpush.msrb.mxu1 %v708_v24  ;;  %vm2142_vm2 = vweird.f32 %v5380_v19  ;;  %6744 = vst [vmem:[#allocation26_spill] sm:$0xff] %v5419_v47  ;;  %v691_v24 = vld [vmem:[%s5255_s22 + $0xe0] sm:$0xff] }
 0x262   : > { %v2135_v58 = vsel %vm2132_vm1, %v2134_v11, %v2130_v20  ;;  %4129 = vrcp.f32 %v5393_v36  ;;  %2760 = vmatpush.msrb.mxu3 %v718_v38  ;;  %v5406_v11 = vpop.f32.mrf.mxu2  ;;  %v709_v20 = vld [vmem:[%s5255_s22 + $0x170] sm:$0xff]  ;;  %vm5435_vm4 = vmor %vm2141_vm3, %vm2142_vm2  ;;  %vm2155_vm7 = vweird.f32 %v5393_v36 }
 0x263   : > { %v5401_v40 = vmul.f32 %v5116_v33, %v2135_v58  ;;  %v2138_v21 = vsub.f32 1.0, %v2137_v8  ;;  %v2145_v58 = vand.u32 2147483647, %v5357_v48  ;;  %v699_v8 = vld [vmem:[%s5255_s22 + $0x120] sm:$0xff]  ;;  %v701_v38 = vld [vmem:[%s5255_s22 + $0x130] sm:$0xff]  ;;  %2720 = vmatpush.msrb.mxu2 %v709_v20  ;;  %2680 = vmatpush.msrb.mxu1 %v700_v7  ;;  %v694_v20 = vld [vmem:[%s5255_s22 + $0xf8] sm:$0xff] }
 0x264   : > { %2761 = vmatpush.msrb.mxu3 %v710_v12  ;;  %2639 = vmatpush.msrb.mxu0 %v699_v8  ;;  %v693_v48 = vld [vmem:[%s5255_s22 + $0xf0] sm:$0xff] }
 0x265   : > { %6743 = vst [vmem:[#allocation25_spill] sm:$0xff] %v5401_v40  ;;  %v2139_v33 = vmul.f32 %v5380_v19, %v2138_v21  ;;  %3834 = vmatmul.msk.f32.gmra.mxu0 %vm1863_vm0, %v5401_v40  ;;  %3842 = vmatmul.msk.f32.gmra.mxu1 %vm1863_vm0, %v5401_v40  ;;  %v702_v21 = vld [vmem:[%s5255_s22 + $0x138] sm:$0xff]  ;;  %vm2146_vm5 = vcmp.eq.f32.partialorder %v2145_v58, 8.507059e+37 }
 0x266   : > { %3850 = vmatmul.msk.f32.gmra.mxu2 %vm1863_vm0, %v5401_v40  ;;  %3858 = vmatmul.msk.f32.gmra.mxu3 %vm1863_vm0, %v5401_v40  ;;  %v2148_v40 = vor.u32 1.1754944e-38, %v2147_v30  ;;  %v683_v30 = vld [vmem:[%s5255_s22 + $0xa0] sm:$0xff]  ;;  %v5457_v58 = vpop.f32.mrf.mxu1 }
 0x267   : > { %v2140_v15 = vadd.f32 %v5380_v19, %v2139_v33  ;;  %2721 = vmatpush.msrb.mxu2 %v701_v38  ;;  %2762 = vmatpush.msrb.mxu3 %v702_v21  ;;  %v2161_v38 = vand.u32 2147483648, %v5393_v36 }
 0x268   : > { %v5431_v29 = vpop.eup %4129  ;;  %2640 = vmatpush.msrb.mxu0 %v691_v24  ;;  %2681 = vmatpush.msrb.mxu1 %v692_v62 }
 0x269   : > { %v2144_v12 = vsel %vm5435_vm4, %v5380_v19, %v2140_v15  ;;  %v2151_v33 = vmul.f32 %v5431_v29, %v5393_v36  ;;  %v1890_v47 = vpop.xlane.xlu1 %1889  ;;  %v5448_v10 = vpop.xlane.xlu2 %2027  ;;  %2722 = vmatpush.msrb.mxu2 %v693_v48  ;;  %2763 = vmatpush.msrb.mxu3 %v694_v20  ;;  %vm2156_vm6 = vweird.f32 %v5431_v29  ;;  %v676_v15 = vld [vmem:[%s5255_s22 + $0x68] sm:$0xff]  ;;  %v678_v48 = vld [vmem:[%s5255_s22 + $0x78] sm:$0xff]  ;;  %v1573_v20 = vadd.f32 %v5238_v34, %v5232_v28 }
 0x26a   : > { %v2149_v8 = vsel %vm2146_vm5, %v2148_v40, %v2144_v12  ;;  %v1944_v7 = vsub.f32 %v5171_v45, %v1890_v47  ;;  %4131 = vrcp.f32 %v5448_v10  ;;  %2641 = vmatpush.msrb.mxu0 %v683_v30  ;;  %2682 = vmatpush.msrb.mxu1 %v684_v1  ;;  %v685_v45 = vld [vmem:[%s5255_s22 + $0xb0] sm:$0xff]  ;;  %v686_v40 = vld [vmem:[%s5255_s22 + $0xb8] sm:$0xff]  ;;  %v675_v47 = vld [vmem:[%s5255_s22 + $0x60] sm:$0xff]  ;;  %v5471_v24 = vpop.f32.mrf.mxu2  ;;  %v2162_v28 = vor.u32 1.1754944e-38, %v2161_v38  ;;  %v5494_v34 = vpop.f32.mrf.mxu0 }
 0x26b   : > { %v5455_v59 = vmul.f32 %v5135_v4, %v2149_v8  ;;  %v2152_v19 = vsub.f32 1.0, %v2151_v33  ;;  %v2159_v4 = vand.u32 2147483647, %v5393_v36  ;;  %v677_v1 = vld [vmem:[%s5255_s22 + $0x70] sm:$0xff]  ;;  %2723 = vmatpush.msrb.mxu2 %v685_v45  ;;  %2764 = vmatpush.msrb.mxu3 %v686_v40  ;;  %v667_v33 = vld [vmem:[%s5255_s22 + $0x20] sm:$0xff]  ;;  %v1570_v8 = vadd.f32 %v5226_v51, %v5217_v61  ;;  %vm5490_vm8 = vmor %vm2155_vm7, %vm2156_vm6 }
 0x26c   : > { %v1976_v21 = vmul.f32 1.442695, %v1944_v7  ;;  %2642 = vmatpush.msrb.mxu0 %v675_v47  ;;  %2683 = vmatpush.msrb.mxu1 %v676_v15  ;;  %v668_v36 = vld [vmem:[%s5255_s22 + $0x28] sm:$0xff]  ;;  %v670_v40 = vld [vmem:[%s5255_s22 + $0x38] sm:$0xff]  ;;  %v1614_v7 = vadd.f32 %v5242_v22, %v1573_v20  ;;  %vm2169_vm11 = vweird.f32 %v5448_v10 }
 0x26d   : > { %v2153_v62 = vmul.f32 %v5431_v29, %v2152_v19  ;;  %3835 = vmatmul.msk.f32.gmra.mxu0 %vm1863_vm0, %v5455_v59  ;;  %3843 = vmatmul.msk.f32.gmra.mxu1 %vm1863_vm0, %v5455_v59  ;;  %v669_v19 = vld [vmem:[%s5255_s22 + $0x30] sm:$0xff]  ;;  %vm2160_vm9 = vcmp.eq.f32.partialorder %v2159_v4, 8.507059e+37  ;;  %v5512_v4 = vpop.f32.mrf.mxu3 }
 0x26e   : > { %4133 = vpow2.f32 %v1976_v21  ;;  %3851 = vmatmul.msk.f32.gmra.mxu2 %vm1863_vm0, %v5455_v59  ;;  %3859 = vmatmul.msk.f32.gmra.mxu3 %vm1863_vm0, %v5455_v59  ;;  %v5522_v22 = vpop.f32.mrf.mxu1 }
 0x26f   : > { %v2154_v12 = vadd.f32 %v5431_v29, %v2153_v62  ;;  %2724 = vmatpush.msrb.mxu2 %v677_v1  ;;  %2765 = vmatpush.msrb.mxu3 %v678_v48  ;;  %v2173_v48 = vand.u32 2147483647, %v5448_v10 }
 0x270   : > { %v5484_v30 = vpop.eup %4131  ;;  %2643 = vmatpush.msrb.mxu0 %v667_v33  ;;  %2684 = vmatpush.msrb.mxu1 %v668_v36 }
 0x271   : > { %v2158_v21 = vsel %vm5490_vm8, %v5431_v29, %v2154_v12  ;;  %v2165_v61 = vmul.f32 %v5484_v30, %v5448_v10  ;;  %v1899_v51 = vpop.xlane.xlu1 %1898  ;;  %v1893_v45 = vpop.xlane.xlu2 %1892  ;;  %2725 = vmatpush.msrb.mxu2 %v669_v19  ;;  %2766 = vmatpush.msrb.mxu3 %v670_v40  ;;  %vm2170_vm10 = vweird.f32 %v5484_v30  ;;  %vm2174_vm13 = vcmp.eq.f32.partialorder %v2173_v48, 8.507059e+37 }
 0x272   : > { %v2163_v38 = vsel %vm2160_vm9, %v2162_v28, %v2158_v21  ;;  %v1947_v62 = vsub.f32 %v5193_v5, %v1899_v51  ;;  %v5505_v47 = vpop.xlane.xlu0 %2030  ;;  %v1945_v15 = vsub.f32 %v5190_v9, %v1893_v45  ;;  %v1611_v5 = vadd.f32 %v5230_v56, %v1570_v8  ;;  %vm2171_vm12 = vmor %vm2169_vm11, %vm2170_vm10 }
 0x273   : > { %v5510_v29 = vmul.f32 %v5157_v50, %v2163_v38  ;;  %v2166_v12 = vsub.f32 1.0, %v2165_v61  ;;  %4135 = vrcp.f32 %v5505_v47  ;;  %v2175_v9 = vand.u32 2147483648, %v5448_v10 }
 0x274   : > { %v5515_v1 = vpop.eup %4133  ;;  %v1982_v33 = vmul.f32 1.442695, %v1947_v62  ;;  %v1978_v20 = vmul.f32 1.442695, %v1945_v15  ;;  %v1582_v8 = vadd.f32 %v5301_v44, %v5289_v0  ;;  %v1655_v28 = vadd.f32 %v5248_v23, %v1614_v7  ;;  %v5541_v0 = vpop.f32.mrf.mxu2 }
 0x275   : > { %v2167_v50 = vmul.f32 %v5484_v30, %v2166_v12  ;;  %3836 = vmatmul.msk.f32.gmra.mxu0 %vm1863_vm0, %v5510_v29  ;;  %3844 = vmatmul.msk.f32.gmra.mxu1 %vm1863_vm0, %v5510_v29  ;;  %v2032_v56 = vsel %vm1863_vm0, %v5515_v1, 0.0  ;;  %v2176_v19 = vor.u32 1.1754944e-38, %v2175_v9  ;;  %v1652_v21 = vadd.f32 %v5236_v14, %v1611_v5  ;;  %v1704_v12 = vpop.f32.mrf.mxu0 }
 0x276   : > { %4137 = vpow2.f32 %v1982_v33  ;;  %3852 = vmatmul.msk.f32.gmra.mxu2 %vm1863_vm0, %v5510_v29  ;;  %3860 = vmatmul.msk.f32.gmra.mxu3 %vm1863_vm0, %v5510_v29  ;;  %v1623_v45 = vadd.f32 %v5303_v63, %v1582_v8  ;;  %v1696_v15 = vadd.f32 %v5365_v43, %v1655_v28  ;;  %v1579_v63 = vadd.f32 %v5276_v17, %v5261_v54  ;;  %v5561_v43 = vpop.f32.mrf.mxu3  ;;  %v1745_v8 = vpop.f32.mrf.mxu1 }
 0x277   : > { %v2168_v36 = vadd.f32 %v5484_v30, %v2167_v50  ;;  %4139 = vpow2.f32 %v1978_v20  ;;  %2033 = vadd.xlane.f32.xlu2 %v2032_v56  ;;  %v2187_v9 = vand.u32 2147483647, %v5505_v47  ;;  %v1576_v28 = vadd.f32 %v5250_v49, %v5246_v2 }
 0x278   : > { %v1664_v17 = vadd.f32 %v5307_v31, %v1623_v45  ;;  %v1737_v56 = vadd.f32 %v5391_v27, %v1696_v15  ;;  %vm2183_vm15 = vweird.f32 %v5505_v47  ;;  %v1693_v31 = vadd.f32 %v5340_v42, %v1652_v21 }
 0x279   : > { %v4136_v44 = vpop.eup %4135  ;;  %v2172_v61 = vsel %vm2171_vm12, %v5484_v30, %v2168_v36  ;;  %v1908_v51 = vpop.xlane.xlu1 %1907  ;;  %vm2188_vm2 = vcmp.eq.f32.partialorder %v2187_v9, 8.507059e+37 }
 0x27a   : > { %v1902_v23 = vpop.xlane.xlu2 %1901  ;;  %v2177_v40 = vsel %vm2174_vm13, %v2176_v19, %v2172_v61  ;;  %v2179_v10 = vmul.f32 %v4136_v44, %v5505_v47  ;;  %v1950_v38 = vsub.f32 %v5212_v57, %v1908_v51  ;;  %v1896_v62 = vpop.xlane.xlu0 %1895  ;;  %vm2184_vm14 = vweird.f32 %v4136_v44 }
 0x27b   : > { %v5550_v7 = vmul.f32 %v5179_v41, %v2177_v40  ;;  %v1946_v14 = vsub.f32 %v5214_v32, %v1896_v62  ;;  %v1948_v30 = vsub.f32 %v5210_v13, %v1902_v23  ;;  %v2189_v41 = vand.u32 2147483648, %v5505_v47  ;;  %vm2185_vm1 = vmor %vm2183_vm15, %vm2184_vm14 }
 0x27c   : > { %v5554_v5 = vpop.eup %4137  ;;  %v2180_v48 = vsub.f32 1.0, %v2179_v10  ;;  %v1988_v57 = vmul.f32 1.442695, %v1950_v38  ;;  %v1620_v61 = vadd.f32 %v5283_v60, %v1579_v63  ;;  %v1778_v23 = vadd.f32 %v5406_v11, %v1737_v56  ;;  %v1786_v10 = vpop.f32.mrf.mxu2  ;;  %v6753_v56 = vld [vmem:[#allocation24_spill] sm:$0xff] }
 0x27d   : > { %v5559_v33 = vpop.eup %4139  ;;  %v1980_v50 = vmul.f32 1.442695, %v1946_v14  ;;  %v1984_v20 = vmul.f32 1.442695, %v1948_v30  ;;  %3837 = vmatmul.msk.f32.gmra.mxu0 %vm1863_vm0, %v5550_v7  ;;  %3845 = vmatmul.msk.f32.gmra.mxu1 %vm1863_vm0, %v5550_v7  ;;  %v2041_v13 = vsel %vm1863_vm0, %v5554_v5, 0.0  ;;  %v2190_v19 = vor.u32 1.1754944e-38, %v2189_v41  ;;  %v1707_v42 = vpop.f32.mrf.mxu0 }
 0x27e   : > { %v2181_v32 = vmul.f32 %v4136_v44, %v2180_v48  ;;  %4141 = vpow2.f32 %v1988_v57  ;;  %3853 = vmatmul.msk.f32.gmra.mxu2 %vm1863_vm0, %v5550_v7  ;;  %3861 = vmatmul.msk.f32.gmra.mxu3 %vm1863_vm0, %v5550_v7  ;;  %v2035_v54 = vsel %vm1863_vm0, %v5559_v33, 0.0  ;;  %v1705_v45 = vadd.f32 %v1704_v12, %v1664_v17  ;;  %v1827_v14 = vpop.f32.mrf.mxu3  ;;  %v6749_v41 = vld [vmem:[#allocation13_spill] sm:$0xff] }
 0x27f   : > { %4143 = vpow2.f32 %v1980_v50  ;;  %2042 = vadd.xlane.f32.xlu0 %v2041_v13  ;;  %2036 = vadd.xlane.f32.xlu1 %v2035_v54  ;;  %v1617_v47 = vadd.f32 %v5252_v18, %v1576_v28  ;;  %v1661_v62 = vadd.f32 %v5295_v46, %v1620_v61  ;;  %v1734_v15 = vadd.f32 %v5355_v25, %v1693_v31  ;;  %v6751_v13 = vld [vmem:[#allocation26_spill] sm:$0xff]  ;;  %v6752_v17 = vld [vmem:[#allocation17_spill] sm:$0xff]  ;;  %v6755_v31 = vld [vmem:[#allocation15_spill] sm:$0xff] }
 0x280   : > { %v2182_v36 = vadd.f32 %v4136_v44, %v2181_v32  ;;  %4145 = vpow2.f32 %v1984_v20  ;;  %v1819_v18 = vadd.f32 %v5439_v37, %v1778_v23  ;;  %v1746_v12 = vadd.f32 %v1745_v8, %v1705_v45  ;;  %v1748_v37 = vpop.f32.mrf.mxu1  ;;  %v6754_v8 = vld [vmem:[#allocation18_spill] sm:$0xff]  ;;  %v6757_v23 = vld [vmem:[#allocation19_spill] sm:$0xff] }
 0x281   : > { %v1775_v30 = vadd.f32 %v5359_v35, %v1734_v15  ;;  %v1702_v9 = vadd.f32 %v5494_v34, %v1661_v62  ;;  %v6758_v62 = vld [vmem:[#allocation20_spill] sm:$0xff] }
 0x282   : > { %v2186_v51 = vsel %vm2185_vm1, %v4136_v44, %v2182_v36  ;;  %v1905_v27 = vpop.xlane.xlu0 %1904  ;;  %v5620_v48 = vmul.f32 0.03125, %v1819_v18  ;;  %v1787_v57 = vadd.f32 %v1786_v10, %v1746_v12  ;;  %v6759_v12 = vld [vmem:[#allocation21_spill] sm:$0xff] }
 0x283   : > { %v2191_v40 = vsel %vm2188_vm2, %v2190_v19, %v2186_v51  ;;  %v1949_v2 = vsub.f32 %v5228_v53, %v1905_v27  ;;  %v1588_v53 = vadd.f32 %v5317_v6, %v5313_v39  ;;  %v1658_v39 = vadd.f32 %v5267_v3, %v1617_v47  ;;  %v6750_v3 = vld [vmem:[#allocation14_spill] sm:$0xff]  ;;  %v6756_v27 = vld [vmem:[#allocation16_spill] sm:$0xff] }
 0x284   : > { %v5586_v49 = vpop.eup %4141  ;;  %v5590_v38 = vmul.f32 %v5197_v26, %v2191_v40  ;;  %v1585_v6 = vadd.f32 %v5309_v55, %v5305_v52  ;;  %v1789_v32 = vpop.f32.mrf.mxu2  ;;  %v1816_v35 = vadd.f32 %v6753_v56, %v1775_v30  ;;  %v1743_v28 = vadd.f32 %v5522_v22, %v1702_v9 }
 0x285   : > { %v5592_v60 = vpop.eup %4143  ;;  %v1986_v44 = vmul.f32 1.442695, %v1949_v2  ;;  %v2050_v21 = vsel %vm1863_vm0, %v5586_v49, 0.0  ;;  %v1629_v25 = vadd.f32 %v5319_v16, %v1588_v53  ;;  %v1699_v52 = vadd.f32 %v6751_v13, %v1658_v39  ;;  %v1710_v19 = vpop.f32.mrf.mxu0  ;;  %v6760_v39 = vld [vmem:[#allocation22_spill] sm:$0xff]  ;;  %v6761_v13 = vld [vmem:[#allocation23_spill] sm:$0xff] }
 0x286   : > { %v5596_v11 = vpop.eup %4145  ;;  %3838 = vmatmul.msk.f32.gmra.mxu0 %vm1863_vm0, %v5590_v38  ;;  %3846 = vmatmul.msk.f32.gmra.mxu1 %vm1863_vm0, %v5590_v38  ;;  %v2038_v26 = vsel %vm1863_vm0, %v5592_v60, 0.0  ;;  %v1626_v20 = vadd.f32 %v6750_v3, %v1585_v6  ;;  %v1828_v36 = vadd.f32 %v1827_v14, %v1787_v57  ;;  %v1915_v61 = vsel %vm1863_vm0, %v5620_v48, -inf  ;;  %v1830_v22 = vpop.f32.mrf.mxu3 }
 0x287   : > { %4147 = vpow2.f32 %v1986_v44  ;;  %3854 = vmatmul.msk.f32.gmra.mxu2 %vm1863_vm0, %v5590_v38  ;;  %3862 = vmatmul.msk.f32.gmra.mxu3 %vm1863_vm0, %v5590_v38  ;;  %v2044_v46 = vsel %vm1863_vm0, %v5596_v11, 0.0  ;;  %v1670_v16 = vadd.f32 %v6752_v17, %v1629_v25  ;;  %v1591_v45 = vadd.f32 %v6757_v23, %v6756_v27  ;;  %v783_v27 = vld [vmem:[%s5255_s22 + $0x3c0] sm:$0xff]  ;;  %v784_v23 = vld [vmem:[%s5255_s22 + $0x3c8] sm:$0xff] }
 0x288   : > { %2051 = vadd.xlane.f32.xlu0 %v2050_v21  ;;  %2039 = vadd.xlane.f32.xlu2 %v2038_v26  ;;  %v1667_v51 = vadd.f32 %v6755_v31, %v1626_v20  ;;  %v1740_v40 = vadd.f32 %v5457_v58, %v1699_v52  ;;  %v5647_v10 = vmul.f32 0.03125, %v1816_v35  ;;  %v1784_v2 = vadd.f32 %v5541_v0, %v1743_v28  ;;  %v1751_v21 = vpop.f32.mrf.mxu1 }
 0x289   : > { %2045 = vadd.xlane.f32.xlu1 %v2044_v46  ;;  %v5650_v47 = vmul.f32 0.03125, %v1828_v36  ;;  %v1711_v44 = vadd.f32 %v1710_v19, %v1670_v16  ;;  %v1632_v53 = vadd.f32 %v6758_v62, %v1591_v45  ;;  %v778_v45 = vld [vmem:[%s5255_s22 + $0x398] sm:$0xff]  ;;  %2824 = vmatpush.msra.mxu0 %v783_v27  ;;  %v776_v62 = vld [vmem:[%s5255_s22 + $0x388] sm:$0xff] }
 0x28a   : > { %v1911_v63 = vpop.xlane.xlu0 %1910  ;;  %v1781_v15 = vadd.f32 %v5471_v24, %v1740_v40  ;;  %v1708_v26 = vadd.f32 %v1707_v42, %v1667_v51  ;;  %v1825_v0 = vadd.f32 %v5561_v43, %v1784_v2  ;;  %v1912_v42 = vsel %vm1863_vm0, %v5647_v10, -inf  ;;  %v786_v51 = vld [vmem:[%s5255_s22 + $0x3d8] sm:$0xff]  ;;  %2865 = vmatpush.msra.mxu1 %v784_v23 }
 0x28b   : > { %v1951_v50 = vsub.f32 %v6749_v41, %v1911_v63  ;;  %v1752_v14 = vadd.f32 %v1751_v21, %v1711_v44  ;;  %v1924_v24 = vsel %vm1863_vm0, %v5650_v47, -inf  ;;  %v1673_v6 = vadd.f32 %v6760_v39, %v1632_v53  ;;  %2947 = vmatpush.msra.mxu3 %v786_v51  ;;  %v775_v21 = vld [vmem:[%s5255_s22 + $0x380] sm:$0xff]  ;;  %v769_v53 = vld [vmem:[%s5255_s22 + $0x350] sm:$0xff] }
 0x28c   : > { %v1792_v46 = vpop.f32.mrf.mxu2  ;;  %v1822_v25 = vadd.f32 %v5512_v4, %v1781_v15  ;;  %v1749_v30 = vadd.f32 %v1748_v37, %v1708_v26  ;;  %v5673_v63 = vmul.f32 0.03125, %v1825_v0  ;;  %2825 = vmatpush.msra.mxu0 %v775_v21  ;;  %2866 = vmatpush.msra.mxu1 %v776_v62  ;;  %v770_v15 = vld [vmem:[%s5255_s22 + $0x358] sm:$0xff]  ;;  %v767_v26 = vld [vmem:[%s5255_s22 + $0x340] sm:$0xff]  ;;  %v760_v0 = vld [vmem:[%s5255_s22 + $0x308] sm:$0xff] }
 0x28d   : > { %v5626_v55 = vpop.eup %4147  ;;  %v1990_v54 = vmul.f32 1.442695, %v1951_v50  ;;  %v1713_v43 = vpop.f32.mrf.mxu0  ;;  %v1793_v9 = vadd.f32 %v1792_v46, %v1752_v14  ;;  %2948 = vmatpush.msra.mxu3 %v778_v45  ;;  %v761_v14 = vld [vmem:[%s5255_s22 + $0x310] sm:$0xff]  ;;  %v762_v46 = vld [vmem:[%s5255_s22 + $0x318] sm:$0xff] }
 0x28e   : > { %3863 = vmatmul.msk.f32.vlgmr.msrb.gmra.mxu0 %vm1863_vm0, %v6754_v8  ;;  %3871 = vmatmul.msk.f32.vlgmr.msrb.gmra.mxu1 %vm1863_vm0, %v6754_v8  ;;  %v2047_v34 = vsel %vm1863_vm0, %v5626_v55, 0.0  ;;  %v1833_v57 = vpop.f32.mrf.mxu3  ;;  %v5675_v41 = vmul.f32 0.03125, %v1822_v25  ;;  %v1790_v50 = vadd.f32 %v1789_v32, %v1749_v30  ;;  %v1714_v3 = vadd.f32 %v1713_v43, %v1673_v6  ;;  %v753_v39 = vld [vmem:[%s5255_s22 + $0x2d0] sm:$0xff]  ;;  %v754_v30 = vld [vmem:[%s5255_s22 + $0x2d8] sm:$0xff] }
 0x28f   : > { %4149 = vpow2.f32 %v1990_v54  ;;  %3879 = vmatmul.msk.f32.vlgmr.msrb.gmra.mxu2 %vm1863_vm0, %v6754_v8  ;;  %3887 = vmatmul.msk.f32.vlgmr.msrb.gmra.mxu3 %vm1863_vm0, %v6754_v8  ;;  %v1834_v4 = vadd.f32 %v1833_v57, %v1793_v9  ;;  %v1921_v37 = vsel %vm1863_vm0, %v5673_v63, -inf  ;;  %v743_v57 = vld [vmem:[%s5255_s22 + $0x280] sm:$0xff] }
 0x290   : > { %1916 = vmax.xlane.f32.xlu0 %v1915_v61  ;;  %2048 = vadd.xlane.f32.xlu2 %v2047_v34  ;;  %v1754_v20 = vpop.f32.mrf.mxu1  ;;  %v1831_v52 = vadd.f32 %v1830_v22, %v1790_v50  ;;  %v1918_v54 = vsel %vm1863_vm0, %v5675_v41, -inf  ;;  %v6762_v34 = vld [vmem:[#allocation25_spill] sm:$0xff]  ;;  %v744_v50 = vld [vmem:[%s5255_s22 + $0x288] sm:$0xff] }
 0x291   : > { %v1755_v32 = vadd.f32 %v1754_v20, %v1714_v3  ;;  %v5689_v16 = vmul.f32 0.03125, %v1834_v4  ;;  %2949 = vmatpush.msra.mxu3 %v770_v15  ;;  %2826 = vmatpush.msra.mxu0 %v767_v26  ;;  %v745_v3 = vld [vmem:[%s5255_s22 + $0x290] sm:$0xff]  ;;  %v746_v20 = vld [vmem:[%s5255_s22 + $0x298] sm:$0xff] }
 0x292   : > { %v5691_v56 = vmul.f32 0.03125, %v1831_v52 }
 0x293   : > { %v1930_v28 = vsel %vm1863_vm0, %v5689_v16, -inf  ;;  %2950 = vmatpush.msra.mxu3 %v762_v46 }
 0x294   : > { %v1795_v17 = vpop.f32.mrf.mxu2  ;;  %v1927_v19 = vsel %vm1863_vm0, %v5691_v56, -inf }
 0x295   : > { %v5654_v18 = vpop.eup %4149  ;;  %v1796_v35 = vadd.f32 %v1795_v17, %v1755_v32  ;;  %2951 = vmatpush.msra.mxu3 %v754_v30  ;;  %v735_v32 = vld [vmem:[%s5255_s22 + $0x240] sm:$0xff]  ;;  %v737_v17 = vld [vmem:[%s5255_s22 + $0x250] sm:$0xff] }
 0x296   : > { %3864 = vmatmul.msk.f32.gmra.mxu0 %vm1863_vm0, %v6759_v12  ;;  %3872 = vmatmul.msk.f32.gmra.mxu1 %vm1863_vm0, %v6759_v12  ;;  %v2053_v58 = vsel %vm1863_vm0, %v5654_v18, 0.0  ;;  %v1836_v8 = vpop.f32.mrf.mxu3 }
 0x297   : > { %3880 = vmatmul.msk.f32.gmra.mxu2 %vm1863_vm0, %v6759_v12  ;;  %3888 = vmatmul.msk.f32.gmra.mxu3 %vm1863_vm0, %v6759_v12  ;;  %v1837_v36 = vadd.f32 %v1836_v8, %v1796_v35  ;;  %v768_v12 = vld [vmem:[%s5255_s22 + $0x348] sm:$0xff]  ;;  %v738_v35 = vld [vmem:[%s5255_s22 + $0x258] sm:$0xff]  ;;  %v727_v8 = vld [vmem:[%s5255_s22 + $0x200] sm:$0xff] }
 0x298   : > { %1925 = vmax.xlane.f32.xlu0 %v1924_v24  ;;  %1913 = vmax.xlane.f32.xlu2 %v1912_v42  ;;  %v751_v24 = vld [vmem:[%s5255_s22 + $0x2c0] sm:$0xff]  ;;  %v752_v42 = vld [vmem:[%s5255_s22 + $0x2c8] sm:$0xff] }
 0x299   : > { %2054 = vadd.xlane.f32.xlu1 %v2053_v58  ;;  %v5705_v61 = vmul.f32 0.03125, %v1837_v36  ;;  %2867 = vmatpush.msra.mxu1 %v768_v12  ;;  %v759_v58 = vld [vmem:[%s5255_s22 + $0x300] sm:$0xff]  ;;  %v730_v36 = vld [vmem:[%s5255_s22 + $0x218] sm:$0xff] }
 0x29a   : > { %2827 = vmatpush.msra.mxu0 %v759_v58  ;;  %2952 = vmatpush.msra.mxu3 %v746_v20 }
 0x29b   : > { %v1933_v31 = vsel %vm1863_vm0, %v5705_v61, -inf  ;;  %2868 = vmatpush.msra.mxu1 %v760_v0 }
 0x29c   : > { %2828 = vmatpush.msra.mxu0 %v751_v24  ;;  %2953 = vmatpush.msra.mxu3 %v738_v35  ;;  %v789_v35 = vld [vmem:[%s5255_s22 + $0x3f0] sm:$0xff] }
 0x29d   : > { %2869 = vmatpush.msra.mxu1 %v752_v42 }
 0x29e   : > { %3865 = vmatmul.msk.f32.gmra.mxu0 %vm1863_vm0, %v6761_v13  ;;  %3873 = vmatmul.msk.f32.gmra.mxu1 %vm1863_vm0, %v6761_v13 }
 0x29f   : > { %3881 = vmatmul.msk.f32.gmra.mxu2 %vm1863_vm0, %v6761_v13  ;;  %3889 = vmatmul.msk.f32.gmra.mxu3 %vm1863_vm0, %v6761_v13 }
 0x2a0   : > { %1922 = vmax.xlane.f32.xlu2 %v1921_v37  ;;  %2829 = vmatpush.msra.mxu0 %v743_v57 }
 0x2a1   : > { %1919 = vmax.xlane.f32.xlu1 %v1918_v54  ;;  %2870 = vmatpush.msra.mxu1 %v744_v50  ;;  %v736_v54 = vld [vmem:[%s5255_s22 + $0x248] sm:$0xff] }
 0x2a2   : > { %2830 = vmatpush.msra.mxu0 %v735_v32  ;;  %2954 = vmatpush.msra.mxu3 %v730_v36 }
 0x2a3   : > { %2871 = vmatpush.msra.mxu1 %v736_v54 }
 0x2a4   : > { %2831 = vmatpush.msra.mxu0 %v727_v8  ;;  %v790_v8 = vld [vmem:[%s5255_s22 + $0x3f8] sm:$0xff] }
 0x2a5   : > { %3111 = vmatpush.msrb.mxu3 %v790_v8 }
 0x2a6   : > { %3866 = vmatmul.msk.f32.gmra.mxu0 %vm1863_vm0, %v6762_v34  ;;  %3874 = vmatmul.msk.f32.gmra.mxu1 %vm1863_vm0, %v6762_v34 }
 0x2a7   : > { %3882 = vmatmul.msk.f32.gmra.mxu2 %vm1863_vm0, %v6762_v34  ;;  %3890 = vmatmul.msk.f32.gmra.mxu3 %vm1863_vm0, %v6762_v34  ;;  %v728_v34 = vld [vmem:[%s5255_s22 + $0x208] sm:$0xff] }
 0x2a8   : > { %1931 = vmax.xlane.f32.xlu2 %v1930_v28  ;;  %v729_v28 = vld [vmem:[%s5255_s22 + $0x210] sm:$0xff]  ;;  %2872 = vmatpush.msra.mxu1 %v728_v34 }
 0x2a9   : > { %1928 = vmax.xlane.f32.xlu1 %v1927_v19 }
 0x2ae   : > { %3867 = vmatmul.msk.f32.gmra.mxu0 %vm1863_vm0, %v5455_v59  ;;  %3875 = vmatmul.msk.f32.gmra.mxu1 %vm1863_vm0, %v5455_v59 }
 0x2af   : > { %3883 = vmatmul.msk.f32.gmra.mxu2 %vm1863_vm0, %v5455_v59  ;;  %3891 = vmatmul.msk.f32.gmra.mxu3 %vm1863_vm0, %v5455_v59  ;;  %v785_v59 = vld [vmem:[%s5255_s22 + $0x3d0] sm:$0xff] }
 0x2b0   : > { %2906 = vmatpush.msra.mxu2 %v785_v59 }
 0x2b1   : > { %1934 = vmax.xlane.f32.xlu1 %v1933_v31 }
 0x2b6   : > { %3868 = vmatmul.msk.f32.gmra.mxu0 %vm1863_vm0, %v5510_v29  ;;  %3876 = vmatmul.msk.f32.gmra.mxu1 %vm1863_vm0, %v5510_v29 }
 0x2b7   : > { %3884 = vmatmul.msk.f32.gmra.mxu2 %vm1863_vm0, %v5510_v29  ;;  %3892 = vmatmul.msk.f32.gmra.mxu3 %vm1863_vm0, %v5510_v29  ;;  %v777_v29 = vld [vmem:[%s5255_s22 + $0x390] sm:$0xff] }
 0x2b8   : > { %2907 = vmatpush.msra.mxu2 %v777_v29 }
 0x2ba   : > { %2908 = vmatpush.msra.mxu2 %v769_v53 }
 0x2bc   : > { %2909 = vmatpush.msra.mxu2 %v761_v14 }
 0x2be   : > { %3869 = vmatmul.msk.f32.gmra.mxu0 %vm1863_vm0, %v5550_v7  ;;  %3877 = vmatmul.msk.f32.gmra.mxu1 %vm1863_vm0, %v5550_v7 }
 0x2bf   : > { %3885 = vmatmul.msk.f32.gmra.mxu2 %vm1863_vm0, %v5550_v7  ;;  %3893 = vmatmul.msk.f32.gmra.mxu3 %vm1863_vm0, %v5550_v7 }
 0x2c0   : > { %2910 = vmatpush.msra.mxu2 %v753_v39 }
 0x2c2   : > { %2911 = vmatpush.msra.mxu2 %v745_v3 }
 0x2c4   : > { %2912 = vmatpush.msra.mxu2 %v737_v17 }
 0x2c6   : > { %3870 = vmatmul.msk.f32.gmra.mxu0 %vm1863_vm0, %v5590_v38  ;;  %3878 = vmatmul.msk.f32.gmra.mxu1 %vm1863_vm0, %v5590_v38 }
 0x2c7   : > { %3886 = vmatmul.msk.f32.gmra.mxu2 %vm1863_vm0, %v5590_v38  ;;  %3894 = vmatmul.msk.f32.gmra.mxu3 %vm1863_vm0, %v5590_v38 }
 0x2c8   : > { %2913 = vmatpush.msra.mxu2 %v729_v28 }
 0x2ca   : > { %v2481_v7 = vpop.f32.mrf.mxu0  ;;  %v2522_v40 = vpop.f32.mrf.mxu1  ;;  %3070 = vmatpush.msrb.mxu2 %v789_v35 }
 0x2cb   : > { %3496 = vst [vmem:[%s5748_s17] sm:$0xff] %v2481_v7 }
 0x2cc   : > { %3497 = vst [vmem:[%s5748_s17 + $0x8] sm:$0xff] %v2522_v40 }
 0x2d1   : > { %v2563_v38 = vpop.f32.mrf.mxu2  ;;  %v2604_v22 = vpop.f32.mrf.mxu3 }
 0x2d2   : > { %3498 = vst [vmem:[%s5748_s17 + $0x10] sm:$0xff] %v2563_v38  ;;  %v2484_v2 = vpop.f32.mrf.mxu0  ;;  %v2525_v44 = vpop.f32.mrf.mxu1 }
 0x2d3   : > { %3499 = vst [vmem:[%s5748_s17 + $0x18] sm:$0xff] %v2604_v22 }
 0x2d4   : > { %3504 = vst [vmem:[%s5748_s17 + $0x40] sm:$0xff] %v2484_v2 }
 0x2d5   : > { %3505 = vst [vmem:[%s5748_s17 + $0x48] sm:$0xff] %v2525_v44 }
 0x2d9   : > { %v2566_v6 = vpop.f32.mrf.mxu2  ;;  %v2607_v25 = vpop.f32.mrf.mxu3 }
 0x2da   : > { %3506 = vst [vmem:[%s5748_s17 + $0x50] sm:$0xff] %v2566_v6  ;;  %v2487_v43 = vpop.f32.mrf.mxu0  ;;  %v2528_v9 = vpop.f32.mrf.mxu1 }
 0x2db   : > { %3507 = vst [vmem:[%s5748_s17 + $0x58] sm:$0xff] %v2607_v25 }
 0x2dc   : > { %3512 = vst [vmem:[%s5748_s17 + $0x80] sm:$0xff] %v2487_v43 }
 0x2dd   : > { %3513 = vst [vmem:[%s5748_s17 + $0x88] sm:$0xff] %v2528_v9 }
 0x2e1   : > { %v2569_v13 = vpop.f32.mrf.mxu2  ;;  %v2610_v4 = vpop.f32.mrf.mxu3 }
 0x2e2   : > { %3514 = vst [vmem:[%s5748_s17 + $0x90] sm:$0xff] %v2569_v13  ;;  %v2490_v37 = vpop.f32.mrf.mxu0  ;;  %v2531_v52 = vpop.f32.mrf.mxu1 }
 0x2e3   : > { %3515 = vst [vmem:[%s5748_s17 + $0x98] sm:$0xff] %v2610_v4 }
 0x2e4   : > { %3520 = vst [vmem:[%s5748_s17 + $0xc0] sm:$0xff] %v2490_v37 }
 0x2e5   : > { %3521 = vst [vmem:[%s5748_s17 + $0xc8] sm:$0xff] %v2531_v52 }
 0x2e9   : > { %v2572_v19 = vpop.f32.mrf.mxu2  ;;  %v2613_v31 = vpop.f32.mrf.mxu3 }
 0x2ea   : > { %3522 = vst [vmem:[%s5748_s17 + $0xd0] sm:$0xff] %v2572_v19  ;;  %v2034_v59 = vpop.xlane.xlu2 %2033  ;;  %v2493_v51 = vpop.f32.mrf.mxu0 }
 0x2eb   : > { %3523 = vst [vmem:[%s5748_s17 + $0xd8] sm:$0xff] %v2613_v31  ;;  %4151 = vrcp.f32 %v2034_v59  ;;  %v2534_v27 = vpop.f32.mrf.mxu1  ;;  %v2203_v21 = vand.u32 2147483648, %v2034_v59  ;;  %v2201_v53 = vand.u32 2147483647, %v2034_v59  ;;  %vm2197_vm4 = vweird.f32 %v2034_v59 }
 0x2ec   : > { %3528 = vst [vmem:[%s5748_s17 + $0x100] sm:$0xff] %v2493_v51 }
 0x2ed   : > { %3529 = vst [vmem:[%s5748_s17 + $0x108] sm:$0xff] %v2534_v27  ;;  %v2204_v26 = vor.u32 1.1754944e-38, %v2203_v21  ;;  %vm2202_vm6 = vcmp.eq.f32.partialorder %v2201_v53, 8.507059e+37 }
 0x2f1   : > { %v4152_v23 = vpop.eup %4151  ;;  %v2575_v29 = vpop.f32.mrf.mxu2 }
 0x2f2   : > { %v2616_v45 = vpop.f32.mrf.mxu3  ;;  %v2193_v7 = vmul.f32 %v4152_v23, %v2034_v59  ;;  %3530 = vst [vmem:[%s5748_s17 + $0x110] sm:$0xff] %v2575_v29  ;;  %v5795_v40 = vpop.xlane.xlu0 %2042  ;;  %vm2198_vm3 = vweird.f32 %v4152_v23 }
 0x2f3   : > { %v2037_v38 = vpop.xlane.xlu1 %2036  ;;  %3531 = vst [vmem:[%s5748_s17 + $0x118] sm:$0xff] %v2616_v45  ;;  %v2496_v22 = vpop.f32.mrf.mxu0  ;;  %vm2199_vm5 = vmor %vm2197_vm4, %vm2198_vm3  ;;  %vm2239_vm1 = vweird.f32 %v5795_v40 }
 0x2f4   : > { %v2537_v2 = vpop.f32.mrf.mxu1  ;;  %v2194_v44 = vsub.f32 1.0, %v2193_v7  ;;  %4153 = vrcp.f32 %v2037_v38  ;;  %3536 = vst [vmem:[%s5748_s17 + $0x140] sm:$0xff] %v2496_v22  ;;  %v2217_v57 = vand.u32 2147483648, %v2037_v38  ;;  %vm2211_vm8 = vweird.f32 %v2037_v38  ;;  %v788_v22 = vld [vmem:[%s5255_s22 + $0x3e8] sm:$0xff] }
 0x2f5   : > { %3537 = vst [vmem:[%s5748_s17 + $0x148] sm:$0xff] %v2537_v2  ;;  %4155 = vrcp.f32 %v5795_v40  ;;  %3029 = vmatpush.msrb.mxu1 %v788_v22 }
 0x2f6   : > { %v2195_v62 = vmul.f32 %v4152_v23, %v2194_v44  ;;  %v2218_v52 = vor.u32 1.1754944e-38, %v2217_v57  ;;  %v779_v57 = vld [vmem:[%s5255_s22 + $0x3a0] sm:$0xff] }
 0x2f8   : > { %v2196_v15 = vadd.f32 %v4152_v23, %v2195_v62 }
 0x2f9   : > { %v2578_v12 = vpop.f32.mrf.mxu2 }
 0x2fa   : > { %v2619_v58 = vpop.f32.mrf.mxu3  ;;  %v4154_v0 = vpop.eup %4153  ;;  %v2200_v14 = vsel %vm2199_vm5, %v4152_v23, %v2196_v15  ;;  %3538 = vst [vmem:[%s5748_s17 + $0x150] sm:$0xff] %v2578_v12  ;;  %v782_v12 = vld [vmem:[%s5255_s22 + $0x3b8] sm:$0xff] }
 0x2fb   : > { %v2205_v46 = vsel %vm2202_vm6, %v2204_v26, %v2200_v14  ;;  %v2207_v24 = vmul.f32 %v4154_v0, %v2037_v38  ;;  %3539 = vst [vmem:[%s5748_s17 + $0x158] sm:$0xff] %v2619_v58  ;;  %v5803_v42 = vpop.xlane.xlu0 %2051  ;;  %v5805_v39 = vpop.xlane.xlu2 %2039  ;;  %vm2212_vm7 = vweird.f32 %v4154_v0  ;;  %v781_v26 = vld [vmem:[%s5255_s22 + $0x3b0] sm:$0xff]  ;;  %3112 = vmatpush.msrb.mxu3 %v782_v12 }
 0x2fc   : > { %v5808_v6 = vmul.f32 %v5515_v1, %v2205_v46  ;;  %v2499_v25 = vpop.f32.mrf.mxu0  ;;  %v2540_v43 = vpop.f32.mrf.mxu1  ;;  %v2215_v1 = vand.u32 2147483647, %v2037_v38  ;;  %4157 = vrcp.f32 %v5805_v39  ;;  %vm2213_vm9 = vmor %vm2211_vm8, %vm2212_vm7  ;;  %v2229_v45 = vand.u32 2147483647, %v5805_v39  ;;  %v787_v38 = vld [vmem:[%s5255_s22 + $0x3e0] sm:$0xff]  ;;  %3071 = vmatpush.msrb.mxu2 %v781_v26  ;;  %v764_v26 = vld [vmem:[%s5255_s22 + $0x328] sm:$0xff] }
 0x2fd   : > { %v2208_v30 = vsub.f32 1.0, %v2207_v24  ;;  %3544 = vst [vmem:[%s5748_s17 + $0x180] sm:$0xff] %v2499_v25  ;;  %v5811_v9 = vpop.eup %4155  ;;  %v5813_v50 = vpop.xlane.xlu1 %2045  ;;  %v2231_v7 = vand.u32 2147483648, %v5805_v39  ;;  %2988 = vmatpush.msrb.mxu0 %v787_v38  ;;  %vm2225_vm12 = vweird.f32 %v5805_v39  ;;  %v765_v12 = vld [vmem:[%s5255_s22 + $0x330] sm:$0xff] }
 0x2fe   : > { %3545 = vst [vmem:[%s5748_s17 + $0x188] sm:$0xff] %v2540_v43  ;;  %3895 = vmatmul.msk.f32.vlgmr.msra.gmra.mxu0 %vm1863_vm0, %v5808_v6  ;;  %3903 = vmatmul.msk.f32.vlgmr.msra.gmra.mxu1 %vm1863_vm0, %v5808_v6  ;;  %v2235_v20 = vmul.f32 %v5811_v9, %v5795_v40  ;;  %4159 = vrcp.f32 %v5813_v50  ;;  %vm2216_vm10 = vcmp.eq.f32.partialorder %v2215_v1, 8.507059e+37  ;;  %vm2240_vm13 = vweird.f32 %v5811_v9 }
 0x2ff   : > { %v2209_v3 = vmul.f32 %v4154_v0, %v2208_v30  ;;  %3911 = vmatmul.msk.f32.vlgmr.msra.gmra.mxu2 %vm1863_vm0, %v5808_v6  ;;  %3919 = vmatmul.msk.f32.vlgmr.msra.gmra.mxu3 %vm1863_vm0, %v5808_v6  ;;  %v2232_v25 = vor.u32 1.1754944e-38, %v2231_v7  ;;  %vm2230_vm15 = vcmp.eq.f32.partialorder %v2229_v45, 8.507059e+37  ;;  %vm5894_vm2 = vmor %vm2239_vm1, %vm2240_vm13  ;;  %vm2253_vm5 = vweird.f32 %v5813_v50 }
 0x300   : > { %v2236_v19 = vsub.f32 1.0, %v2235_v20  ;;  %v2245_v20 = vand.u32 2147483648, %v5795_v40  ;;  %2989 = vmatpush.msrb.mxu0 %v779_v57  ;;  %vm2281_vm13 = vweird.f32 %v5803_v42 }
 0x301   : > { %v2210_v13 = vadd.f32 %v4154_v0, %v2209_v3  ;;  %v2581_v4 = vpop.f32.mrf.mxu2  ;;  %v780_v3 = vld [vmem:[%s5255_s22 + $0x3a8] sm:$0xff] }
 0x302   : > { %v2622_v37 = vpop.f32.mrf.mxu3  ;;  %3546 = vst [vmem:[%s5748_s17 + $0x190] sm:$0xff] %v2581_v4  ;;  %v4158_v36 = vpop.eup %4157  ;;  %3030 = vmatpush.msrb.mxu1 %v780_v3 }
 0x303   : > { %v2214_v32 = vsel %vm2213_vm9, %v4154_v0, %v2210_v13  ;;  %3547 = vst [vmem:[%s5748_s17 + $0x198] sm:$0xff] %v2622_v37  ;;  %v1917_v54 = vpop.xlane.xlu0 %1916  ;;  %v5830_v17 = vpop.xlane.xlu2 %2048  ;;  %v2221_v51 = vmul.f32 %v4158_v36, %v5805_v39  ;;  %vm2226_vm11 = vweird.f32 %v4158_v36 }
 0x304   : > { %v2219_v34 = vsel %vm2216_vm10, %v2218_v52, %v2214_v32  ;;  %v2502_v28 = vpop.f32.mrf.mxu0  ;;  %v2543_v59 = vpop.f32.mrf.mxu1  ;;  %v1953_v27 = vsub.f32 %v5620_v48, %v1917_v54  ;;  %v2237_v48 = vmul.f32 %v5811_v9, %v2236_v19  ;;  %4161 = vrcp.f32 %v5830_v17  ;;  %vm5869_vm14 = vmor %vm2225_vm12, %vm2226_vm11 }
 0x305   : > { %v5835_v31 = vmul.f32 %v5559_v33, %v2219_v34  ;;  %3552 = vst [vmem:[%s5748_s17 + $0x1c0] sm:$0xff] %v2502_v28  ;;  %v5841_v23 = vpop.eup %4159  ;;  %v2222_v29 = vsub.f32 1.0, %v2221_v51  ;;  %v2243_v52 = vand.u32 2147483647, %v5795_v40  ;;  %v2246_v19 = vor.u32 1.1754944e-38, %v2245_v20  ;;  %v774_v51 = vld [vmem:[%s5255_s22 + $0x378] sm:$0xff] }
 0x306   : > { %3553 = vst [vmem:[%s5748_s17 + $0x1c8] sm:$0xff] %v2543_v59  ;;  %v1994_v33 = vmul.f32 1.442695, %v1953_v27  ;;  %v2249_v2 = vmul.f32 %v5841_v23, %v5813_v50  ;;  %v2238_v39 = vadd.f32 %v5811_v9, %v2237_v48  ;;  %v773_v59 = vld [vmem:[%s5255_s22 + $0x370] sm:$0xff]  ;;  %3113 = vmatpush.msrb.mxu3 %v774_v51  ;;  %vm2254_vm4 = vweird.f32 %v5841_v23  ;;  %v755_v20 = vld [vmem:[%s5255_s22 + $0x2e0] sm:$0xff] }
 0x307   : > { %3896 = vmatmul.msk.f32.gmra.mxu0 %vm1863_vm0, %v5835_v31  ;;  %3904 = vmatmul.msk.f32.gmra.mxu1 %vm1863_vm0, %v5835_v31  ;;  %v2223_v44 = vmul.f32 %v4158_v36, %v2222_v29  ;;  %vm2244_vm3 = vcmp.eq.f32.partialorder %v2243_v52, 8.507059e+37  ;;  %vm5942_vm6 = vmor %vm2253_vm5, %vm2254_vm4  ;;  %v739_v51 = vld [vmem:[%s5255_s22 + $0x260] sm:$0xff]  ;;  %vm2267_vm9 = vweird.f32 %v5830_v17 }
 0x308   : > { %3912 = vmatmul.msk.f32.gmra.mxu2 %vm1863_vm0, %v5835_v31  ;;  %3920 = vmatmul.msk.f32.gmra.mxu3 %vm1863_vm0, %v5835_v31  ;;  %4163 = vpow2.f32 %v1994_v33  ;;  %v2250_v43 = vsub.f32 1.0, %v2249_v2  ;;  %v2259_v2 = vand.u32 2147483648, %v5813_v50 }
 0x309   : > { %v2224_v58 = vadd.f32 %v4158_v36, %v2223_v44  ;;  %4165 = vrcp.f32 %v5803_v42  ;;  %3072 = vmatpush.msrb.mxu2 %v773_v59 }
 0x30a   : > { %v2584_v21 = vpop.f32.mrf.mxu2  ;;  %v2625_v62 = vpop.f32.mrf.mxu3  ;;  %v2251_v8 = vmul.f32 %v5841_v23, %v2250_v43  ;;  %v2260_v57 = vor.u32 1.1754944e-38, %v2259_v2 }
 0x30b   : > { %3554 = vst [vmem:[%s5748_s17 + $0x1d0] sm:$0xff] %v2584_v21  ;;  %v1926_v53 = vpop.xlane.xlu0 %1925  ;;  %v1914_v15 = vpop.xlane.xlu2 %1913  ;;  %v771_v21 = vld [vmem:[%s5255_s22 + $0x360] sm:$0xff]  ;;  %3073 = vmatpush.msrb.mxu2 %v765_v12 }
 0x30c   : > { %3555 = vst [vmem:[%s5748_s17 + $0x1d8] sm:$0xff] %v2625_v62  ;;  %v1956_v0 = vsub.f32 %v5650_v47, %v1926_v53  ;;  %v5865_v14 = vpop.xlane.xlu1 %2054  ;;  %v2645_v46 = vpop.f32.mrf.mxu0  ;;  %v2228_v47 = vsel %vm5869_vm14, %v4158_v36, %v2224_v58  ;;  %v1952_v54 = vsub.f32 %v5647_v10, %v1914_v15  ;;  %v2252_v22 = vadd.f32 %v5841_v23, %v2251_v8  ;;  %v772_v62 = vld [vmem:[%s5255_s22 + $0x368] sm:$0xff]  ;;  %v731_v12 = vld [vmem:[%s5255_s22 + $0x220] sm:$0xff] }
 0x30d   : > { %3500 = vst [vmem:[%s5748_s17 + $0x20] sm:$0xff] %v2645_v46  ;;  %v2686_v30 = vpop.f32.mrf.mxu1  ;;  %v5880_v1 = vpop.eup %4161  ;;  %v2233_v13 = vsel %vm2230_vm15, %v2232_v25, %v2228_v47  ;;  %2990 = vmatpush.msrb.mxu0 %v771_v21  ;;  %3031 = vmatpush.msrb.mxu1 %v772_v62  ;;  %v766_v47 = vld [vmem:[%s5255_s22 + $0x338] sm:$0xff] }
 0x30e   : > { %3501 = vst [vmem:[%s5748_s17 + $0x28] sm:$0xff] %v2686_v30  ;;  %v2000_v4 = vmul.f32 1.442695, %v1956_v0  ;;  %v5884_v37 = vpop.eup %4163  ;;  %v5889_v32 = vmul.f32 %v5592_v60, %v2233_v13  ;;  %v2242_v60 = vsel %vm5894_vm2, %v5811_v9, %v2238_v39  ;;  %v2263_v10 = vmul.f32 %v5880_v1, %v5830_v17  ;;  %v756_v13 = vld [vmem:[%s5255_s22 + $0x2e8] sm:$0xff]  ;;  %3114 = vmatpush.msrb.mxu3 %v766_v47 }
 0x30f   : > { %v2059_v40 = vsel %vm1863_vm0, %v5884_v37, 0.0  ;;  %v1992_v34 = vmul.f32 1.442695, %v1952_v54  ;;  %v2247_v33 = vsel %vm2244_vm3, %v2246_v19, %v2242_v60  ;;  %v5921_v38 = vpop.eup %4165  ;;  %v2257_v0 = vand.u32 2147483647, %v5813_v50  ;;  %3032 = vmatpush.msrb.mxu1 %v764_v26  ;;  %v747_v60 = vld [vmem:[%s5255_s22 + $0x2a0] sm:$0xff] }
 0x310   : > { %4167 = vpow2.f32 %v2000_v4  ;;  %3897 = vmatmul.msk.f32.gmra.mxu0 %vm1863_vm0, %v5889_v32  ;;  %3905 = vmatmul.msk.f32.gmra.mxu1 %vm1863_vm0, %v5889_v32  ;;  %v2264_v44 = vsub.f32 1.0, %v2263_v10  ;;  %v5935_v58 = vmul.f32 %v5554_v5, %v2247_v33  ;;  %v5952_v50 = vmul.f32 %v5921_v38, %v5803_v42  ;;  %v757_v4 = vld [vmem:[%s5255_s22 + $0x2f0] sm:$0xff] }
 0x311   : > { %3913 = vmatmul.msk.f32.gmra.mxu2 %vm1863_vm0, %v5889_v32  ;;  %3921 = vmatmul.msk.f32.gmra.mxu3 %vm1863_vm0, %v5889_v32  ;;  %4169 = vpow2.f32 %v1992_v34  ;;  %v2256_v25 = vsel %vm5942_vm6, %v5841_v23, %v2252_v22  ;;  %vm2258_vm7 = vcmp.eq.f32.partialorder %v2257_v0, 8.507059e+37  ;;  %vm2268_vm8 = vweird.f32 %v5880_v1 }
 0x312   : > { %v2727_v28 = vpop.f32.mrf.mxu2  ;;  %v2768_v36 = vpop.f32.mrf.mxu3  ;;  %2060 = vadd.xlane.f32.xlu2 %v2059_v40  ;;  %4171 = vrcp.f32 %v5865_v14  ;;  %v2265_v30 = vmul.f32 %v5880_v1, %v2264_v44  ;;  %v758_v40 = vld [vmem:[%s5255_s22 + $0x2f8] sm:$0xff]  ;;  %v2261_v8 = vsel %vm2258_vm7, %v2260_v57, %v2256_v25  ;;  %3033 = vmatpush.msrb.mxu1 %v756_v13  ;;  %vm6001_vm10 = vmor %vm2267_vm9, %vm2268_vm8  ;;  %vm2282_vm12 = vweird.f32 %v5921_v38 }
 0x313   : > { %3502 = vst [vmem:[%s5748_s17 + $0x30] sm:$0xff] %v2727_v28  ;;  %v1923_v9 = vpop.xlane.xlu2 %1922  ;;  %v748_v28 = vld [vmem:[%s5255_s22 + $0x2a8] sm:$0xff]  ;;  %3074 = vmatpush.msrb.mxu2 %v757_v4  ;;  %3115 = vmatpush.msrb.mxu3 %v758_v40  ;;  %v2285_v13 = vand.u32 2147483647, %v5803_v42  ;;  %vm6047_vm14 = vmor %vm2281_vm13, %vm2282_vm12  ;;  %vm2295_vm2 = vweird.f32 %v5865_v14 }
 0x314   : > { %3503 = vst [vmem:[%s5748_s17 + $0x38] sm:$0xff] %v2768_v36  ;;  %v1920_v27 = vpop.xlane.xlu1 %1919  ;;  %v2648_v29 = vpop.f32.mrf.mxu0  ;;  %v1955_v45 = vsub.f32 %v5673_v63, %v1923_v9  ;;  %v749_v36 = vld [vmem:[%s5255_s22 + $0x2b0] sm:$0xff]  ;;  %v2278_v9 = vsub.f32 1.0, %v5952_v50  ;;  %3034 = vmatpush.msrb.mxu1 %v748_v28 }
 0x315   : > { %v1954_v48 = vsub.f32 %v5675_v41, %v1920_v27  ;;  %3508 = vst [vmem:[%s5748_s17 + $0x60] sm:$0xff] %v2648_v29  ;;  %v2689_v7 = vpop.f32.mrf.mxu1  ;;  %v763_v41 = vld [vmem:[%s5255_s22 + $0x320] sm:$0xff]  ;;  %v2273_v29 = vand.u32 2147483648, %v5830_v17  ;;  %3075 = vmatpush.msrb.mxu2 %v749_v36  ;;  %v733_v50 = vld [vmem:[%s5255_s22 + $0x230] sm:$0xff]  ;;  %vm2286_vm15 = vcmp.eq.f32.partialorder %v2285_v13, 8.507059e+37 }
 0x316   : > { %3509 = vst [vmem:[%s5748_s17 + $0x68] sm:$0xff] %v2689_v7  ;;  %v5930_v53 = vpop.eup %4167  ;;  %v1998_v15 = vmul.f32 1.442695, %v1955_v45  ;;  %2991 = vmatpush.msrb.mxu0 %v763_v41  ;;  %v5995_v45 = vmul.f32 %v5596_v11, %v2261_v8  ;;  %v2271_v7 = vand.u32 2147483647, %v5830_v17  ;;  %v2279_v17 = vmul.f32 %v5921_v38, %v2278_v9  ;;  %v809_v13 = vld [vmem:[%s5255_s22 + $0x490] sm:$0xff] }
 0x317   : > { %v1996_v63 = vmul.f32 1.442695, %v1954_v48  ;;  %v2068_v24 = vsel %vm1863_vm0, %v5930_v53, 0.0  ;;  %v5948_v5 = vpop.eup %4169  ;;  %v2274_v26 = vor.u32 1.1754944e-38, %v2273_v29  ;;  %v2301_v9 = vand.u32 2147483648, %v5865_v14 }
 0x318   : > { %3898 = vmatmul.msk.f32.gmra.mxu0 %vm1863_vm0, %v5935_v58  ;;  %3906 = vmatmul.msk.f32.gmra.mxu1 %vm1863_vm0, %v5935_v58  ;;  %v2056_v23 = vsel %vm1863_vm0, %v5948_v5, 0.0  ;;  %v5981_v19 = vpop.eup %4171  ;;  %vm2272_vm11 = vcmp.eq.f32.partialorder %v2271_v7, 8.507059e+37  ;;  %v2280_v57 = vadd.f32 %v5921_v38, %v2279_v17 }
 0x319   : > { %4173 = vpow2.f32 %v1996_v63  ;;  %3914 = vmatmul.msk.f32.gmra.mxu2 %vm1863_vm0, %v5935_v58  ;;  %3922 = vmatmul.msk.f32.gmra.mxu3 %vm1863_vm0, %v5935_v58  ;;  %v2291_v21 = vmul.f32 %v5981_v19, %v5865_v14  ;;  %v740_v63 = vld [vmem:[%s5255_s22 + $0x268] sm:$0xff]  ;;  %vm2296_vm1 = vweird.f32 %v5981_v19 }
 0x31a   : > { %4175 = vpow2.f32 %v1998_v15  ;;  %v2730_v39 = vpop.f32.mrf.mxu2  ;;  %v2771_v43 = vpop.f32.mrf.mxu3  ;;  %2069 = vadd.xlane.f32.xlu2 %v2068_v24  ;;  %2057 = vadd.xlane.f32.xlu0 %v2056_v23  ;;  %v741_v15 = vld [vmem:[%s5255_s22 + $0x270] sm:$0xff]  ;;  %v732_v24 = vld [vmem:[%s5255_s22 + $0x228] sm:$0xff]  ;;  %vm2297_vm3 = vmor %vm2295_vm2, %vm2296_vm1 }
 0x31b   : > { %3510 = vst [vmem:[%s5748_s17 + $0x70] sm:$0xff] %v2730_v39  ;;  %v1932_v3 = vpop.xlane.xlu2 %1931  ;;  %2992 = vmatpush.msrb.mxu0 %v755_v20  ;;  %3035 = vmatpush.msrb.mxu1 %v740_v63  ;;  %v2292_v23 = vsub.f32 1.0, %v2291_v21  ;;  %v2287_v20 = vand.u32 2147483648, %v5803_v42  ;;  %v2284_v42 = vsel %vm6047_vm14, %v5921_v38, %v2280_v57  ;;  %v847_v63 = vld [vmem:[%s5255_s22 + $0x5c0] sm:$0xff] }
 0x31c   : > { %3511 = vst [vmem:[%s5748_s17 + $0x78] sm:$0xff] %v2771_v43  ;;  %v1929_v52 = vpop.xlane.xlu1 %1928  ;;  %v1958_v54 = vsub.f32 %v5689_v16, %v1932_v3  ;;  %v2651_v35 = vpop.f32.mrf.mxu0  ;;  %v2266_v16 = vadd.f32 %v5880_v1, %v2265_v30  ;;  %3076 = vmatpush.msrb.mxu2 %v741_v15  ;;  %v734_v43 = vld [vmem:[%s5255_s22 + $0x238] sm:$0xff]  ;;  %v823_v57 = vld [vmem:[%s5255_s22 + $0x500] sm:$0xff] }
 0x31d   : > { %v1957_v10 = vsub.f32 %v5691_v56, %v1929_v52  ;;  %3516 = vst [vmem:[%s5748_s17 + $0xa0] sm:$0xff] %v2651_v35  ;;  %v2692_v34 = vpop.f32.mrf.mxu1  ;;  %v750_v56 = vld [vmem:[%s5255_s22 + $0x2b8] sm:$0xff]  ;;  %2993 = vmatpush.msrb.mxu0 %v747_v60  ;;  %3036 = vmatpush.msrb.mxu1 %v732_v24  ;;  %v2288_v8 = vor.u32 1.1754944e-38, %v2287_v20  ;;  %v839_v24 = vld [vmem:[%s5255_s22 + $0x580] sm:$0xff]  ;;  %v817_v20 = vld [vmem:[%s5255_s22 + $0x4d0] sm:$0xff] }
 0x31e   : > { %v2004_v59 = vmul.f32 1.442695, %v1958_v54  ;;  %3517 = vst [vmem:[%s5748_s17 + $0xa8] sm:$0xff] %v2692_v34  ;;  %3116 = vmatpush.msrb.mxu3 %v750_v56  ;;  %v2270_v44 = vsel %vm6001_vm10, %v5880_v1, %v2266_v16  ;;  %v742_v1 = vld [vmem:[%s5255_s22 + $0x278] sm:$0xff]  ;;  %3077 = vmatpush.msrb.mxu2 %v733_v50  ;;  %v840_v50 = vld [vmem:[%s5255_s22 + $0x588] sm:$0xff] }
 0x31f   : > { %v5989_v27 = vpop.eup %4173  ;;  %v2002_v33 = vmul.f32 1.442695, %v1957_v10  ;;  %2994 = vmatpush.msrb.mxu0 %v739_v51  ;;  %v2275_v25 = vsel %vm2272_vm11, %v2274_v26, %v2270_v44  ;;  %v2289_v10 = vsel %vm2286_vm15, %v2288_v8, %v2284_v42  ;;  %v848_v26 = vld [vmem:[%s5255_s22 + $0x5c8] sm:$0xff]  ;;  %v802_v8 = vld [vmem:[%s5255_s22 + $0x458] sm:$0xff] }
 0x320   : > { %v5992_v48 = vpop.eup %4175  ;;  %4177 = vpow2.f32 %v2004_v59  ;;  %v2062_v11 = vsel %vm1863_vm0, %v5989_v27, 0.0  ;;  %3899 = vmatmul.msk.f32.gmra.mxu0 %vm1863_vm0, %v5995_v45  ;;  %3907 = vmatmul.msk.f32.gmra.mxu1 %vm1863_vm0, %v5995_v45  ;;  %v6045_v4 = vmul.f32 %v5626_v55, %v2275_v25  ;;  %v2293_v55 = vmul.f32 %v5981_v19, %v2292_v23  ;;  %v834_v25 = vld [vmem:[%s5255_s22 + $0x558] sm:$0xff]  ;;  %v824_v23 = vld [vmem:[%s5255_s22 + $0x508] sm:$0xff] }
 0x321   : > { %4179 = vpow2.f32 %v2002_v33  ;;  %v2065_v2 = vsel %vm1863_vm0, %v5992_v48, 0.0  ;;  %3915 = vmatmul.msk.f32.gmra.mxu2 %vm1863_vm0, %v5995_v45  ;;  %3923 = vmatmul.msk.f32.gmra.mxu3 %vm1863_vm0, %v5995_v45  ;;  %v6077_v16 = vmul.f32 %v5586_v49, %v2289_v10  ;;  %v2299_v59 = vand.u32 2147483647, %v5865_v14  ;;  %v808_v42 = vld [vmem:[%s5255_s22 + $0x488] sm:$0xff] }
 0x322   : > { %v2733_v62 = vpop.f32.mrf.mxu2  ;;  %v2774_v41 = vpop.f32.mrf.mxu3  ;;  %2063 = vadd.xlane.f32.xlu0 %v2062_v11  ;;  %2066 = vadd.xlane.f32.xlu1 %v2065_v2  ;;  %v2294_v28 = vadd.f32 %v5981_v19, %v2293_v55  ;;  %v2302_v33 = vor.u32 1.1754944e-38, %v2301_v9  ;;  %v800_v10 = vld [vmem:[%s5255_s22 + $0x448] sm:$0xff]  ;;  %v793_v9 = vld [vmem:[%s5255_s22 + $0x410] sm:$0xff] }
 0x323   : > { %3518 = vst [vmem:[%s5748_s17 + $0xb0] sm:$0xff] %v2733_v62  ;;  %3117 = vmatpush.msrb.mxu3 %v742_v1  ;;  %2995 = vmatpush.msrb.mxu0 %v731_v12  ;;  %vm2300_vm4 = vcmp.eq.f32.partialorder %v2299_v59, 8.507059e+37  ;;  %v849_v62 = vld [vmem:[%s5255_s22 + $0x5d0] sm:$0xff]  ;;  %v791_v59 = vld [vmem:[%s5255_s22 + $0x400] sm:$0xff] }
 0x324   : > { %3519 = vst [vmem:[%s5748_s17 + $0xb8] sm:$0xff] %v2774_v41  ;;  %v1935_v0 = vpop.xlane.xlu1 %1934  ;;  %v2654_v46 = vpop.f32.mrf.mxu0  ;;  %v2298_v51 = vsel %vm2297_vm3, %v5981_v19, %v2294_v28  ;;  %v850_v41 = vld [vmem:[%s5255_s22 + $0x5d8] sm:$0xff]  ;;  %3258 = vmatpush.msra.mxu2 %v849_v62  ;;  %3217 = vmatpush.msra.mxu1 %v848_v26  ;;  %v852_v62 = vld [vmem:[%s5255_s22 + $0x5e8] sm:$0xff] }
 0x325   : > { %v1959_v30 = vsub.f32 %v5705_v61, %v1935_v0  ;;  %3524 = vst [vmem:[%s5748_s17 + $0xe0] sm:$0xff] %v2654_v46  ;;  %v2695_v39 = vpop.f32.mrf.mxu1  ;;  %3118 = vmatpush.msrb.mxu3 %v734_v43  ;;  %v2303_v19 = vsel %vm2300_vm4, %v2302_v33, %v2298_v51  ;;  %3176 = vmatpush.msra.mxu0 %v847_v63  ;;  %v841_v0 = vld [vmem:[%s5255_s22 + $0x590] sm:$0xff]  ;;  %v842_v46 = vld [vmem:[%s5255_s22 + $0x598] sm:$0xff] }
 0x326   : > { %v6034_v47 = vpop.eup %4177  ;;  %3525 = vst [vmem:[%s5748_s17 + $0xe8] sm:$0xff] %v2695_v39  ;;  %v6097_v22 = vmul.f32 %v5654_v18, %v2303_v19  ;;  %3259 = vmatpush.msra.mxu2 %v841_v0  ;;  %3218 = vmatpush.msra.mxu1 %v840_v50  ;;  %v832_v39 = vld [vmem:[%s5255_s22 + $0x548] sm:$0xff]  ;;  %v826_v43 = vld [vmem:[%s5255_s22 + $0x518] sm:$0xff]  ;;  %v837_v50 = vld [vmem:[%s5255_s22 + $0x570] sm:$0xff] }
 0x327   : > { %v6039_v3 = vpop.eup %4179  ;;  %v2006_v61 = vmul.f32 1.442695, %v1959_v30  ;;  %v2074_v35 = vsel %vm1863_vm0, %v6034_v47, 0.0  ;;  %3299 = vmatpush.msra.mxu3 %v850_v41  ;;  %3177 = vmatpush.msra.mxu0 %v839_v24  ;;  %v831_v30 = vld [vmem:[%s5255_s22 + $0x540] sm:$0xff]  ;;  %v845_v41 = vld [vmem:[%s5255_s22 + $0x5b0] sm:$0xff]  ;;  %v844_v0 = vld [vmem:[%s5255_s22 + $0x5a8] sm:$0xff] }
 0x328   : > { %v2071_v54 = vsel %vm1863_vm0, %v6039_v3, 0.0  ;;  %3900 = vmatmul.msk.f32.gmra.mxu0 %vm1863_vm0, %v6045_v4  ;;  %3908 = vmatmul.msk.f32.gmra.mxu1 %vm1863_vm0, %v6045_v4 }
 0x329   : > { %4181 = vpow2.f32 %v2006_v61  ;;  %3916 = vmatmul.msk.f32.gmra.mxu2 %vm1863_vm0, %v6045_v4  ;;  %3924 = vmatmul.msk.f32.gmra.mxu3 %vm1863_vm0, %v6045_v4  ;;  %v818_v61 = vld [vmem:[%s5255_s22 + $0x4d8] sm:$0xff] }
 0x32a   : > { %v2736_v40 = vpop.f32.mrf.mxu2  ;;  %v2777_v60 = vpop.f32.mrf.mxu3  ;;  %2072 = vadd.xlane.f32.xlu0 %v2071_v54  ;;  %2075 = vadd.xlane.f32.xlu1 %v2074_v35  ;;  %v807_v35 = vld [vmem:[%s5255_s22 + $0x480] sm:$0xff] }
 0x32b   : > { %3526 = vst [vmem:[%s5748_s17 + $0xf0] sm:$0xff] %v2736_v40  ;;  %3300 = vmatpush.msra.mxu3 %v842_v46  ;;  %3178 = vmatpush.msra.mxu0 %v831_v30 }
 0x32c   : > { %3527 = vst [vmem:[%s5748_s17 + $0xf8] sm:$0xff] %v2777_v60  ;;  %v2657_v38 = vpop.f32.mrf.mxu0  ;;  %3219 = vmatpush.msra.mxu1 %v832_v39  ;;  %v801_v60 = vld [vmem:[%s5255_s22 + $0x450] sm:$0xff]  ;;  %v835_v39 = vld [vmem:[%s5255_s22 + $0x560] sm:$0xff] }
 0x32d   : > { %3532 = vst [vmem:[%s5748_s17 + $0x120] sm:$0xff] %v2657_v38  ;;  %v2698_v34 = vpop.f32.mrf.mxu1  ;;  %3301 = vmatpush.msra.mxu3 %v834_v25  ;;  %3179 = vmatpush.msra.mxu0 %v823_v57  ;;  %v799_v38 = vld [vmem:[%s5255_s22 + $0x440] sm:$0xff] }
 0x32e   : > { %3533 = vst [vmem:[%s5748_s17 + $0x128] sm:$0xff] %v2698_v34  ;;  %3220 = vmatpush.msra.mxu1 %v824_v23 }
 0x32f   : > { %v6073_v36 = vpop.eup %4181  ;;  %3302 = vmatpush.msra.mxu3 %v826_v43 }
 0x330   : > { %v2077_v56 = vsel %vm1863_vm0, %v6073_v36, 0.0  ;;  %3901 = vmatmul.msk.f32.gmra.mxu0 %vm1863_vm0, %v6077_v16  ;;  %3909 = vmatmul.msk.f32.gmra.mxu1 %vm1863_vm0, %v6077_v16 }
 0x331   : > { %2078 = vadd.xlane.f32.xlu2 %v2077_v56  ;;  %3917 = vmatmul.msk.f32.gmra.mxu2 %vm1863_vm0, %v6077_v16  ;;  %v792_v56 = vld [vmem:[%s5255_s22 + $0x408] sm:$0xff] }
 0x332   : > { %v2739_v49 = vpop.f32.mrf.mxu2  ;;  %v2780_v29 = vpop.f32.mrf.mxu3  ;;  %3925 = vmatmul.msk.f32.gmra.mxu3 %vm1863_vm0, %v6077_v16 }
 0x333   : > { %3534 = vst [vmem:[%s5748_s17 + $0x130] sm:$0xff] %v2739_v49  ;;  %3303 = vmatpush.msra.mxu3 %v818_v61  ;;  %v830_v61 = vld [vmem:[%s5255_s22 + $0x538] sm:$0xff] }
 0x334   : > { %3535 = vst [vmem:[%s5748_s17 + $0x138] sm:$0xff] %v2780_v29  ;;  %v2660_v14 = vpop.f32.mrf.mxu0 }
 0x335   : > { %3540 = vst [vmem:[%s5748_s17 + $0x160] sm:$0xff] %v2660_v14  ;;  %v2701_v7 = vpop.f32.mrf.mxu1 }
 0x336   : > { %3541 = vst [vmem:[%s5748_s17 + $0x168] sm:$0xff] %v2701_v7 }
 0x338   : > { %3902 = vmatmul.msk.f32.gmra.mxu0 %vm1863_vm0, %v6097_v22  ;;  %3910 = vmatmul.msk.f32.gmra.mxu1 %vm1863_vm0, %v6097_v22 }
 0x339   : > { %3918 = vmatmul.msk.f32.gmra.mxu2 %vm1863_vm0, %v6097_v22 }
 0x33a   : > { %v2742_v11 = vpop.f32.mrf.mxu2  ;;  %v2783_v2 = vpop.f32.mrf.mxu3  ;;  %3926 = vmatmul.msk.f32.gmra.mxu3 %vm1863_vm0, %v6097_v22 }
 0x33b   : > { %3542 = vst [vmem:[%s5748_s17 + $0x170] sm:$0xff] %v2742_v11  ;;  %v853_v11 = vld [vmem:[%s5255_s22 + $0x5f0] sm:$0xff] }
 0x33c   : > { %3543 = vst [vmem:[%s5748_s17 + $0x178] sm:$0xff] %v2783_v2  ;;  %v2663_v18 = vpop.f32.mrf.mxu0  ;;  %v854_v2 = vld [vmem:[%s5255_s22 + $0x5f8] sm:$0xff] }
 0x33d   : > { %3548 = vst [vmem:[%s5748_s17 + $0x1a0] sm:$0xff] %v2663_v18  ;;  %v2704_v17 = vpop.f32.mrf.mxu1 }
 0x33e   : > { %3549 = vst [vmem:[%s5748_s17 + $0x1a8] sm:$0xff] %v2704_v17 }
 0x340   : > { %3927 = vmatmul.msk.f32.vlgmr.msrb.gmra.mxu0 %vm1863_vm0, %v5808_v6  ;;  %3935 = vmatmul.msk.f32.vlgmr.msrb.gmra.mxu1 %vm1863_vm0, %v5808_v6 }
 0x341   : > { %3943 = vmatmul.msk.f32.vlgmr.msrb.gmra.mxu2 %vm1863_vm0, %v5808_v6 }
 0x342   : > { %v2745_v44 = vpop.f32.mrf.mxu2  ;;  %v2786_v21 = vpop.f32.mrf.mxu3  ;;  %3951 = vmatmul.msk.f32.vlgmr.msrb.gmra.mxu3 %vm1863_vm0, %v5808_v6 }
 0x343   : > { %3550 = vst [vmem:[%s5748_s17 + $0x1b0] sm:$0xff] %v2745_v44 }
 0x344   : > { %3551 = vst [vmem:[%s5748_s17 + $0x1b8] sm:$0xff] %v2786_v21  ;;  %v2666_v15 = vpop.f32.mrf.mxu0  ;;  %v851_v21 = vld [vmem:[%s5255_s22 + $0x5e0] sm:$0xff] }
 0x345   : > { %3556 = vst [vmem:[%s5748_s17 + $0x1e0] sm:$0xff] %v2666_v15  ;;  %v2707_v1 = vpop.f32.mrf.mxu1 }
 0x346   : > { %3557 = vst [vmem:[%s5748_s17 + $0x1e8] sm:$0xff] %v2707_v1 }
 0x348   : > { %3928 = vmatmul.msk.f32.gmra.mxu0 %vm1863_vm0, %v5835_v31  ;;  %3936 = vmatmul.msk.f32.gmra.mxu1 %vm1863_vm0, %v5835_v31 }
 0x349   : > { %3944 = vmatmul.msk.f32.gmra.mxu2 %vm1863_vm0, %v5835_v31 }
 0x34a   : > { %v2748_v6 = vpop.f32.mrf.mxu2  ;;  %v2789_v12 = vpop.f32.mrf.mxu3  ;;  %3952 = vmatmul.msk.f32.gmra.mxu3 %vm1863_vm0, %v5835_v31  ;;  %v833_v31 = vld [vmem:[%s5255_s22 + $0x550] sm:$0xff] }
 0x34b   : > { %3558 = vst [vmem:[%s5748_s17 + $0x1f0] sm:$0xff] %v2748_v6  ;;  %3260 = vmatpush.msra.mxu2 %v833_v31  ;;  %v846_v6 = vld [vmem:[%s5255_s22 + $0x5b8] sm:$0xff] }
 0x34c   : > { %3559 = vst [vmem:[%s5748_s17 + $0x1f8] sm:$0xff] %v2789_v12  ;;  %v843_v12 = vld [vmem:[%s5255_s22 + $0x5a0] sm:$0xff]  ;;  %v838_v31 = vld [vmem:[%s5255_s22 + $0x578] sm:$0xff] }
 0x350   : > { %3929 = vmatmul.msk.f32.gmra.mxu0 %vm1863_vm0, %v5889_v32  ;;  %3937 = vmatmul.msk.f32.gmra.mxu1 %vm1863_vm0, %v5889_v32 }
 0x351   : > { %3945 = vmatmul.msk.f32.gmra.mxu2 %vm1863_vm0, %v5889_v32 }
 0x352   : > { %3953 = vmatmul.msk.f32.gmra.mxu3 %vm1863_vm0, %v5889_v32  ;;  %v825_v32 = vld [vmem:[%s5255_s22 + $0x510] sm:$0xff] }
 0x353   : > { %3261 = vmatpush.msra.mxu2 %v825_v32  ;;  %v836_v32 = vld [vmem:[%s5255_s22 + $0x568] sm:$0xff] }
 0x355   : > { %3262 = vmatpush.msra.mxu2 %v817_v20  ;;  %v829_v20 = vld [vmem:[%s5255_s22 + $0x530] sm:$0xff] }
 0x357   : > { %3263 = vmatpush.msra.mxu2 %v809_v13 }
 0x358   : > { %3930 = vmatmul.msk.f32.gmra.mxu0 %vm1863_vm0, %v5935_v58  ;;  %3938 = vmatmul.msk.f32.gmra.mxu1 %vm1863_vm0, %v5935_v58 }
 0x359   : > { %3946 = vmatmul.msk.f32.gmra.mxu2 %vm1863_vm0, %v5935_v58 }
 0x35a   : > { %3954 = vmatmul.msk.f32.gmra.mxu3 %vm1863_vm0, %v5935_v58  ;;  %v815_v58 = vld [vmem:[%s5255_s22 + $0x4c0] sm:$0xff]  ;;  %3264 = vmatpush.msra.mxu2 %v801_v60 }
 0x35b   : > { %3180 = vmatpush.msra.mxu0 %v815_v58 }
 0x35c   : > { %3265 = vmatpush.msra.mxu2 %v793_v9 }
 0x35d   : > { %3181 = vmatpush.msra.mxu0 %v807_v35 }
 0x35e   : > { %3422 = vmatpush.msrb.mxu2 %v853_v11 }
 0x35f   : > { %3182 = vmatpush.msra.mxu0 %v799_v38 }
 0x360   : > { %3931 = vmatmul.msk.f32.gmra.mxu0 %vm1863_vm0, %v5995_v45  ;;  %3939 = vmatmul.msk.f32.gmra.mxu1 %vm1863_vm0, %v5995_v45 }
 0x361   : > { %3947 = vmatmul.msk.f32.gmra.mxu2 %vm1863_vm0, %v5995_v45  ;;  %3183 = vmatpush.msra.mxu0 %v791_v59  ;;  %v827_v59 = vld [vmem:[%s5255_s22 + $0x520] sm:$0xff] }
 0x362   : > { %3955 = vmatmul.msk.f32.gmra.mxu3 %vm1863_vm0, %v5995_v45  ;;  %v816_v45 = vld [vmem:[%s5255_s22 + $0x4c8] sm:$0xff]  ;;  %3423 = vmatpush.msrb.mxu2 %v845_v41 }
 0x363   : > { %3221 = vmatpush.msra.mxu1 %v816_v45  ;;  %3340 = vmatpush.msrb.mxu0 %v851_v21 }
 0x364   : > { %3424 = vmatpush.msrb.mxu2 %v837_v50  ;;  %v814_v50 = vld [vmem:[%s5255_s22 + $0x4b8] sm:$0xff] }
 0x365   : > { %3222 = vmatpush.msra.mxu1 %v808_v42  ;;  %3341 = vmatpush.msrb.mxu0 %v843_v12  ;;  %v820_v12 = vld [vmem:[%s5255_s22 + $0x4e8] sm:$0xff] }
 0x366   : > { %3425 = vmatpush.msrb.mxu2 %v829_v20 }
 0x367   : > { %3223 = vmatpush.msra.mxu1 %v800_v10  ;;  %3342 = vmatpush.msrb.mxu0 %v835_v39 }
 0x368   : > { %3932 = vmatmul.msk.f32.gmra.mxu0 %vm1863_vm0, %v6045_v4  ;;  %3940 = vmatmul.msk.f32.gmra.mxu1 %vm1863_vm0, %v6045_v4 }
 0x369   : > { %3948 = vmatmul.msk.f32.gmra.mxu2 %vm1863_vm0, %v6045_v4  ;;  %3224 = vmatpush.msra.mxu1 %v792_v56  ;;  %v828_v56 = vld [vmem:[%s5255_s22 + $0x528] sm:$0xff] }
 0x36a   : > { %3956 = vmatmul.msk.f32.gmra.mxu3 %vm1863_vm0, %v6045_v4  ;;  %v810_v4 = vld [vmem:[%s5255_s22 + $0x498] sm:$0xff]  ;;  %3343 = vmatpush.msrb.mxu0 %v827_v59 }
 0x36b   : > { %3304 = vmatpush.msra.mxu3 %v810_v4  ;;  %3381 = vmatpush.msrb.mxu1 %v852_v62 }
 0x36d   : > { %3305 = vmatpush.msra.mxu3 %v802_v8  ;;  %3382 = vmatpush.msrb.mxu1 %v844_v0 }
 0x36f   : > { %3383 = vmatpush.msrb.mxu1 %v836_v32 }
 0x370   : > { %3933 = vmatmul.msk.f32.gmra.mxu0 %vm1863_vm0, %v6077_v16  ;;  %3941 = vmatmul.msk.f32.gmra.mxu1 %vm1863_vm0, %v6077_v16 }
 0x371   : > { %3949 = vmatmul.msk.f32.gmra.mxu2 %vm1863_vm0, %v6077_v16  ;;  %3384 = vmatpush.msrb.mxu1 %v828_v56 }
 0x372   : > { %3957 = vmatmul.msk.f32.gmra.mxu3 %vm1863_vm0, %v6077_v16  ;;  %v794_v16 = vld [vmem:[%s5255_s22 + $0x418] sm:$0xff] }
 0x373   : > { %3306 = vmatpush.msra.mxu3 %v794_v16  ;;  %3385 = vmatpush.msrb.mxu1 %v820_v12 }
 0x375   : > { %3463 = vmatpush.msrb.mxu3 %v854_v2 }
 0x377   : > { %3464 = vmatpush.msrb.mxu3 %v846_v6  ;;  %v819_v6 = vld [vmem:[%s5255_s22 + $0x4e0] sm:$0xff] }
 0x378   : > { %3934 = vmatmul.msk.f32.gmra.mxu0 %vm1863_vm0, %v6097_v22  ;;  %3942 = vmatmul.msk.f32.gmra.mxu1 %vm1863_vm0, %v6097_v22 }
 0x379   : > { %3950 = vmatmul.msk.f32.gmra.mxu2 %vm1863_vm0, %v6097_v22  ;;  %3465 = vmatpush.msrb.mxu3 %v838_v31 }
 0x37a   : > { %3958 = vmatmul.msk.f32.gmra.mxu3 %vm1863_vm0, %v6097_v22  ;;  %3344 = vmatpush.msrb.mxu0 %v819_v6 }
 0x37b   : > { %v2833_v52 = vpop.f32.mrf.mxu0  ;;  %v2874_v54 = vpop.f32.mrf.mxu1  ;;  %3466 = vmatpush.msrb.mxu3 %v830_v61 }
 0x37c   : > { %3560 = vst [vmem:[%s5748_s17 + $0x200] sm:$0xff] %v2833_v52 }
 0x37d   : > { %3561 = vst [vmem:[%s5748_s17 + $0x208] sm:$0xff] %v2874_v54 }
 0x382   : > { %v2915_v55 = vpop.f32.mrf.mxu2  ;;  %v2956_v40 = vpop.f32.mrf.mxu3 }
 0x383   : > { %3562 = vst [vmem:[%s5748_s17 + $0x210] sm:$0xff] %v2915_v55 }
 0x384   : > { %3563 = vst [vmem:[%s5748_s17 + $0x218] sm:$0xff] %v2956_v40  ;;  %v2836_v34 = vpop.f32.mrf.mxu0  ;;  %v2877_v28 = vpop.f32.mrf.mxu1 }
 0x385   : > { %3568 = vst [vmem:[%s5748_s17 + $0x240] sm:$0xff] %v2836_v34  ;;  %v6219_v51 = vpop.xlane.xlu2 %2060 }
 0x386   : > { %3569 = vst [vmem:[%s5748_s17 + $0x248] sm:$0xff] %v2877_v28  ;;  %4183 = vrcp.f32 %v6219_v51  ;;  %v2329_v60 = vand.u32 2147483648, %v6219_v51  ;;  %vm2323_vm10 = vweird.f32 %v6219_v51  ;;  %v2327_v34 = vand.u32 2147483647, %v6219_v51 }
 0x388   : > { %vm2328_vm12 = vcmp.eq.f32.partialorder %v2327_v34, 8.507059e+37 }
 0x38b   : > { %v2918_v49 = vpop.f32.mrf.mxu2  ;;  %v2959_v29 = vpop.f32.mrf.mxu3 }
 0x38c   : > { %3570 = vst [vmem:[%s5748_s17 + $0x250] sm:$0xff] %v2918_v49  ;;  %v6226_v14 = vpop.eup %4183 }
 0x38d   : > { %3571 = vst [vmem:[%s5748_s17 + $0x258] sm:$0xff] %v2959_v29  ;;  %v6224_v33 = vpop.xlane.xlu0 %2057  ;;  %v2839_v19 = vpop.f32.mrf.mxu0  ;;  %v2319_v22 = vmul.f32 %v6226_v14, %v6219_v51  ;;  %vm2324_vm7 = vweird.f32 %v6226_v14  ;;  %v2330_v29 = vor.u32 1.1754944e-38, %v2329_v60  ;;  %v806_v60 = vld [vmem:[%s5255_s22 + $0x478] sm:$0xff] }
 0x38e   : > { %4185 = vrcp.f32 %v6224_v33  ;;  %v2880_v7 = vpop.f32.mrf.mxu1  ;;  %3576 = vst [vmem:[%s5748_s17 + $0x280] sm:$0xff] %v2839_v19  ;;  %v2315_v30 = vand.u32 2147483648, %v6224_v33  ;;  %v2313_v23 = vand.u32 2147483647, %v6224_v33  ;;  %vm2309_vm6 = vweird.f32 %v6224_v33  ;;  %v6273_v42 = vpop.xlane.xlu2 %2069  ;;  %vm6290_vm11 = vmor %vm2323_vm10, %vm2324_vm7 }
 0x38f   : > { %3577 = vst [vmem:[%s5748_s17 + $0x288] sm:$0xff] %v2880_v7  ;;  %v2320_v63 = vsub.f32 1.0, %v2319_v22  ;;  %v2371_v59 = vand.u32 2147483648, %v6273_v42  ;;  %vm2365_vm7 = vweird.f32 %v6273_v42 }
 0x390   : > { %v2316_v13 = vor.u32 1.1754944e-38, %v2315_v30  ;;  %vm2314_vm9 = vcmp.eq.f32.partialorder %v2313_v23, 8.507059e+37 }
 0x391   : > { %v2321_v43 = vmul.f32 %v6226_v14, %v2320_v63 }
 0x393   : > { %v2322_v54 = vadd.f32 %v6226_v14, %v2321_v43 }
 0x394   : > { %v6235_v18 = vpop.eup %4185  ;;  %v2921_v17 = vpop.f32.mrf.mxu2 }
 0x395   : > { %v2962_v44 = vpop.f32.mrf.mxu3  ;;  %v2305_v15 = vmul.f32 %v6235_v18, %v6224_v33  ;;  %3578 = vst [vmem:[%s5748_s17 + $0x290] sm:$0xff] %v2921_v17  ;;  %v6243_v26 = vpop.xlane.xlu0 %2063  ;;  %vm2310_vm5 = vweird.f32 %v6235_v18  ;;  %v821_v33 = vld [vmem:[%s5255_s22 + $0x4f0] sm:$0xff] }
 0x396   : > { %v6245_v1 = vpop.xlane.xlu1 %2066  ;;  %3579 = vst [vmem:[%s5748_s17 + $0x298] sm:$0xff] %v2962_v44  ;;  %4187 = vrcp.f32 %v6243_v26  ;;  %v2842_v46 = vpop.f32.mrf.mxu0  ;;  %vm2311_vm8 = vmor %vm2309_vm6, %vm2310_vm5  ;;  %3426 = vmatpush.msrb.mxu2 %v821_v33  ;;  %v2343_v44 = vand.u32 2147483648, %v6243_v26  ;;  %vm2337_vm14 = vweird.f32 %v6243_v26  ;;  %v2341_v63 = vand.u32 2147483647, %v6243_v26  ;;  %v803_v33 = vld [vmem:[%s5255_s22 + $0x460] sm:$0xff] }
 0x397   : > { %v2883_v24 = vpop.f32.mrf.mxu1  ;;  %v2306_v25 = vsub.f32 1.0, %v2305_v15  ;;  %3584 = vst [vmem:[%s5748_s17 + $0x2c0] sm:$0xff] %v2842_v46  ;;  %4189 = vrcp.f32 %v6245_v1  ;;  %v2357_v23 = vand.u32 2147483648, %v6245_v1  ;;  %vm2351_vm3 = vweird.f32 %v6245_v1 }
 0x398   : > { %3585 = vst [vmem:[%s5748_s17 + $0x2c8] sm:$0xff] %v2883_v24  ;;  %4191 = vrcp.f32 %v6273_v42  ;;  %v2344_v46 = vor.u32 1.1754944e-38, %v2343_v44  ;;  %v813_v24 = vld [vmem:[%s5255_s22 + $0x4b0] sm:$0xff]  ;;  %vm2342_vm1 = vcmp.eq.f32.partialorder %v2341_v63, 8.507059e+37 }
 0x399   : > { %v2307_v57 = vmul.f32 %v6235_v18, %v2306_v25  ;;  %3427 = vmatpush.msrb.mxu2 %v813_v24  ;;  %v796_v24 = vld [vmem:[%s5255_s22 + $0x428] sm:$0xff] }
 0x39b   : > { %v2308_v58 = vadd.f32 %v6235_v18, %v2307_v57 }
 0x39c   : > { %v6268_v45 = vpop.eup %4187  ;;  %v2924_v4 = vpop.f32.mrf.mxu2 }
 0x39d   : > { %v2965_v52 = vpop.f32.mrf.mxu3  ;;  %v2312_v35 = vsel %vm2311_vm8, %v6235_v18, %v2308_v58  ;;  %v2333_v55 = vmul.f32 %v6268_v45, %v6243_v26  ;;  %3586 = vst [vmem:[%s5748_s17 + $0x2d0] sm:$0xff] %v2924_v4  ;;  %v6278_v40 = vpop.eup %4189  ;;  %vm2338_vm13 = vweird.f32 %v6268_v45  ;;  %v811_v4 = vld [vmem:[%s5255_s22 + $0x4a0] sm:$0xff] }
 0x39e   : > { %v2317_v8 = vsel %vm2314_vm9, %v2316_v13, %v2312_v35  ;;  %3587 = vst [vmem:[%s5748_s17 + $0x2d8] sm:$0xff] %v2965_v52  ;;  %v2845_v38 = vpop.f32.mrf.mxu0  ;;  %v2347_v49 = vmul.f32 %v6278_v40, %v6245_v1  ;;  %v6316_v18 = vpop.xlane.xlu0 %2072  ;;  %vm6329_vm15 = vmor %vm2337_vm14, %vm2338_vm13  ;;  %vm2352_vm2 = vweird.f32 %v6278_v40  ;;  %v812_v52 = vld [vmem:[%s5255_s22 + $0x4a8] sm:$0xff]  ;;  %v2358_v35 = vor.u32 1.1754944e-38, %v2357_v23  ;;  %3345 = vmatpush.msrb.mxu0 %v811_v4 }
 0x39f   : > { %v2886_v10 = vpop.f32.mrf.mxu1  ;;  %v6285_v28 = vmul.f32 %v5948_v5, %v2317_v8  ;;  %v2334_v9 = vsub.f32 1.0, %v2333_v55  ;;  %3592 = vst [vmem:[%s5748_s17 + $0x300] sm:$0xff] %v2845_v38  ;;  %v2326_v5 = vsel %vm6290_vm11, %v6226_v14, %v2322_v54  ;;  %v822_v14 = vld [vmem:[%s5255_s22 + $0x4f8] sm:$0xff]  ;;  %v6319_v17 = vpop.eup %4191  ;;  %4193 = vrcp.f32 %v6316_v18  ;;  %vm6368_vm4 = vmor %vm2351_vm3, %vm2352_vm2  ;;  %v805_v55 = vld [vmem:[%s5255_s22 + $0x470] sm:$0xff]  ;;  %3386 = vmatpush.msrb.mxu1 %v812_v52 }
 0x3a0   : > { %3593 = vst [vmem:[%s5748_s17 + $0x308] sm:$0xff] %v2886_v10  ;;  %v2331_v19 = vsel %vm2328_vm12, %v2330_v29, %v2326_v5  ;;  %3467 = vmatpush.msrb.mxu3 %v822_v14  ;;  %v2348_v2 = vsub.f32 1.0, %v2347_v49  ;;  %v6355_v43 = vpop.xlane.xlu1 %2075  ;;  %3428 = vmatpush.msrb.mxu2 %v805_v55  ;;  %vm2366_vm6 = vweird.f32 %v6319_v17  ;;  %v804_v14 = vld [vmem:[%s5255_s22 + $0x468] sm:$0xff]  ;;  %v2385_v15 = vand.u32 2147483648, %v6316_v18 }
 0x3a1   : > { %v2335_v51 = vmul.f32 %v6268_v45, %v2334_v9  ;;  %3959 = vmatmul.msk.f32.vlgmr.msra.gmra.mxu0 %vm1863_vm0, %v6285_v28  ;;  %3967 = vmatmul.msk.f32.vlgmr.msra.gmra.mxu1 %vm1863_vm0, %v6285_v28  ;;  %v6324_v41 = vmul.f32 %v5884_v37, %v2331_v19  ;;  %v2361_v37 = vmul.f32 %v6319_v17, %v6273_v42  ;;  %4195 = vrcp.f32 %v6355_v43  ;;  %vm6407_vm8 = vmor %vm2365_vm7, %vm2366_vm6 }
 0x3a2   : > { %3975 = vmatmul.msk.f32.vlgmr.msra.gmra.mxu2 %vm1863_vm0, %v6285_v28  ;;  %3983 = vmatmul.msk.f32.vlgmr.msra.gmra.mxu3 %vm1863_vm0, %v6285_v28  ;;  %v2349_v26 = vmul.f32 %v6278_v40, %v2348_v2  ;;  %vm2379_vm11 = vweird.f32 %v6316_v18  ;;  %v2399_v23 = vand.u32 2147483648, %v6355_v43  ;;  %v2397_v13 = vand.u32 2147483647, %v6355_v43 }
 0x3a3   : > { %v2336_v11 = vadd.f32 %v6268_v45, %v2335_v51  ;;  %3468 = vmatpush.msrb.mxu3 %v814_v50  ;;  %v2362_v39 = vsub.f32 1.0, %v2361_v37  ;;  %v2369_v51 = vand.u32 2147483647, %v6273_v42  ;;  %3346 = vmatpush.msrb.mxu0 %v803_v33 }
 0x3a4   : > { %v2927_v7 = vpop.f32.mrf.mxu2  ;;  %v2350_v32 = vadd.f32 %v6278_v40, %v2349_v26  ;;  %v6394_v9 = vpop.xlane.xlu2 %2078  ;;  %3387 = vmatpush.msrb.mxu1 %v804_v14  ;;  %vm2398_vm2 = vcmp.eq.f32.partialorder %v2397_v13, 8.507059e+37 }
 0x3a5   : > { %v2968_v22 = vpop.f32.mrf.mxu3  ;;  %3594 = vst [vmem:[%s5748_s17 + $0x310] sm:$0xff] %v2927_v7  ;;  %v2340_v0 = vsel %vm6329_vm15, %v6268_v45, %v2336_v11  ;;  %v6358_v57 = vpop.eup %4193  ;;  %v2355_v45 = vand.u32 2147483647, %v6245_v1  ;;  %v2363_v54 = vmul.f32 %v6319_v17, %v2362_v39  ;;  %3469 = vmatpush.msrb.mxu3 %v806_v60  ;;  %4197 = vrcp.f32 %v6394_v9  ;;  %v798_v11 = vld [vmem:[%s5255_s22 + $0x438] sm:$0xff] }
 0x3a6   : > { %3595 = vst [vmem:[%s5748_s17 + $0x318] sm:$0xff] %v2968_v22  ;;  %v2848_v21 = vpop.f32.mrf.mxu0  ;;  %v2345_v31 = vsel %vm2342_vm1, %v2344_v46, %v2340_v0  ;;  %v2375_v1 = vmul.f32 %v6358_v57, %v6316_v18  ;;  %v2372_v7 = vor.u32 1.1754944e-38, %v2371_v59  ;;  %v797_v22 = vld [vmem:[%s5255_s22 + $0x430] sm:$0xff]  ;;  %vm2370_vm9 = vcmp.eq.f32.partialorder %v2369_v51, 8.507059e+37  ;;  %v795_v46 = vld [vmem:[%s5255_s22 + $0x420] sm:$0xff]  ;;  %3388 = vmatpush.msrb.mxu1 %v796_v24 }
 0x3a7   : > { %v2889_v62 = vpop.f32.mrf.mxu1  ;;  %3600 = vst [vmem:[%s5748_s17 + $0x340] sm:$0xff] %v2848_v21  ;;  %v6363_v58 = vmul.f32 %v5989_v27, %v2345_v31  ;;  %v2354_v27 = vsel %vm6368_vm4, %v6278_v40, %v2350_v32  ;;  %vm2356_vm5 = vcmp.eq.f32.partialorder %v2355_v45, 8.507059e+37  ;;  %v2364_v10 = vadd.f32 %v6319_v17, %v2363_v54  ;;  %v6397_v16 = vpop.eup %4195  ;;  %3429 = vmatpush.msrb.mxu2 %v797_v22 }
 0x3a8   : > { %3601 = vst [vmem:[%s5748_s17 + $0x348] sm:$0xff] %v2889_v62  ;;  %v2359_v40 = vsel %vm2356_vm5, %v2358_v35, %v2354_v27  ;;  %v2376_v34 = vsub.f32 1.0, %v2375_v1  ;;  %3470 = vmatpush.msrb.mxu3 %v798_v11  ;;  %vm2380_vm10 = vweird.f32 %v6358_v57  ;;  %v2383_v0 = vand.u32 2147483647, %v6316_v18  ;;  %3347 = vmatpush.msrb.mxu0 %v795_v46 }
 0x3a9   : > { %3960 = vmatmul.msk.f32.gmra.mxu0 %vm1863_vm0, %v6324_v41  ;;  %3968 = vmatmul.msk.f32.gmra.mxu1 %vm1863_vm0, %v6324_v41  ;;  %v6404_v49 = vmul.f32 %v5992_v48, %v2359_v40  ;;  %v2368_v19 = vsel %vm6407_vm8, %v6319_v17, %v2364_v10  ;;  %v2389_v48 = vmul.f32 %v6397_v16, %v6355_v43  ;;  %vm6444_vm12 = vmor %vm2379_vm11, %vm2380_vm10  ;;  %v2386_v18 = vor.u32 1.1754944e-38, %v2385_v15 }
 0x3aa   : > { %3976 = vmatmul.msk.f32.gmra.mxu2 %vm1863_vm0, %v6324_v41  ;;  %3984 = vmatmul.msk.f32.gmra.mxu3 %vm1863_vm0, %v6324_v41  ;;  %v2377_v42 = vmul.f32 %v6358_v57, %v2376_v34  ;;  %v2373_v2 = vsel %vm2370_vm9, %v2372_v7, %v2368_v19  ;;  %vm2384_vm13 = vcmp.eq.f32.partialorder %v2383_v0, 8.507059e+37  ;;  %vm2394_vm14 = vweird.f32 %v6397_v16 }
 0x3ab   : > { %v2390_v62 = vsub.f32 1.0, %v2389_v48  ;;  %v6434_v63 = vpop.eup %4197  ;;  %v6439_v37 = vmul.f32 %v5930_v53, %v2373_v2  ;;  %vm2393_vm15 = vweird.f32 %v6355_v43  ;;  %v2413_v35 = vand.u32 2147483648, %v6394_v9 }
 0x3ac   : > { %v2930_v25 = vpop.f32.mrf.mxu2  ;;  %v2378_v21 = vadd.f32 %v6358_v57, %v2377_v42  ;;  %v2403_v53 = vmul.f32 %v6434_v63, %v6394_v9  ;;  %vm2395_vm1 = vmor %vm2393_vm15, %vm2394_vm14  ;;  %vm2408_vm3 = vweird.f32 %v6434_v63  ;;  %vm2407_vm4 = vweird.f32 %v6394_v9 }
 0x3ad   : > { %v2971_v30 = vpop.f32.mrf.mxu3  ;;  %3602 = vst [vmem:[%s5748_s17 + $0x350] sm:$0xff] %v2930_v25  ;;  %v2391_v31 = vmul.f32 %v6397_v16, %v2390_v62  ;;  %vm2409_vm5 = vmor %vm2407_vm4, %vm2408_vm3 }
 0x3ae   : > { %3603 = vst [vmem:[%s5748_s17 + $0x358] sm:$0xff] %v2971_v30  ;;  %v2851_v20 = vpop.f32.mrf.mxu0  ;;  %v2382_v50 = vsel %vm6444_vm12, %v6358_v57, %v2378_v21  ;;  %v2404_v57 = vsub.f32 1.0, %v2403_v53 }
 0x3af   : > { %v2892_v61 = vpop.f32.mrf.mxu1  ;;  %3608 = vst [vmem:[%s5748_s17 + $0x380] sm:$0xff] %v2851_v20  ;;  %v2387_v25 = vsel %vm2384_vm13, %v2386_v18, %v2382_v50  ;;  %v2392_v32 = vadd.f32 %v6397_v16, %v2391_v31 }
 0x3b0   : > { %3609 = vst [vmem:[%s5748_s17 + $0x388] sm:$0xff] %v2892_v61  ;;  %v6471_v45 = vmul.f32 %v6039_v3, %v2387_v25  ;;  %v2405_v52 = vmul.f32 %v6434_v63, %v2404_v57  ;;  %v2400_v3 = vor.u32 1.1754944e-38, %v2399_v23 }
 0x3b1   : > { %3961 = vmatmul.msk.f32.gmra.mxu0 %vm1863_vm0, %v6363_v58  ;;  %3969 = vmatmul.msk.f32.gmra.mxu1 %vm1863_vm0, %v6363_v58  ;;  %v2396_v4 = vsel %vm2395_vm1, %v6397_v16, %v2392_v32 }
 0x3b2   : > { %3977 = vmatmul.msk.f32.gmra.mxu2 %vm1863_vm0, %v6363_v58  ;;  %3985 = vmatmul.msk.f32.gmra.mxu3 %vm1863_vm0, %v6363_v58  ;;  %v2401_v43 = vsel %vm2398_vm2, %v2400_v3, %v2396_v4  ;;  %v2406_v1 = vadd.f32 %v6434_v63, %v2405_v52 }
 0x3b3   : > { %v6493_v40 = vmul.f32 %v6034_v47, %v2401_v43  ;;  %v2414_v47 = vor.u32 1.1754944e-38, %v2413_v35 }
 0x3b4   : > { %v2933_v8 = vpop.f32.mrf.mxu2 }
 0x3b5   : > { %v2974_v38 = vpop.f32.mrf.mxu3  ;;  %3610 = vst [vmem:[%s5748_s17 + $0x390] sm:$0xff] %v2933_v8  ;;  %v2411_v8 = vand.u32 2147483647, %v6394_v9 }
 0x3b6   : > { %3611 = vst [vmem:[%s5748_s17 + $0x398] sm:$0xff] %v2974_v38  ;;  %v2854_v56 = vpop.f32.mrf.mxu0  ;;  %v2410_v38 = vsel %vm2409_vm5, %v6434_v63, %v2406_v1 }
 0x3b7   : > { %v2895_v5 = vpop.f32.mrf.mxu1  ;;  %3616 = vst [vmem:[%s5748_s17 + $0x3c0] sm:$0xff] %v2854_v56  ;;  %vm2412_vm6 = vcmp.eq.f32.partialorder %v2411_v8, 8.507059e+37 }
 0x3b8   : > { %3617 = vst [vmem:[%s5748_s17 + $0x3c8] sm:$0xff] %v2895_v5  ;;  %v2415_v10 = vsel %vm2412_vm6, %v2414_v47, %v2410_v38 }
 0x3b9   : > { %3962 = vmatmul.msk.f32.gmra.mxu0 %vm1863_vm0, %v6404_v49  ;;  %3970 = vmatmul.msk.f32.gmra.mxu1 %vm1863_vm0, %v6404_v49  ;;  %v6511_v56 = vmul.f32 %v6073_v36, %v2415_v10 }
 0x3ba   : > { %3978 = vmatmul.msk.f32.gmra.mxu2 %vm1863_vm0, %v6404_v49  ;;  %3986 = vmatmul.msk.f32.gmra.mxu3 %vm1863_vm0, %v6404_v49 }
 0x3bc   : > { %v2936_v17 = vpop.f32.mrf.mxu2 }
 0x3bd   : > { %v2977_v44 = vpop.f32.mrf.mxu3  ;;  %3618 = vst [vmem:[%s5748_s17 + $0x3d0] sm:$0xff] %v2936_v17 }
 0x3be   : > { %3619 = vst [vmem:[%s5748_s17 + $0x3d8] sm:$0xff] %v2977_v44  ;;  %v2997_v6 = vpop.f32.mrf.mxu0 }
 0x3bf   : > { %v3038_v12 = vpop.f32.mrf.mxu1  ;;  %3564 = vst [vmem:[%s5748_s17 + $0x220] sm:$0xff] %v2997_v6 }
 0x3c0   : > { %3565 = vst [vmem:[%s5748_s17 + $0x228] sm:$0xff] %v3038_v12 }
 0x3c1   : > { %3963 = vmatmul.msk.f32.gmra.mxu0 %vm1863_vm0, %v6439_v37  ;;  %3971 = vmatmul.msk.f32.gmra.mxu1 %vm1863_vm0, %v6439_v37 }
 0x3c2   : > { %3979 = vmatmul.msk.f32.gmra.mxu2 %vm1863_vm0, %v6439_v37  ;;  %3987 = vmatmul.msk.f32.gmra.mxu3 %vm1863_vm0, %v6439_v37 }
 0x3c4   : > { %v3079_v30 = vpop.f32.mrf.mxu2 }
 0x3c5   : > { %v3120_v39 = vpop.f32.mrf.mxu3  ;;  %3566 = vst [vmem:[%s5748_s17 + $0x230] sm:$0xff] %v3079_v30 }
 0x3c6   : > { %3567 = vst [vmem:[%s5748_s17 + $0x238] sm:$0xff] %v3120_v39  ;;  %v3000_v20 = vpop.f32.mrf.mxu0 }
 0x3c7   : > { %v3041_v61 = vpop.f32.mrf.mxu1  ;;  %3572 = vst [vmem:[%s5748_s17 + $0x260] sm:$0xff] %v3000_v20 }
 0x3c8   : > { %3573 = vst [vmem:[%s5748_s17 + $0x268] sm:$0xff] %v3041_v61 }
 0x3c9   : > { %3964 = vmatmul.msk.f32.gmra.mxu0 %vm1863_vm0, %v6471_v45  ;;  %3972 = vmatmul.msk.f32.gmra.mxu1 %vm1863_vm0, %v6471_v45 }
 0x3ca   : > { %3980 = vmatmul.msk.f32.gmra.mxu2 %vm1863_vm0, %v6471_v45  ;;  %3988 = vmatmul.msk.f32.gmra.mxu3 %vm1863_vm0, %v6471_v45 }
 0x3cc   : > { %v3082_v54 = vpop.f32.mrf.mxu2 }
 0x3cd   : > { %v3123_v27 = vpop.f32.mrf.mxu3  ;;  %3574 = vst [vmem:[%s5748_s17 + $0x270] sm:$0xff] %v3082_v54 }
 0x3ce   : > { %3575 = vst [vmem:[%s5748_s17 + $0x278] sm:$0xff] %v3123_v27  ;;  %v3003_v55 = vpop.f32.mrf.mxu0 }
 0x3cf   : > { %v3044_v60 = vpop.f32.mrf.mxu1  ;;  %3580 = vst [vmem:[%s5748_s17 + $0x2a0] sm:$0xff] %v3003_v55 }
 0x3d0   : > { %3581 = vst [vmem:[%s5748_s17 + $0x2a8] sm:$0xff] %v3044_v60 }
 0x3d1   : > { %3965 = vmatmul.msk.f32.gmra.mxu0 %vm1863_vm0, %v6493_v40  ;;  %3973 = vmatmul.msk.f32.gmra.mxu1 %vm1863_vm0, %v6493_v40 }
 0x3d2   : > { %3981 = vmatmul.msk.f32.gmra.mxu2 %vm1863_vm0, %v6493_v40  ;;  %3989 = vmatmul.msk.f32.gmra.mxu3 %vm1863_vm0, %v6493_v40 }
 0x3d4   : > { %v3085_v34 = vpop.f32.mrf.mxu2 }
 0x3d5   : > { %v3126_v9 = vpop.f32.mrf.mxu3  ;;  %3582 = vst [vmem:[%s5748_s17 + $0x2b0] sm:$0xff] %v3085_v34 }
 0x3d6   : > { %3583 = vst [vmem:[%s5748_s17 + $0x2b8] sm:$0xff] %v3126_v9  ;;  %v3006_v16 = vpop.f32.mrf.mxu0 }
 0x3d7   : > { %v3047_v59 = vpop.f32.mrf.mxu1  ;;  %3588 = vst [vmem:[%s5748_s17 + $0x2e0] sm:$0xff] %v3006_v16 }
 0x3d8   : > { %3589 = vst [vmem:[%s5748_s17 + $0x2e8] sm:$0xff] %v3047_v59 }
 0x3d9   : > { %3966 = vmatmul.msk.f32.gmra.mxu0 %vm1863_vm0, %v6511_v56  ;;  %3974 = vmatmul.msk.f32.gmra.mxu1 %vm1863_vm0, %v6511_v56 }
 0x3da   : > { %3982 = vmatmul.msk.f32.gmra.mxu2 %vm1863_vm0, %v6511_v56  ;;  %3990 = vmatmul.msk.f32.gmra.mxu3 %vm1863_vm0, %v6511_v56 }
 0x3dc   : > { %v3088_v5 = vpop.f32.mrf.mxu2 }
 0x3dd   : > { %v3129_v51 = vpop.f32.mrf.mxu3  ;;  %3590 = vst [vmem:[%s5748_s17 + $0x2f0] sm:$0xff] %v3088_v5 }
 0x3de   : > { %3591 = vst [vmem:[%s5748_s17 + $0x2f8] sm:$0xff] %v3129_v51  ;;  %v3009_v36 = vpop.f32.mrf.mxu0 }
 0x3df   : > { %v3050_v29 = vpop.f32.mrf.mxu1  ;;  %3596 = vst [vmem:[%s5748_s17 + $0x320] sm:$0xff] %v3009_v36 }
 0x3e0   : > { %3597 = vst [vmem:[%s5748_s17 + $0x328] sm:$0xff] %v3050_v29 }
 0x3e1   : > { %3991 = vmatmul.msk.f32.vlgmr.msrb.gmra.mxu0 %vm1863_vm0, %v6285_v28  ;;  %3999 = vmatmul.msk.f32.vlgmr.msrb.gmra.mxu1 %vm1863_vm0, %v6285_v28 }
 0x3e2   : > { %4007 = vmatmul.msk.f32.vlgmr.msrb.gmra.mxu2 %vm1863_vm0, %v6285_v28  ;;  %4015 = vmatmul.msk.f32.vlgmr.msrb.gmra.mxu3 %vm1863_vm0, %v6285_v28 }
 0x3e4   : > { %v3091_v33 = vpop.f32.mrf.mxu2 }
 0x3e5   : > { %v3132_v14 = vpop.f32.mrf.mxu3  ;;  %3598 = vst [vmem:[%s5748_s17 + $0x330] sm:$0xff] %v3091_v33 }
 0x3e6   : > { %3599 = vst [vmem:[%s5748_s17 + $0x338] sm:$0xff] %v3132_v14  ;;  %v3012_v19 = vpop.f32.mrf.mxu0 }
 0x3e7   : > { %v3053_v42 = vpop.f32.mrf.mxu1  ;;  %3604 = vst [vmem:[%s5748_s17 + $0x360] sm:$0xff] %v3012_v19 }
 0x3e8   : > { %3605 = vst [vmem:[%s5748_s17 + $0x368] sm:$0xff] %v3053_v42 }
 0x3e9   : > { %3992 = vmatmul.msk.f32.gmra.mxu0 %vm1863_vm0, %v6324_v41  ;;  %4000 = vmatmul.msk.f32.gmra.mxu1 %vm1863_vm0, %v6324_v41 }
 0x3ea   : > { %4008 = vmatmul.msk.f32.gmra.mxu2 %vm1863_vm0, %v6324_v41  ;;  %4016 = vmatmul.msk.f32.gmra.mxu3 %vm1863_vm0, %v6324_v41 }
 0x3ec   : > { %v3094_v28 = vpop.f32.mrf.mxu2 }
 0x3ed   : > { %v3135_v48 = vpop.f32.mrf.mxu3  ;;  %3606 = vst [vmem:[%s5748_s17 + $0x370] sm:$0xff] %v3094_v28 }
 0x3ee   : > { %3607 = vst [vmem:[%s5748_s17 + $0x378] sm:$0xff] %v3135_v48  ;;  %v3015_v7 = vpop.f32.mrf.mxu0 }
 0x3ef   : > { %v3056_v22 = vpop.f32.mrf.mxu1  ;;  %3612 = vst [vmem:[%s5748_s17 + $0x3a0] sm:$0xff] %v3015_v7 }
 0x3f0   : > { %3613 = vst [vmem:[%s5748_s17 + $0x3a8] sm:$0xff] %v3056_v22 }
 0x3f1   : > { %3993 = vmatmul.msk.f32.gmra.mxu0 %vm1863_vm0, %v6363_v58  ;;  %4001 = vmatmul.msk.f32.gmra.mxu1 %vm1863_vm0, %v6363_v58 }
 0x3f2   : > { %4009 = vmatmul.msk.f32.gmra.mxu2 %vm1863_vm0, %v6363_v58  ;;  %4017 = vmatmul.msk.f32.gmra.mxu3 %vm1863_vm0, %v6363_v58 }
 0x3f4   : > { %v3097_v41 = vpop.f32.mrf.mxu2 }
 0x3f5   : > { %v3138_v11 = vpop.f32.mrf.mxu3  ;;  %3614 = vst [vmem:[%s5748_s17 + $0x3b0] sm:$0xff] %v3097_v41 }
 0x3f6   : > { %3615 = vst [vmem:[%s5748_s17 + $0x3b8] sm:$0xff] %v3138_v11  ;;  %v3018_v2 = vpop.f32.mrf.mxu0 }
 0x3f7   : > { %v3059_v17 = vpop.f32.mrf.mxu1  ;;  %3620 = vst [vmem:[%s5748_s17 + $0x3e0] sm:$0xff] %v3018_v2 }
 0x3f8   : > { %3621 = vst [vmem:[%s5748_s17 + $0x3e8] sm:$0xff] %v3059_v17 }
 0x3f9   : > { %3994 = vmatmul.msk.f32.gmra.mxu0 %vm1863_vm0, %v6404_v49  ;;  %4002 = vmatmul.msk.f32.gmra.mxu1 %vm1863_vm0, %v6404_v49 }
 0x3fa   : > { %4010 = vmatmul.msk.f32.gmra.mxu2 %vm1863_vm0, %v6404_v49  ;;  %4018 = vmatmul.msk.f32.gmra.mxu3 %vm1863_vm0, %v6404_v49 }
 0x3fc   : > { %v3100_v58 = vpop.f32.mrf.mxu2 }
 0x3fd   : > { %v3141_v44 = vpop.f32.mrf.mxu3  ;;  %3622 = vst [vmem:[%s5748_s17 + $0x3f0] sm:$0xff] %v3100_v58 }
 0x3fe   : > { %3623 = vst [vmem:[%s5748_s17 + $0x3f8] sm:$0xff] %v3141_v44 }
 0x401   : > { %3995 = vmatmul.msk.f32.gmra.mxu0 %vm1863_vm0, %v6439_v37  ;;  %4003 = vmatmul.msk.f32.gmra.mxu1 %vm1863_vm0, %v6439_v37 }
 0x402   : > { %4011 = vmatmul.msk.f32.gmra.mxu2 %vm1863_vm0, %v6439_v37  ;;  %4019 = vmatmul.msk.f32.gmra.mxu3 %vm1863_vm0, %v6439_v37 }
 0x409   : > { %3996 = vmatmul.msk.f32.gmra.mxu0 %vm1863_vm0, %v6471_v45  ;;  %4004 = vmatmul.msk.f32.gmra.mxu1 %vm1863_vm0, %v6471_v45 }
 0x40a   : > { %4012 = vmatmul.msk.f32.gmra.mxu2 %vm1863_vm0, %v6471_v45  ;;  %4020 = vmatmul.msk.f32.gmra.mxu3 %vm1863_vm0, %v6471_v45 }
 0x411   : > { %3997 = vmatmul.msk.f32.gmra.mxu0 %vm1863_vm0, %v6493_v40  ;;  %4005 = vmatmul.msk.f32.gmra.mxu1 %vm1863_vm0, %v6493_v40 }
 0x412   : > { %4013 = vmatmul.msk.f32.gmra.mxu2 %vm1863_vm0, %v6493_v40  ;;  %4021 = vmatmul.msk.f32.gmra.mxu3 %vm1863_vm0, %v6493_v40 }
 0x419   : > { %3998 = vmatmul.msk.f32.gmra.mxu0 %vm1863_vm0, %v6511_v56  ;;  %4006 = vmatmul.msk.f32.gmra.mxu1 %vm1863_vm0, %v6511_v56 }
 0x41a   : > { %4014 = vmatmul.msk.f32.gmra.mxu2 %vm1863_vm0, %v6511_v56  ;;  %4022 = vmatmul.msk.f32.gmra.mxu3 %vm1863_vm0, %v6511_v56 }
 0x41e   : > { %v3185_v49 = vpop.f32.mrf.mxu0  ;;  %v3226_v21 = vpop.f32.mrf.mxu1 }
 0x41f   : > { %3624 = vst [vmem:[%s5748_s17 + $0x400] sm:$0xff] %v3185_v49 }
 0x420   : > { %3625 = vst [vmem:[%s5748_s17 + $0x408] sm:$0xff] %v3226_v21 }
 0x425   : > { %v3267_v62 = vpop.f32.mrf.mxu2  ;;  %v3308_v63 = vpop.f32.mrf.mxu3 }
 0x426   : > { %3626 = vst [vmem:[%s5748_s17 + $0x410] sm:$0xff] %v3267_v62  ;;  %v3188_v15 = vpop.f32.mrf.mxu0  ;;  %v3229_v6 = vpop.f32.mrf.mxu1 }
 0x427   : > { %3627 = vst [vmem:[%s5748_s17 + $0x418] sm:$0xff] %v3308_v63 }
 0x428   : > { %3632 = vst [vmem:[%s5748_s17 + $0x440] sm:$0xff] %v3188_v15 }
 0x429   : > { %3633 = vst [vmem:[%s5748_s17 + $0x448] sm:$0xff] %v3229_v6 }
 0x42d   : > { %v3270_v12 = vpop.f32.mrf.mxu2  ;;  %v3311_v37 = vpop.f32.mrf.mxu3 }
 0x42e   : > { %3634 = vst [vmem:[%s5748_s17 + $0x450] sm:$0xff] %v3270_v12  ;;  %v3191_v0 = vpop.f32.mrf.mxu0  ;;  %v3232_v26 = vpop.f32.mrf.mxu1 }
 0x42f   : > { %3635 = vst [vmem:[%s5748_s17 + $0x458] sm:$0xff] %v3311_v37 }
 0x430   : > { %3640 = vst [vmem:[%s5748_s17 + $0x480] sm:$0xff] %v3191_v0 }
 0x431   : > { %3641 = vst [vmem:[%s5748_s17 + $0x488] sm:$0xff] %v3232_v26 }
 0x435   : > { %v3273_v46 = vpop.f32.mrf.mxu2  ;;  %v3314_v24 = vpop.f32.mrf.mxu3 }
 0x436   : > { %3642 = vst [vmem:[%s5748_s17 + $0x490] sm:$0xff] %v3273_v46  ;;  %v3194_v50 = vpop.f32.mrf.mxu0  ;;  %v3235_v31 = vpop.f32.mrf.mxu1 }
 0x437   : > { %3643 = vst [vmem:[%s5748_s17 + $0x498] sm:$0xff] %v3314_v24 }
 0x438   : > { %3648 = vst [vmem:[%s5748_s17 + $0x4c0] sm:$0xff] %v3194_v50 }
 0x439   : > { %3649 = vst [vmem:[%s5748_s17 + $0x4c8] sm:$0xff] %v3235_v31 }
 0x43d   : > { %v3276_v53 = vpop.f32.mrf.mxu2  ;;  %v3317_v18 = vpop.f32.mrf.mxu3 }
 0x43e   : > { %3650 = vst [vmem:[%s5748_s17 + $0x4d0] sm:$0xff] %v3276_v53  ;;  %v3197_v25 = vpop.f32.mrf.mxu0  ;;  %v3238_v30 = vpop.f32.mrf.mxu1 }
 0x43f   : > { %3651 = vst [vmem:[%s5748_s17 + $0x4d8] sm:$0xff] %v3317_v18 }
 0x440   : > { %3656 = vst [vmem:[%s5748_s17 + $0x500] sm:$0xff] %v3197_v25 }
 0x441   : > { %3657 = vst [vmem:[%s5748_s17 + $0x508] sm:$0xff] %v3238_v30 }
 0x445   : > { %v3279_v39 = vpop.f32.mrf.mxu2  ;;  %v3320_v32 = vpop.f32.mrf.mxu3 }
 0x446   : > { %3658 = vst [vmem:[%s5748_s17 + $0x510] sm:$0xff] %v3279_v39  ;;  %v3200_v57 = vpop.f32.mrf.mxu0  ;;  %v3241_v23 = vpop.f32.mrf.mxu1 }
 0x447   : > { %3659 = vst [vmem:[%s5748_s17 + $0x518] sm:$0xff] %v3320_v32 }
 0x448   : > { %3664 = vst [vmem:[%s5748_s17 + $0x540] sm:$0xff] %v3200_v57 }
 0x449   : > { %3665 = vst [vmem:[%s5748_s17 + $0x548] sm:$0xff] %v3241_v23 }
 0x44d   : > { %v3282_v20 = vpop.f32.mrf.mxu2  ;;  %v3323_v61 = vpop.f32.mrf.mxu3 }
 0x44e   : > { %3666 = vst [vmem:[%s5748_s17 + $0x550] sm:$0xff] %v3282_v20  ;;  %v3203_v45 = vpop.f32.mrf.mxu0  ;;  %v3244_v13 = vpop.f32.mrf.mxu1 }
 0x44f   : > { %3667 = vst [vmem:[%s5748_s17 + $0x558] sm:$0xff] %v3323_v61 }
 0x450   : > { %3672 = vst [vmem:[%s5748_s17 + $0x580] sm:$0xff] %v3203_v45 }
 0x451   : > { %3673 = vst [vmem:[%s5748_s17 + $0x588] sm:$0xff] %v3244_v13 }
 0x455   : > { %v3285_v4 = vpop.f32.mrf.mxu2  ;;  %v3326_v52 = vpop.f32.mrf.mxu3 }
 0x456   : > { %3674 = vst [vmem:[%s5748_s17 + $0x590] sm:$0xff] %v3285_v4  ;;  %v3206_v3 = vpop.f32.mrf.mxu0  ;;  %v3247_v43 = vpop.f32.mrf.mxu1 }
 0x457   : > { %3675 = vst [vmem:[%s5748_s17 + $0x598] sm:$0xff] %v3326_v52 }
 0x458   : > { %3680 = vst [vmem:[%s5748_s17 + $0x5c0] sm:$0xff] %v3206_v3 }
 0x459   : > { %3681 = vst [vmem:[%s5748_s17 + $0x5c8] sm:$0xff] %v3247_v43 }
 0x45d   : > { %v3288_v54 = vpop.f32.mrf.mxu2  ;;  %v3329_v27 = vpop.f32.mrf.mxu3 }
 0x45e   : > { %3682 = vst [vmem:[%s5748_s17 + $0x5d0] sm:$0xff] %v3288_v54  ;;  %v3349_v1 = vpop.f32.mrf.mxu0  ;;  %v3390_v35 = vpop.f32.mrf.mxu1 }
 0x45f   : > { %3683 = vst [vmem:[%s5748_s17 + $0x5d8] sm:$0xff] %v3329_v27 }
 0x460   : > { %3628 = vst [vmem:[%s5748_s17 + $0x420] sm:$0xff] %v3349_v1 }
 0x461   : > { %3629 = vst [vmem:[%s5748_s17 + $0x428] sm:$0xff] %v3390_v35 }
 0x465   : > { %v3431_v55 = vpop.f32.mrf.mxu2  ;;  %v3472_v60 = vpop.f32.mrf.mxu3 }
 0x466   : > { %3630 = vst [vmem:[%s5748_s17 + $0x430] sm:$0xff] %v3431_v55  ;;  %v3352_v40 = vpop.f32.mrf.mxu0  ;;  %v3393_v8 = vpop.f32.mrf.mxu1 }
 0x467   : > { %3631 = vst [vmem:[%s5748_s17 + $0x438] sm:$0xff] %v3472_v60 }
 0x468   : > { %3636 = vst [vmem:[%s5748_s17 + $0x460] sm:$0xff] %v3352_v40 }
 0x469   : > { %3637 = vst [vmem:[%s5748_s17 + $0x468] sm:$0xff] %v3393_v8 }
 0x46d   : > { %v3434_v38 = vpop.f32.mrf.mxu2  ;;  %v3475_v47 = vpop.f32.mrf.mxu3 }
 0x46e   : > { %3638 = vst [vmem:[%s5748_s17 + $0x470] sm:$0xff] %v3434_v38  ;;  %v3355_v10 = vpop.f32.mrf.mxu0  ;;  %v3396_v34 = vpop.f32.mrf.mxu1 }
 0x46f   : > { %3639 = vst [vmem:[%s5748_s17 + $0x478] sm:$0xff] %v3475_v47 }
 0x470   : > { %3644 = vst [vmem:[%s5748_s17 + $0x4a0] sm:$0xff] %v3355_v10 }
 0x471   : > { %3645 = vst [vmem:[%s5748_s17 + $0x4a8] sm:$0xff] %v3396_v34 }
 0x475   : > { %v3437_v9 = vpop.f32.mrf.mxu2  ;;  %v3478_v16 = vpop.f32.mrf.mxu3 }
 0x476   : > { %3646 = vst [vmem:[%s5748_s17 + $0x4b0] sm:$0xff] %v3437_v9  ;;  %v3358_v59 = vpop.f32.mrf.mxu0  ;;  %v3399_v56 = vpop.f32.mrf.mxu1 }
 0x477   : > { %3647 = vst [vmem:[%s5748_s17 + $0x4b8] sm:$0xff] %v3478_v16 }
 0x478   : > { %3652 = vst [vmem:[%s5748_s17 + $0x4e0] sm:$0xff] %v3358_v59 }
 0x479   : > { %3653 = vst [vmem:[%s5748_s17 + $0x4e8] sm:$0xff] %v3399_v56 }
 0x47d   : > { %v3440_v5 = vpop.f32.mrf.mxu2  ;;  %v3481_v51 = vpop.f32.mrf.mxu3 }
 0x47e   : > { %3654 = vst [vmem:[%s5748_s17 + $0x4f0] sm:$0xff] %v3440_v5  ;;  %v3361_v36 = vpop.f32.mrf.mxu0  ;;  %v3402_v29 = vpop.f32.mrf.mxu1 }
 0x47f   : > { %3655 = vst [vmem:[%s5748_s17 + $0x4f8] sm:$0xff] %v3481_v51 }
 0x480   : > { %3660 = vst [vmem:[%s5748_s17 + $0x520] sm:$0xff] %v3361_v36 }
 0x481   : > { %3661 = vst [vmem:[%s5748_s17 + $0x528] sm:$0xff] %v3402_v29 }
 0x485   : > { %v3443_v33 = vpop.f32.mrf.mxu2  ;;  %v3484_v14 = vpop.f32.mrf.mxu3 }
 0x486   : > { %3662 = vst [vmem:[%s5748_s17 + $0x530] sm:$0xff] %v3443_v33  ;;  %v3364_v19 = vpop.f32.mrf.mxu0  ;;  %v3405_v42 = vpop.f32.mrf.mxu1 }
 0x487   : > { %3663 = vst [vmem:[%s5748_s17 + $0x538] sm:$0xff] %v3484_v14 }
 0x488   : > { %3668 = vst [vmem:[%s5748_s17 + $0x560] sm:$0xff] %v3364_v19 }
 0x489   : > { %3669 = vst [vmem:[%s5748_s17 + $0x568] sm:$0xff] %v3405_v42 }
 0x48d   : > { %v3446_v28 = vpop.f32.mrf.mxu2  ;;  %v3487_v48 = vpop.f32.mrf.mxu3 }
 0x48e   : > { %3670 = vst [vmem:[%s5748_s17 + $0x570] sm:$0xff] %v3446_v28  ;;  %v3367_v7 = vpop.f32.mrf.mxu0  ;;  %v3408_v22 = vpop.f32.mrf.mxu1 }
 0x48f   : > { %3671 = vst [vmem:[%s5748_s17 + $0x578] sm:$0xff] %v3487_v48 }
 0x490   : > { %3676 = vst [vmem:[%s5748_s17 + $0x5a0] sm:$0xff] %v3367_v7 }
 0x491   : > { %3677 = vst [vmem:[%s5748_s17 + $0x5a8] sm:$0xff] %v3408_v22 }
 0x495   : > { %v3449_v41 = vpop.f32.mrf.mxu2  ;;  %v3490_v11 = vpop.f32.mrf.mxu3 }
 0x496   : > { %3678 = vst [vmem:[%s5748_s17 + $0x5b0] sm:$0xff] %v3449_v41  ;;  %v3370_v2 = vpop.f32.mrf.mxu0  ;;  %v3411_v17 = vpop.f32.mrf.mxu1 }
 0x497   : > { %3679 = vst [vmem:[%s5748_s17 + $0x5b8] sm:$0xff] %v3490_v11 }
 0x498   : > { %3684 = vst [vmem:[%s5748_s17 + $0x5e0] sm:$0xff] %v3370_v2 }
 0x499   : > { %3685 = vst [vmem:[%s5748_s17 + $0x5e8] sm:$0xff] %v3411_v17 }
 0x49d   : > { %v3452_v58 = vpop.f32.mrf.mxu2  ;;  %v3493_v44 = vpop.f32.mrf.mxu3 }
 0x49e   : > { %3686 = vst [vmem:[%s5748_s17 + $0x5f0] sm:$0xff] %v3452_v58 }
 0x49f   : > { %3687 = vst [vmem:[%s5748_s17 + $0x5f8] sm:$0xff] %v3493_v44 }
 0x4a0   : > { %4316 = shalt.err (!%p4313_p7)
}
 0x4a1   : > { %s4363_s0 = smov 1024   ;;  %s4364_s26 = smov 64  }
 0x4a2   : > { %4049 = dma.vmem_to_hbm [thread:$0]  (%p4431_p11), %s3703_s29, 24576, %s3705_s1, %s3689_s16, %s4363_s0, %s4363_s0, %s4364_s26  }
 0x4a3 PF: > { %s3719_s27 = sand.u32 1, %s4347_s12   ;;  %p4062_p0 = pnand %p3823_p9, %p4435_p12 }
 0x4a4   : > { %s3720_s28 = scalar_lea.sflag [#allocation4], %s3719_s27 }
 0x4a5   : > { %p4063_p8 = pneg %p4062_p0 }
 0x4a7   : > { %4342 = dma.done.wait (%p4063_p8), %s3720_s28, 24576  }
 0x4a8   : > { %4344 = vsyncadd (%p4063_p8), %s3720_s28, 4294942720  ;;  %s6783_s9 = sld [smem:[#allocation12_spill]]  ;;  %p19_p10 = scmp.ge.s32.totalorder %s4410_s18, 4  }
 0x4a9   : > { %s6784_s12 = smov %s4351_s13  ;;  %s6785_s13 = smov %s4355_s14 }
 0x4aa   : > { %s6787_s15 = smov %s4410_s18  ;;  %21 = sbr.rel (!%p19_p10) target bundleno = 10 (0xa), region = 101 }
 0x4ae   : > { %s6786_s14 = smov %s6783_s9 }
 0x4af   :  { %3726 = vsyncpa [#allocation3], 1 }
 0x4b0   :  { %3728 = vsyncpa [#allocation3 + $0x1], 1 }
 0x4b1   :  { %3729 = vsyncpa [#allocation6], 1 }
 0x4b2   :  { %3731 = vsyncpa [#allocation6 + $0x1], 1 }
 0x4b3   :  { %3732 = vsyncpa [#allocation4], 1 }
 0x4b4   :  { %3734 = vsyncpa [#allocation4 + $0x1], 1 }

</bundles_post_ra>
